<compile_context>
chip_gen: v6e
topology: v6e:2x2x1
jax: 0.10.0
libtpu: 0.0.40
codegen_flags: <defaults>
</compile_context>

<pallas_src>
import functools

import numpy as np
import jax
import jax.numpy as jnp
from jax import lax
from jax.experimental import pallas as pl
from jax.experimental.pallas import tpu as pltpu

LAMBDA_SOFTMAX = 9.0
LAMBDA_LSE = 6.0
MARGIN = 0.2
EPS = 1e-8


# --------------------------------------------------------------------------
# Kernel: one (caption-block i, image-tile j) grid step of the t2i
# cross-attention similarity matrix.  cap_lens arrives via scalar prefetch.
# --------------------------------------------------------------------------
def _xattn_t2i_block_kernel(cap_len_ref, im_ref, cap_ref, out_ref,
                            capn_ref, valid_ref):
    """
    im_ref   : (TB, R, D)   image-region features (input dtype; bf16 ok)
    cap_ref  : (TN, W, D)   caption-word features of caption block i
    out_ref  : (1, TB, TN)  sims[image, caption] for this tile (lane-dense)
    capn_ref : (TN*W, D)    scratch: L2-normalized caption words (per block i)
    valid_ref: (1, TN*W)    scratch: 1.0 for real words, 0.0 for padding
    """
    i = pl.program_id(0)          # caption-block index (megacore "parallel")
    j = pl.program_id(1)          # image-tile index (innermost, "arbitrary")
    TB, R, D = im_ref.shape
    TN, W, _ = cap_ref.shape
    M = TN * W

    # ---- caption-only work: once per caption block (j == 0), reused across
    #      all image tiles (hoisted out of the per-image work).
    @pl.when(j == 0)
    def _():
        cap_f = cap_ref[...].reshape(M, D).astype(jnp.float32)
        inv_w1 = lax.rsqrt(jnp.sum(cap_f * cap_f, axis=1, keepdims=True) + EPS)
        capn_ref[...] = cap_f * inv_w1                      # normalized words
        word = lax.broadcasted_iota(jnp.int32, (1, M), 1)
        base = i * TN
        valid = jnp.zeros((1, M), jnp.float32)
        for t in range(TN):                                 # static unroll
            lo = t * W
            sel = (word >= lo) & (word < lo + cap_len_ref[base + t])
            valid = valid + sel.astype(jnp.float32)
        valid_ref[...] = valid

    im = im_ref[...]                                        # (TB, R, D)
    cap2 = cap_ref[...].reshape(M, D)                       # (M, D)
    valid = valid_ref[...]                                  # (1, M)

    # static word -> caption segment matrices: grouped (per-caption) word
    # reductions run on the MXU with a lane-dense (., M) layout.
    m_a = lax.broadcasted_iota(jnp.int32, (M, TN), 0)
    t_a = lax.broadcasted_iota(jnp.int32, (M, TN), 1)
    seg = ((m_a >= t_a * W) & (m_a < (t_a + 1) * W)).astype(jnp.float32)
    m_b = lax.broadcasted_iota(jnp.int32, (TN, M), 1)
    t_b = lax.broadcasted_iota(jnp.int32, (TN, M), 0)
    seg_t = ((m_b >= t_b * W) & (m_b < (t_b + 1) * W)).astype(jnp.float32)

    # ---- attention logits: ONE matmul, image batch folded into M = TB*R ----
    im2 = im.reshape(TB * R, D)
    attn = lax.dot_general(im2, cap2, (((1,), (1,)), ((), ())),
                           preferred_element_type=jnp.float32)     # (TB*R, M)

    # clipped_l2norm: LeakyReLU(0.1), drop padded words, L2-norm over words.
    attn = jnp.where(attn > 0, attn, 0.1 * attn) * valid
    ssq = lax.dot_general(attn * attn, seg, (((1,), (0,)), ((), ())),
                          preferred_element_type=jnp.float32)      # (TB*R, TN)
    inv_nrm = lax.rsqrt(ssq + EPS)
    attn = attn * lax.dot_general(inv_nrm, seg_t, (((1,), (0,)), ((), ())),
                                  preferred_element_type=jnp.float32)

    # ---- smoothed softmax over image regions, per (image, word) ------------
    logits = (attn * LAMBDA_SOFTMAX).reshape(TB, R, M)
    mx = jnp.max(logits, axis=1, keepdims=True)
    e = jnp.exp(logits - mx)
    inv_s = pl.reciprocal(jnp.sum(e, axis=1, keepdims=True), approx=True)
    p = e * inv_s                                                  # (TB, R, M)
    max_attn = inv_s[:, 0, :]        # max_r softmax(r) == 1 / sum_r exp(.)

    # ---- weighted image context: batched MXU matmul (batch=TB, M, K=R, N=D)
    p_t = jnp.swapaxes(p, 1, 2).astype(im.dtype)                   # (TB, M, R)
    wc = jnp.einsum("bmr,brd->bmd", p_t, im,
                    preferred_element_type=jnp.float32)            # (TB, M, D)

    # ---- cosine similarity along the feature dim (lane-dense D reduction) --
    w12 = jnp.sum(capn_ref[...][None, :, :] * wc, axis=2)          # (TB, M)
    inv_w2 = lax.rsqrt(jnp.sum(wc * wc, axis=2) + EPS)
    row_sim = w12 * inv_w2

    # ---- LogSumExp over valid words, grouped per caption on the MXU --------
    ez = jnp.exp(row_sim * LAMBDA_LSE) * valid
    em = jnp.exp(max_attn * LAMBDA_LSE) * valid
    sz = lax.dot_general(ez, seg, (((1,), (0,)), ((), ())),
                         preferred_element_type=jnp.float32)       # (TB, TN)
    sm = lax.dot_general(em, seg, (((1,), (0,)), ((), ())),
                         preferred_element_type=jnp.float32)       # (TB, TN)
    out_ref[0] = (jnp.log(jnp.maximum(sz, 1e-30))
                  + 0.5 * jnp.log(jnp.maximum(sm, 1e-30))) * (1.0 / LAMBDA_LSE)


def xattn_score_t2i(images, captions, cap_lens, *, tn=None, tb=None,
                    vmem_limit_bytes=64 * 1024 * 1024):
    """scores[b, n] = t2i cross-attention similarity(image b, caption n)."""
    B, R, D = images.shape
    N, W, _ = captions.shape
    tn = N if tn is None else tn    # captions per grid step
    tb = B if tb is None else tb    # images per grid step (tile B for v7x VMEM)
    assert N % tn == 0 and B % tb == 0
    n_cap_blocks, n_im_blocks = N // tn, B // tb

    out = pl.pallas_call(
        _xattn_t2i_block_kernel,
        out_shape=jax.ShapeDtypeStruct((n_cap_blocks, B, tn), jnp.float32),
        grid_spec=pltpu.PrefetchScalarGridSpec(
            num_scalar_prefetch=1,
            grid=(n_cap_blocks, n_im_blocks),
            in_specs=[
                pl.BlockSpec((tb, R, D), lambda i, j, cl: (j, 0, 0)),   # images
                pl.BlockSpec((tn, W, D), lambda i, j, cl: (i, 0, 0)),   # captions
            ],
            out_specs=pl.BlockSpec((1, tb, tn), lambda i, j, cl: (i, j, 0)),
            scratch_shapes=[
                pltpu.VMEM((tn * W, D), jnp.float32),   # normalized caption words
                pltpu.VMEM((1, tn * W), jnp.float32),   # valid-word mask
            ],
        ),
        compiler_params=pltpu.CompilerParams(
            # caption axis may be megacore-sharded; image axis is "arbitrary"
            # because caption scratch is carried across it.
            dimension_semantics=("parallel", "arbitrary"),
            vmem_limit_bytes=vmem_limit_bytes,
        ),
    )(cap_lens, images, captions)
    # out[i, b, t] -> scores[b, i*tn + t]   (cheap XLA-side plumbing)
    return jnp.transpose(out, (1, 0, 2)).reshape(B, N)


def contrastive_loss(im, s, s_l, margin=MARGIN, *, tn=None, tb=None):
    """Contrastive hinge loss (max_violation=False).  Requires N == B."""
    scores = xattn_score_t2i(im, s, s_l, tn=tn, tb=tb)      # (B, N)
    n = scores.shape[0]
    diag = jnp.diagonal(scores).reshape(n, 1)
    eye = jnp.eye(n, dtype=bool)
    cost_s = jnp.maximum(margin + scores - diag, 0.0)
    cost_im = jnp.maximum(margin + scores - diag.T, 0.0)
    cost_s = jnp.where(eye, 0.0, cost_s)
    cost_im = jnp.where(eye, 0.0, cost_im)
    return jnp.sum(cost_s) + jnp.sum(cost_im)


# --------------------------------------------------------------------------
# Pure numpy reference (mirrors the PyTorch code) for a sanity check.
# --------------------------------------------------------------------------
def _reference_loss(im, s, s_l, margin=MARGIN):
    im = np.asarray(im, dtype=np.float64)
    s = np.asarray(s, dtype=np.float64)
    B = im.shape[0]
    N = s.shape[0]
    sims = np.zeros((B, N))
    for i in range(N):
        nw = int(s_l[i])
        cap = s[i, :nw, :]                                        # (nw, D)
        attn = np.einsum("brd,wd->brw", im, cap)                  # (B, R, nw)
        attn = np.where(attn > 0, attn, 0.1 * attn)               # LeakyReLU(0.1)
        attn = attn / (np.sqrt((attn ** 2).sum(2, keepdims=True)) + EPS)
        attn = np.transpose(attn, (0, 2, 1)) * LAMBDA_SOFTMAX     # (B, nw, R)
        attn = attn - attn.max(2, keepdims=True)
        attn = np.exp(attn)
        p = attn / attn.sum(2, keepdims=True)
        max_attn = p.max(2)                                       # (B, nw)
        wc = np.einsum("bwr,brd->bwd", p, im)                     # (B, nw, D)
        w12 = (cap[None] * wc).sum(2)
        w1 = np.sqrt((cap ** 2).sum(1))[None]
        w2 = np.sqrt((wc ** 2).sum(2))
        row_sim = w12 / np.maximum(w1 * w2, EPS)
        row_agg = np.log(np.exp(row_sim * LAMBDA_LSE).sum(1)) / LAMBDA_LSE
        max_agg = np.log(np.exp(max_attn * LAMBDA_LSE).sum(1)) / LAMBDA_LSE
        sims[:, i] = row_agg + 0.5 * max_agg
    diag = np.diag(sims)[:, None]
    cost_s = np.clip(margin + sims - diag, 0, None)
    cost_im = np.clip(margin + sims - diag.T, 0, None)
    np.fill_diagonal(cost_s, 0.0)
    np.fill_diagonal(cost_im, 0.0)
    return cost_s.sum() + cost_im.sum()


if __name__ == "__main__":
    # small, (8, 128)-friendly shapes; n_image == n_caption required by diag()
    B = N = 16
    R, W, D = 8, 8, 128
    key = jax.random.PRNGKey(0)
    k1, k2 = jax.random.split(key)
    im = jax.random.normal(k1, (B, R, D), dtype=jnp.float32) * 0.5
    s = jax.random.normal(k2, (N, W, D), dtype=jnp.float32) * 0.5
    s_l = jnp.array([8, 5, 7, 3, 6, 8, 4, 2, 7, 6, 5, 8, 3, 4, 6, 7],
                    dtype=jnp.int32)

    # tn=8 captions / tb=8 images per grid step -> 2x2 grid (exercises blocking)
    loss_fn = jax.jit(functools.partial(contrastive_loss, tn=8, tb=8))
    loss = jax.block_until_ready(loss_fn(im, s, s_l))

    ref = _reference_loss(np.asarray(im), np.asarray(s), np.asarray(s_l))
    np.testing.assert_allclose(float(loss), float(ref), rtol=1e-2, atol=1e-2)

    print("KERNEL_OK")
</pallas_src>

<mosaic_0001>
module attributes {stable_mosaic.version = 11 : i64} {
  func.func @_xattn_t2i_block_kernel(%arg0: i32, %arg1: i32, %arg2: memref<16xi32, #tpu.memory_space<smem>>, %arg3: memref<8x8x128xf32, #tpu.memory_space<vmem>>, %arg4: memref<8x8x128xf32, #tpu.memory_space<vmem>>, %arg5: memref<1x8x8xf32, #tpu.memory_space<vmem>>, %arg6: memref<64x128xf32, #tpu.memory_space<vmem>>, %arg7: memref<1x64xf32, #tpu.memory_space<vmem>>) attributes {dimension_semantics = [#tpu.dimension_semantics<parallel>, #tpu.dimension_semantics<arbitrary>], iteration_bounds = array<i64: 2, 2>, scalar_prefetch = 1 : i64, scratch_operands = 2 : i64, tpu.core_type = #tpu.core_type<tc>, window_params = [{transform_indices = @transform_0, window_bounds = array<i64: 8, 8, 128>}, {transform_indices = @transform_1, window_bounds = array<i64: 8, 8, 128>}, {transform_indices = @transform_2, window_bounds = array<i64: 1, 8, 8>}]} {
    %c0_i32 = arith.constant 0 : i32
    %0 = arith.cmpi eq, %arg1, %c0_i32 : i32
    %1 = arith.extui %0 : i1 to i32
    %c0_i32_0 = arith.constant 0 : i32
    %2 = arith.cmpi ne, %1, %c0_i32_0 : i32
    scf.if %2 {
      %c0_37 = arith.constant 0 : index
      %c0_38 = arith.constant 0 : index
      %c0_39 = arith.constant 0 : index
      %102 = vector.load %arg4[%c0_37, %c0_38, %c0_39] : memref<8x8x128xf32, #tpu.memory_space<vmem>>, vector<8x8x128xf32>
      %103 = vector.shape_cast %102 : vector<8x8x128xf32> to vector<64x128xf32>
      %104 = arith.mulf %103, %103 : vector<64x128xf32>
      %cst_40 = arith.constant dense<0.000000e+00> : vector<64xf32>
      %105 = vector.multi_reduction <add>, %104, %cst_40 [1] : vector<64x128xf32> to vector<64xf32>
      %106 = vector.shape_cast %105 : vector<64xf32> to vector<64x1xf32>
      %cst_41 = arith.constant 9.99999993E-9 : f32
      %107 = vector.broadcast %cst_41 : f32 to vector<64x1xf32>
      %108 = arith.addf %106, %107 : vector<64x1xf32>
      %109 = math.rsqrt %108 : vector<64x1xf32>
      %110 = vector.broadcast %109 : vector<64x1xf32> to vector<64x128xf32>
      %111 = arith.mulf %103, %110 : vector<64x128xf32>
      %c0_42 = arith.constant 0 : index
      %c0_43 = arith.constant 0 : index
      %112 = vector.load %arg6[%c0_42, %c0_43] : memref<64x128xf32, #tpu.memory_space<vmem>>, vector<64x128xf32>
      tpu.vector_store %arg6[%c0_42, %c0_43], %111 {strides = array<i32>} : memref<64x128xf32, #tpu.memory_space<vmem>>, vector<64x128xf32>,
      %113 = tpu.iota {dimensions = array<i32: 1>} : vector<1x64xi32>
      %c8_i32_44 = arith.constant 8 : i32
      %114 = arith.muli %arg0, %c8_i32_44 : i32
      %cst_45 = arith.constant 0.000000e+00 : f32
      %115 = vector.broadcast %cst_45 : f32 to vector<1x64xf32>
      %c0_i32_46 = arith.constant 0 : i32
      %116 = vector.broadcast %c0_i32_46 : i32 to vector<1x64xi32>
      %117 = arith.cmpi sge, %113, %116 : vector<1x64xi32>
      %c0_i32_47 = arith.constant 0 : i32
      %118 = arith.addi %114, %c0_i32_47 : i32
      %119 = arith.index_cast %118 : i32 to index
      %120 = memref.load %arg2[%119] : memref<16xi32, #tpu.memory_space<smem>>
      %c0_i32_48 = arith.constant 0 : i32
      %121 = arith.addi %c0_i32_48, %120 : i32
      %122 = vector.broadcast %121 : i32 to vector<1x64xi32>
      %123 = arith.cmpi slt, %113, %122 : vector<1x64xi32>
      %124 = arith.andi %117, %123 : vector<1x64xi1>
      %125 = arith.extui %124 : vector<1x64xi1> to vector<1x64xi32>
      %126 = arith.sitofp %125 : vector<1x64xi32> to vector<1x64xf32>
      %127 = arith.addf %115, %126 : vector<1x64xf32>
      %c8_i32_49 = arith.constant 8 : i32
      %128 = vector.broadcast %c8_i32_49 : i32 to vector<1x64xi32>
      %129 = arith.cmpi sge, %113, %128 : vector<1x64xi32>
      %c1_i32_50 = arith.constant 1 : i32
      %130 = arith.addi %114, %c1_i32_50 : i32
      %131 = arith.index_cast %130 : i32 to index
      %132 = memref.load %arg2[%131] : memref<16xi32, #tpu.memory_space<smem>>
      %c8_i32_51 = arith.constant 8 : i32
      %133 = arith.addi %c8_i32_51, %132 : i32
      %134 = vector.broadcast %133 : i32 to vector<1x64xi32>
      %135 = arith.cmpi slt, %113, %134 : vector<1x64xi32>
      %136 = arith.andi %129, %135 : vector<1x64xi1>
      %137 = arith.extui %136 : vector<1x64xi1> to vector<1x64xi32>
      %138 = arith.sitofp %137 : vector<1x64xi32> to vector<1x64xf32>
      %139 = arith.addf %127, %138 : vector<1x64xf32>
      %c16_i32 = arith.constant 16 : i32
      %140 = vector.broadcast %c16_i32 : i32 to vector<1x64xi32>
      %141 = arith.cmpi sge, %113, %140 : vector<1x64xi32>
      %c2_i32 = arith.constant 2 : i32
      %142 = arith.addi %114, %c2_i32 : i32
      %143 = arith.index_cast %142 : i32 to index
      %144 = memref.load %arg2[%143] : memref<16xi32, #tpu.memory_space<smem>>
      %c16_i32_52 = arith.constant 16 : i32
      %145 = arith.addi %c16_i32_52, %144 : i32
      %146 = vector.broadcast %145 : i32 to vector<1x64xi32>
      %147 = arith.cmpi slt, %113, %146 : vector<1x64xi32>
      %148 = arith.andi %141, %147 : vector<1x64xi1>
      %149 = arith.extui %148 : vector<1x64xi1> to vector<1x64xi32>
      %150 = arith.sitofp %149 : vector<1x64xi32> to vector<1x64xf32>
      %151 = arith.addf %139, %150 : vector<1x64xf32>
      %c24_i32 = arith.constant 24 : i32
      %152 = vector.broadcast %c24_i32 : i32 to vector<1x64xi32>
      %153 = arith.cmpi sge, %113, %152 : vector<1x64xi32>
      %c3_i32 = arith.constant 3 : i32
      %154 = arith.addi %114, %c3_i32 : i32
      %155 = arith.index_cast %154 : i32 to index
      %156 = memref.load %arg2[%155] : memref<16xi32, #tpu.memory_space<smem>>
      %c24_i32_53 = arith.constant 24 : i32
      %157 = arith.addi %c24_i32_53, %156 : i32
      %158 = vector.broadcast %157 : i32 to vector<1x64xi32>
      %159 = arith.cmpi slt, %113, %158 : vector<1x64xi32>
      %160 = arith.andi %153, %159 : vector<1x64xi1>
      %161 = arith.extui %160 : vector<1x64xi1> to vector<1x64xi32>
      %162 = arith.sitofp %161 : vector<1x64xi32> to vector<1x64xf32>
      %163 = arith.addf %151, %162 : vector<1x64xf32>
      %c32_i32 = arith.constant 32 : i32
      %164 = vector.broadcast %c32_i32 : i32 to vector<1x64xi32>
      %165 = arith.cmpi sge, %113, %164 : vector<1x64xi32>
      %c4_i32 = arith.constant 4 : i32
      %166 = arith.addi %114, %c4_i32 : i32
      %167 = arith.index_cast %166 : i32 to index
      %168 = memref.load %arg2[%167] : memref<16xi32, #tpu.memory_space<smem>>
      %c32_i32_54 = arith.constant 32 : i32
      %169 = arith.addi %c32_i32_54, %168 : i32
      %170 = vector.broadcast %169 : i32 to vector<1x64xi32>
      %171 = arith.cmpi slt, %113, %170 : vector<1x64xi32>
      %172 = arith.andi %165, %171 : vector<1x64xi1>
      %173 = arith.extui %172 : vector<1x64xi1> to vector<1x64xi32>
      %174 = arith.sitofp %173 : vector<1x64xi32> to vector<1x64xf32>
      %175 = arith.addf %163, %174 : vector<1x64xf32>
      %c40_i32 = arith.constant 40 : i32
      %176 = vector.broadcast %c40_i32 : i32 to vector<1x64xi32>
      %177 = arith.cmpi sge, %113, %176 : vector<1x64xi32>
      %c5_i32 = arith.constant 5 : i32
      %178 = arith.addi %114, %c5_i32 : i32
      %179 = arith.index_cast %178 : i32 to index
      %180 = memref.load %arg2[%179] : memref<16xi32, #tpu.memory_space<smem>>
      %c40_i32_55 = arith.constant 40 : i32
      %181 = arith.addi %c40_i32_55, %180 : i32
      %182 = vector.broadcast %181 : i32 to vector<1x64xi32>
      %183 = arith.cmpi slt, %113, %182 : vector<1x64xi32>
      %184 = arith.andi %177, %183 : vector<1x64xi1>
      %185 = arith.extui %184 : vector<1x64xi1> to vector<1x64xi32>
      %186 = arith.sitofp %185 : vector<1x64xi32> to vector<1x64xf32>
      %187 = arith.addf %175, %186 : vector<1x64xf32>
      %c48_i32 = arith.constant 48 : i32
      %188 = vector.broadcast %c48_i32 : i32 to vector<1x64xi32>
      %189 = arith.cmpi sge, %113, %188 : vector<1x64xi32>
      %c6_i32 = arith.constant 6 : i32
      %190 = arith.addi %114, %c6_i32 : i32
      %191 = arith.index_cast %190 : i32 to index
      %192 = memref.load %arg2[%191] : memref<16xi32, #tpu.memory_space<smem>>
      %c48_i32_56 = arith.constant 48 : i32
      %193 = arith.addi %c48_i32_56, %192 : i32
      %194 = vector.broadcast %193 : i32 to vector<1x64xi32>
      %195 = arith.cmpi slt, %113, %194 : vector<1x64xi32>
      %196 = arith.andi %189, %195 : vector<1x64xi1>
      %197 = arith.extui %196 : vector<1x64xi1> to vector<1x64xi32>
      %198 = arith.sitofp %197 : vector<1x64xi32> to vector<1x64xf32>
      %199 = arith.addf %187, %198 : vector<1x64xf32>
      %c56_i32 = arith.constant 56 : i32
      %200 = vector.broadcast %c56_i32 : i32 to vector<1x64xi32>
      %201 = arith.cmpi sge, %113, %200 : vector<1x64xi32>
      %c7_i32 = arith.constant 7 : i32
      %202 = arith.addi %114, %c7_i32 : i32
      %203 = arith.index_cast %202 : i32 to index
      %204 = memref.load %arg2[%203] : memref<16xi32, #tpu.memory_space<smem>>
      %c56_i32_57 = arith.constant 56 : i32
      %205 = arith.addi %c56_i32_57, %204 : i32
      %206 = vector.broadcast %205 : i32 to vector<1x64xi32>
      %207 = arith.cmpi slt, %113, %206 : vector<1x64xi32>
      %208 = arith.andi %201, %207 : vector<1x64xi1>
      %209 = arith.extui %208 : vector<1x64xi1> to vector<1x64xi32>
      %210 = arith.sitofp %209 : vector<1x64xi32> to vector<1x64xf32>
      %211 = arith.addf %199, %210 : vector<1x64xf32>
      %c0_58 = arith.constant 0 : index
      %c0_59 = arith.constant 0 : index
      %212 = vector.load %arg7[%c0_58, %c0_59] : memref<1x64xf32, #tpu.memory_space<vmem>>, vector<1x64xf32>
      tpu.vector_store %arg7[%c0_58, %c0_59], %211 {strides = array<i32>} : memref<1x64xf32, #tpu.memory_space<vmem>>, vector<1x64xf32>,
    } else {
    }
    %c0 = arith.constant 0 : index
    %c0_1 = arith.constant 0 : index
    %c0_2 = arith.constant 0 : index
    %3 = vector.load %arg3[%c0, %c0_1, %c0_2] : memref<8x8x128xf32, #tpu.memory_space<vmem>>, vector<8x8x128xf32>
    %c0_3 = arith.constant 0 : index
    %c0_4 = arith.constant 0 : index
    %c0_5 = arith.constant 0 : index
    %4 = vector.load %arg4[%c0_3, %c0_4, %c0_5] : memref<8x8x128xf32, #tpu.memory_space<vmem>>, vector<8x8x128xf32>
    %5 = vector.shape_cast %4 : vector<8x8x128xf32> to vector<64x128xf32>
    %c0_6 = arith.constant 0 : index
    %c0_7 = arith.constant 0 : index
    %6 = vector.load %arg7[%c0_6, %c0_7] : memref<1x64xf32, #tpu.memory_space<vmem>>, vector<1x64xf32>
    %7 = tpu.iota {dimensions = array<i32: 0>} : vector<64x8xi32>
    %8 = tpu.iota {dimensions = array<i32: 1>} : vector<64x8xi32>
    %c8_i32 = arith.constant 8 : i32
    %9 = vector.broadcast %c8_i32 : i32 to vector<64x8xi32>
    %10 = arith.muli %8, %9 : vector<64x8xi32>
    %11 = arith.cmpi sge, %7, %10 : vector<64x8xi32>
    %c1_i32 = arith.constant 1 : i32
    %12 = vector.broadcast %c1_i32 : i32 to vector<64x8xi32>
    %13 = arith.addi %8, %12 : vector<64x8xi32>
    %c8_i32_8 = arith.constant 8 : i32
    %14 = vector.broadcast %c8_i32_8 : i32 to vector<64x8xi32>
    %15 = arith.muli %13, %14 : vector<64x8xi32>
    %16 = arith.cmpi slt, %7, %15 : vector<64x8xi32>
    %17 = arith.andi %11, %16 : vector<64x8xi1>
    %18 = arith.extui %17 : vector<64x8xi1> to vector<64x8xi32>
    %19 = arith.sitofp %18 : vector<64x8xi32> to vector<64x8xf32>
    %20 = tpu.iota {dimensions = array<i32: 1>} : vector<8x64xi32>
    %21 = tpu.iota {dimensions = array<i32: 0>} : vector<8x64xi32>
    %c8_i32_9 = arith.constant 8 : i32
    %22 = vector.broadcast %c8_i32_9 : i32 to vector<8x64xi32>
    %23 = arith.muli %21, %22 : vector<8x64xi32>
    %24 = arith.cmpi sge, %20, %23 : vector<8x64xi32>
    %c1_i32_10 = arith.constant 1 : i32
    %25 = vector.broadcast %c1_i32_10 : i32 to vector<8x64xi32>
    %26 = arith.addi %21, %25 : vector<8x64xi32>
    %c8_i32_11 = arith.constant 8 : i32
    %27 = vector.broadcast %c8_i32_11 : i32 to vector<8x64xi32>
    %28 = arith.muli %26, %27 : vector<8x64xi32>
    %29 = arith.cmpi slt, %20, %28 : vector<8x64xi32>
    %30 = arith.andi %24, %29 : vector<8x64xi1>
    %31 = arith.extui %30 : vector<8x64xi1> to vector<8x64xi32>
    %32 = arith.sitofp %31 : vector<8x64xi32> to vector<8x64xf32>
    %33 = vector.shape_cast %3 : vector<8x8x128xf32> to vector<64x128xf32>
    %cst = arith.constant dense<0.000000e+00> : vector<64x64xf32>
    %34 = tpu.matmul %33, %5, %cst {dimension_numbers = #tpu.dot_dimension_numbers<[1], [1], [0], [0], [0, 0, 1, 0], [], []>} : vector<64x128xf32>, vector<64x128xf32>, vector<64x64xf32> -> vector<64x64xf32>
    %cst_12 = arith.constant 0.000000e+00 : f32
    %35 = vector.broadcast %cst_12 : f32 to vector<64x64xf32>
    %36 = arith.cmpf ogt, %34, %35 : vector<64x64xf32>
    %cst_13 = arith.constant 1.000000e-01 : f32
    %37 = vector.broadcast %cst_13 : f32 to vector<64x64xf32>
    %38 = arith.mulf %37, %34 : vector<64x64xf32>
    %39 = arith.select %36, %34, %38 : vector<64x64xi1>, vector<64x64xf32>
    %40 = vector.broadcast %6 : vector<1x64xf32> to vector<64x64xf32>
    %41 = arith.mulf %39, %40 : vector<64x64xf32>
    %42 = arith.mulf %41, %41 : vector<64x64xf32>
    %cst_14 = arith.constant dense<0.000000e+00> : vector<64x8xf32>
    %43 = tpu.matmul %42, %19, %cst_14 {dimension_numbers = #tpu.dot_dimension_numbers<[1], [0], [0], [1], [0, 0, 1, 1], [], []>} : vector<64x64xf32>, vector<64x8xf32>, vector<64x8xf32> -> vector<64x8xf32>
    %cst_15 = arith.constant 9.99999993E-9 : f32
    %44 = vector.broadcast %cst_15 : f32 to vector<64x8xf32>
    %45 = arith.addf %43, %44 : vector<64x8xf32>
    %46 = math.rsqrt %45 : vector<64x8xf32>
    %cst_16 = arith.constant dense<0.000000e+00> : vector<64x64xf32>
    %47 = tpu.matmul %46, %32, %cst_16 {dimension_numbers = #tpu.dot_dimension_numbers<[1], [0], [0], [1], [0, 0, 1, 1], [], []>} : vector<64x8xf32>, vector<8x64xf32>, vector<64x64xf32> -> vector<64x64xf32>
    %48 = arith.mulf %41, %47 : vector<64x64xf32>
    %cst_17 = arith.constant 9.000000e+00 : f32
    %49 = vector.broadcast %cst_17 : f32 to vector<64x64xf32>
    %50 = arith.mulf %48, %49 : vector<64x64xf32>
    %51 = vector.shape_cast %50 : vector<64x64xf32> to vector<8x8x64xf32>
    %cst_18 = arith.constant dense<0xFF800000> : vector<8x64xf32>
    %52 = vector.multi_reduction <maximumf>, %51, %cst_18 [1] : vector<8x8x64xf32> to vector<8x64xf32>
    %53 = vector.shape_cast %52 : vector<8x64xf32> to vector<8x1x64xf32>
    %54 = vector.broadcast %53 : vector<8x1x64xf32> to vector<8x8x64xf32>
    %55 = arith.subf %51, %54 : vector<8x8x64xf32>
    %56 = math.exp %55 : vector<8x8x64xf32>
    %cst_19 = arith.constant dense<0.000000e+00> : vector<8x64xf32>
    %57 = vector.multi_reduction <add>, %56, %cst_19 [1] : vector<8x8x64xf32> to vector<8x64xf32>
    %58 = vector.shape_cast %57 : vector<8x64xf32> to vector<8x1x64xf32>
    %59 = tpu.reciprocal %58 {approx = true} : vector<8x1x64xf32> -> vector<8x1x64xf32>
    %60 = vector.broadcast %59 : vector<8x1x64xf32> to vector<8x8x64xf32>
    %61 = arith.mulf %56, %60 : vector<8x8x64xf32>
    %62 = vector.shape_cast %59 : vector<8x1x64xf32> to vector<8x64xf32>
    %63 = tpu.transpose %61, [0, 2, 1] : vector<8x8x64xf32> -> vector<8x64x8xf32>
    "tpu.trace_start"() <{level = 10 : i32, message = "bmr,brd->bmd"}> : () -> ()
    %cst_20 = arith.constant dense<0.000000e+00> : vector<8x64x128xf32>
    %64 = tpu.matmul %63, %3, %cst_20 {dimension_numbers = #tpu.dot_dimension_numbers<[2], [1], [1], [2], [0, 0, 0, 1, 1, 2], [0], [0]>} : vector<8x64x8xf32>, vector<8x8x128xf32>, vector<8x64x128xf32> -> vector<8x64x128xf32>
    "tpu.trace_stop"() : () -> ()
    %c0_21 = arith.constant 0 : index
    %c0_22 = arith.constant 0 : index
    %65 = vector.load %arg6[%c0_21, %c0_22] : memref<64x128xf32, #tpu.memory_space<vmem>>, vector<64x128xf32>
    %66 = vector.shape_cast %65 : vector<64x128xf32> to vector<1x64x128xf32>
    %67 = vector.broadcast %66 : vector<1x64x128xf32> to vector<8x64x128xf32>
    %68 = arith.mulf %67, %64 : vector<8x64x128xf32>
    %cst_23 = arith.constant dense<0.000000e+00> : vector<8x64xf32>
    %69 = vector.multi_reduction <add>, %68, %cst_23 [2] : vector<8x64x128xf32> to vector<8x64xf32>
    %70 = arith.mulf %64, %64 : vector<8x64x128xf32>
    %cst_24 = arith.constant dense<0.000000e+00> : vector<8x64xf32>
    %71 = vector.multi_reduction <add>, %70, %cst_24 [2] : vector<8x64x128xf32> to vector<8x64xf32>
    %cst_25 = arith.constant 9.99999993E-9 : f32
    %72 = vector.broadcast %cst_25 : f32 to vector<8x64xf32>
    %73 = arith.addf %71, %72 : vector<8x64xf32>
    %74 = math.rsqrt %73 : vector<8x64xf32>
    %75 = arith.mulf %69, %74 : vector<8x64xf32>
    %cst_26 = arith.constant 6.000000e+00 : f32
    %76 = vector.broadcast %cst_26 : f32 to vector<8x64xf32>
    %77 = arith.mulf %75, %76 : vector<8x64xf32>
    %78 = math.exp %77 : vector<8x64xf32>
    %79 = vector.broadcast %6 : vector<1x64xf32> to vector<8x64xf32>
    %80 = arith.mulf %78, %79 : vector<8x64xf32>
    %cst_27 = arith.constant 6.000000e+00 : f32
    %81 = vector.broadcast %cst_27 : f32 to vector<8x64xf32>
    %82 = arith.mulf %62, %81 : vector<8x64xf32>
    %83 = math.exp %82 : vector<8x64xf32>
    %84 = vector.broadcast %6 : vector<1x64xf32> to vector<8x64xf32>
    %85 = arith.mulf %83, %84 : vector<8x64xf32>
    %cst_28 = arith.constant dense<0.000000e+00> : vector<8x8xf32>
    %86 = tpu.matmul %80, %19, %cst_28 {dimension_numbers = #tpu.dot_dimension_numbers<[1], [0], [0], [1], [0, 0, 1, 1], [], []>} : vector<8x64xf32>, vector<64x8xf32>, vector<8x8xf32> -> vector<8x8xf32>
    %cst_29 = arith.constant dense<0.000000e+00> : vector<8x8xf32>
    %87 = tpu.matmul %85, %19, %cst_29 {dimension_numbers = #tpu.dot_dimension_numbers<[1], [0], [0], [1], [0, 0, 1, 1], [], []>} : vector<8x64xf32>, vector<64x8xf32>, vector<8x8xf32> -> vector<8x8xf32>
    %cst_30 = arith.constant 1.000000e-30 : f32
    %88 = vector.broadcast %cst_30 : f32 to vector<8x8xf32>
    %89 = arith.maximumf %86, %88 : vector<8x8xf32>
    %90 = math.log %89 : vector<8x8xf32>
    %cst_31 = arith.constant 1.000000e-30 : f32
    %91 = vector.broadcast %cst_31 : f32 to vector<8x8xf32>
    %92 = arith.maximumf %87, %91 : vector<8x8xf32>
    %93 = math.log %92 : vector<8x8xf32>
    %cst_32 = arith.constant 5.000000e-01 : f32
    %94 = vector.broadcast %cst_32 : f32 to vector<8x8xf32>
    %95 = arith.mulf %94, %93 : vector<8x8xf32>
    %96 = arith.addf %90, %95 : vector<8x8xf32>
    %cst_33 = arith.constant 0.166666672 : f32
    %97 = vector.broadcast %cst_33 : f32 to vector<8x8xf32>
    %98 = arith.mulf %96, %97 : vector<8x8xf32>
    %c0_34 = arith.constant 0 : index
    %c0_35 = arith.constant 0 : index
    %c0_36 = arith.constant 0 : index
    %99 = vector.load %arg5[%c0_34, %c0_35, %c0_36] : memref<1x8x8xf32, #tpu.memory_space<vmem>>, vector<1x8x8xf32>
    %100 = vector.shape_cast %99 : vector<1x8x8xf32> to vector<8x8xf32>
    %101 = vector.shape_cast %98 : vector<8x8xf32> to vector<1x8x8xf32>
    tpu.vector_store %arg5[%c0_34, %c0_35, %c0_36], %101 {strides = array<i32>} : memref<1x8x8xf32, #tpu.memory_space<vmem>>, vector<1x8x8xf32>,
    return
  }
  func.func @transform_0(%arg0: i32, %arg1: i32, %arg2: memref<16xi32, #tpu.memory_space<smem>>) -> (i32, i32, i32) {
    %c0_i32 = arith.constant 0 : i32
    %c0_i32_0 = arith.constant 0 : i32
    %c0_i32_1 = arith.constant 0 : i32
    return %arg1, %c0_i32, %c0_i32_0 : i32, i32, i32
  }
  func.func @transform_1(%arg0: i32, %arg1: i32, %arg2: memref<16xi32, #tpu.memory_space<smem>>) -> (i32, i32, i32) {
    %c0_i32 = arith.constant 0 : i32
    %c0_i32_0 = arith.constant 0 : i32
    %c0_i32_1 = arith.constant 0 : i32
    return %arg0, %c0_i32, %c0_i32_0 : i32, i32, i32
  }
  func.func @transform_2(%arg0: i32, %arg1: i32, %arg2: memref<16xi32, #tpu.memory_space<smem>>) -> (i32, i32, i32) {
    %c0_i32 = arith.constant 0 : i32
    %c0_i32_0 = arith.constant 0 : i32
    return %arg0, %arg1, %c0_i32 : i32, i32, i32
  }
}

</mosaic_0001>

<bundles_post_ra>
// kernel: contrastive_loss.1
= control target key start
LH: loop header
LB: loop body
LE: loop exit
PB: predicated region body
PF: predicated region fallthrough
CT: control target
= control target key end

     0   :  { %s5243_s12 = smov [#allocation5]   ;;  %s6728_s0 = inlined_call_operand.hbm [shape: s32[16], index: 0, kind: input, shape index: {}]   ;;  %s6729_s1 = inlined_call_operand.hbm [shape: f32[16,8,128], index: 1, kind: input, shape index: {}]   ;;  %s6730_s2 = inlined_call_operand.hbm [shape: f32[16,8,128], index: 2, kind: input, shape index: {}]   ;;  %s6731_s3 = inlined_call_operand.vmem [shape: f32[2,16,8], index: 3, kind: output, shape index: {}]  }
   0x1   :  { %6739 = sst [smem:[#allocation17_spill]] %s6729_s1 }
   0x2   :  { %9 = dma.hbm_to_smem %s6728_s0, 16, %s5243_s12, [#allocation4] }
   0x3   :  { %5189 = dma.done.wait [#allocation4], 16 }
   0x4   :  { %5190 = vsyncadd [#allocation4], 4294967280 }
   0x5   :  { %11 = sfence }
   0x6   :  { %12 = vsyncpa [#allocation7], 0 }
   0x7   :  { %14 = vsyncpa [#allocation7 + $0x1], 0 }
   0x8   :  { %15 = vsyncpa [#allocation9], 0 }
   0x9   :  { %17 = vsyncpa [#allocation9 + $0x1], 0  ;;  %s5276_s15 = smov 0   ;;  %s5278_s16 = smov 0  }
   0xa   :  { %s5280_s17 = smov 0   ;;  %s5282_s18 = smov 0  }
   0xb   :  { %s5284_s19 = smov 0   ;;  %s5286_s20 = smov 0  }
   0xc   :  { %s5288_s0 = smov 0   ;;  %s5290_s21 = smov 0  }
   0xd   :  { %s5292_s22 = smov 0   ;;  %s5294_s23 = smov 0  }
   0xe   :  { %s5296_s24 = smov 0  }
   0xf LB: > { %s4134_s25 = sadd.s32 4294967295, %s5241_s24   ;;  %s32_s26 = sadd.s32 1, %s5233_s22  ;;  %s5241_s24 = sphi %s5296_s24, %s23_s24   ;;  %s5237_s23 = sphi %s5294_s23, %s6785_s23   ;;  %s5233_s22 = sphi %s5292_s22, %s6784_s22   ;;  %s5229_s21 = sphi %s5290_s21, %s6783_s21   ;;  %s5225_s0 = sphi %s5288_s0, %s6782_s0   ;;  %s5221_s20 = sphi %s5286_s20, %s6781_s20   ;;  %s5217_s19 = sphi %s5284_s19, %s6780_s19   ;;  %s5213_s18 = sphi %s5282_s18, %s6779_s18   ;;  %s5209_s17 = sphi %s5280_s17, %s6778_s17   ;;  %s5205_s16 = sphi %s5278_s16, %s6777_s16   ;;  %s5201_s15 = sphi %s5276_s15, %s6776_s15  }
  0x10   : > { %p5331_p0 = scmp.ge.s32.totalorder %s32_s26, 2  ;;  %s42_s28 = sadd.s32 1, %s5221_s20 }
  0x11   : > { %p49_p1 = scmp.ne.s32.totalorder %s5221_s20, %s5217_s19  ;;  %p50_p2 = scmp.eq.s32.totalorder %s5241_s24, 0 }
  0x12   : > { %s6787_s26 = smov (%p5331_p0, %s32_s26), 0  ;;  %p55_p4 = scmp.ne.s32.totalorder %s5217_s19, %s5213_s18 }
  0x13   : > { %p5345_p3 = por %p50_p2, %p49_p1  ;;  %s39_s30 = ssub.s32 %s5233_s22, %s6787_s26 }
  0x14   : > { %p5352_p5 = scmp.eq.s32.totalorder %s4134_s25, 0  ;;  %p40_p6 = scmp.eq.s32.totalorder %s39_s30, 0 }
  0x15   : > { %p4642_p8 = scmp.lt.s32.totalorder %s5241_s24, 4  ;;  %s133_s7 = sand.u32 1, %s5221_s20  }
  0x16   : > { %p5358_p7 = por %p5352_p5, %p55_p4  ;;  %s4278_s8 = sshll.u32 %s5233_s22, 10 }
  0x17   : > { %s5364_s6 = scalar_select %p40_p6, %s5221_s20, %s42_s28  }
  0x18   : > { %s4138_s9 = sshll.u32 %s133_s7, 6  ;;  %s6744_s1 = sld [smem:[#allocation17_spill]] }
  0x19   : > { %s137_s13 = scalar_lea.vmem [#allocation6], %s4138_s9  ;;  %p5375_p9 = pnand %p4642_p8, %p5345_p3 }
  0x1a   : > { %s144_s14 = sshll.u32 %s137_s13, 4  ;;  %s134_s25 = scalar_lea.sflag [#allocation7], %s133_s7  ;;  %s145_s14 = int_to_ptr.vmem [resolvable:$true] %s144_s14 }
  0x1b   : > { %p5091_p10 = pneg %p5375_p9  ;;  %s5102_s28 = scalar_lea.vmem %s145_s14, 1024 }
  0x1c   : > { %p5103_p11 = scmp.ne.s32.totalorder %s145_s14, %s5102_s28  ;;  %s5244_s30 = smov [#allocation6]  }
  0x1d   : > { %s5107_s10 = sshll.u32 %s5244_s30, 4  ;;  %s5108_s10 = int_to_ptr.vmem [resolvable:$false] %s5107_s10 }
  0x1e   : > { %s143_s12 = scalar_lea.hbm %s6744_s1, %s4278_s8  ;;  %p5105_p12 = pnand %p5103_p11, %p5091_p10 }
  0x1f   : > { %s5109_s8 = scalar_lea.vmem %s5108_s10, 2048  ;;  %p5110_p1 = scmp.lt.s32.totalorder %s145_s14, %s5108_s10 }
  0x20   : > { %p5106_p13 = pneg %p5105_p12  ;;  %p5111_p4 = scmp.lt.s32.totalorder %s5109_s8, %s5102_s28 }
  0x22   : > { %p5112_p6 = por %p5111_p4, %p5110_p1 }
  0x24   : > { %p5113_p3 = pnand %p5112_p6, %p5106_p13 }
  0x26   : > { %5116 = shalt.err (!%p5113_p3)
}
  0x27   : > { %s6732_s29 = smov 128   ;;  %s6733_s7 = smov 8  }
  0x28   : > { %4638 = dma.hbm_to_vmem [thread:$0]  (!%p5375_p9), %s143_s12, 1024, %s145_s14, %s134_s25, %s6732_s29, %s6732_s29, %s6733_s7  }
  0x29   : > { %p4144_p10 = scmp.ge.s32.totalorder %s5241_s24, 1  ;;  %p173_p11 = scmp.lt.s32.totalorder %s5241_s24, 5 }
  0x2a   : > { %s35_s11 = sadd.s32 1, %s5237_s23  ;;  %p75_p13 = scmp.ne.s32.totalorder %s5209_s17, %s5205_s16 }
  0x2b   : > { %p5388_p12 = pnand %p4144_p10, %p173_p11  ;;  %s6789_s11 = smov (!%p5331_p0, %s35_s11), %s5237_s23 }
  0x2c   : > { %p37_p1 = scmp.ge.s32.totalorder %s6789_s11, 2  ;;  %p81_p4 = scmp.ne.s32.totalorder %s5205_s16, %s5201_s15 }
  0x2d   : > { %s68_s13 = sadd.s32 1, %s5209_s17  ;;  %s154_s18 = sand.u32 1, %s5209_s17  }
  0x2e   : > { %s6791_s11 = smov (%p37_p1, %s6789_s11), 0  ;;  %p77_p9 = por %p75_p13, %p50_p2 }
  0x2f   : > { %p5408_p6 = por %p81_p4, %p5352_p5  ;;  %s65_s14 = ssub.s32 %s5237_s23, %s6791_s11 }
  0x30   : > { %s4141_s27 = sshll.u32 %s154_s18, 6  ;;  %p66_p3 = scmp.eq.s32.totalorder %s65_s14, 0 }
  0x31   : > { %s4279_s25 = sshll.u32 %s5237_s23, 10  ;;  %s158_s28 = scalar_lea.vmem [#allocation8], %s4141_s27 }
  0x32   : > { %s165_s30 = sshll.u32 %s158_s28, 4  ;;  %s164_s29 = scalar_lea.hbm %s6730_s2, %s4279_s25  ;;  %s166_s30 = int_to_ptr.vmem [resolvable:$true] %s165_s30 }
  0x33   : > { %s5416_s10 = scalar_select %p66_p3, %s5209_s17, %s68_s13  }
  0x34   : > { %p5423_p0 = pnand %p4642_p8, %p77_p9  ;;  %s155_s7 = scalar_lea.sflag [#allocation9], %s154_s18 }
  0x35   : > { %s5130_s14 = scalar_lea.vmem %s166_s30, 1024  ;;  %s5247_s13 = smov [#allocation8]  }
  0x36   : > { %p5119_p2 = pneg %p5423_p0  ;;  %p5131_p5 = scmp.ne.s32.totalorder %s166_s30, %s5130_s14 }
  0x37   : > { %s5135_s27 = sshll.u32 %s5247_s13, 4  ;;  %s5136_s27 = int_to_ptr.vmem [resolvable:$false] %s5135_s27 }
  0x38   : > { %p5133_p10 = pnand %p5131_p5, %p5119_p2  ;;  %s5137_s28 = scalar_lea.vmem %s5136_s27, 2048 }
  0x39   : > { %p5138_p13 = scmp.lt.s32.totalorder %s166_s30, %s5136_s27  ;;  %p5139_p1 = scmp.lt.s32.totalorder %s5137_s28, %s5130_s14 }
  0x3a   : > { %p5134_p11 = pneg %p5133_p10 }
  0x3b   : > { %p5140_p4 = por %p5139_p1, %p5138_p13 }
  0x3d   : > { %p5141_p3 = pnand %p5140_p4, %p5134_p11 }
  0x3f   : > { %5144 = shalt.err (!%p5141_p3)
}
  0x40   : > { %s6749_s25 = smov 8   ;;  %s6750_s15 = smov 128  }
  0x41   : > { %4641 = dma.hbm_to_vmem [thread:$0]  (!%p5423_p0), %s164_s29, 1024, %s166_s30, %s155_s7, %s6750_s15, %s6750_s15, %s6749_s25  }
  0x42   : > { %177 = sbr.rel (%p5388_p12) target bundleno = 2094 (0x82e), region = 28 }
  0x47   : > { %s179_s18 = sand.u32 1, %s5217_s19  }
  0x48   : > { %s4145_s8 = sshll.u32 %s179_s18, 6  ;;  %s180_s13 = scalar_lea.sflag [#allocation7], %s179_s18 }
  0x49   : > { %s5437_s1 = scalar_lea.vmem [#allocation6], %s4145_s8 }
  0x4a   : > { %5192 = dma.done.wait (%p5358_p7), %s180_s13, 1024  }
  0x4b   : > { %5194 = vsyncadd (%p5358_p7), %s180_s13, 4294966272  ;;  %s188_s4 = sand.u32 1, %s5205_s16  }
  0x4c   : > { %s4146_s14 = sshll.u32 %s188_s4, 6  ;;  %s189_s29 = scalar_lea.sflag [#allocation9], %s188_s4 }
  0x4d   : > { %s5444_s7 = scalar_lea.vmem [#allocation8], %s4146_s14 }
  0x4e   : > { %5196 = dma.done.wait (%p5408_p6), %s189_s29, 1024  }
  0x4f   : > { %5198 = vsyncadd (%p5408_p6), %s189_s29, 4294966272  ;;  %p223_p8 = scmp.lt.s32.totalorder %s5229_s21, 1  ;;  %p225_p12 = scmp.lt.s32.totalorder %s5225_s0, 1 }
  0x50   : > { %p4149_p7 = scmp.ne.s32.totalorder %s5225_s0, 0 }
  0x51   : > { %s224_s5 = scalar_select %p223_p8, %s5229_s21, 1 }
  0x52   : > { %s226_s9 = scalar_select %p225_p12, %s5225_s0, 1 }
  0x53   : > { %s4147_s30 = sshll.u32 %s224_s5, 1  ;;  %234 = sbr.rel (%p4149_p7) target bundleno = 261 (0x105), region = 40 }
  0x54   : > { %s228_s27 = sadd.s32 %s4147_s30, %s226_s9  ;;  %s5501_s0 = sshll.u32 (!%p4149_p7), %s5229_s21, 3 }
  0x55   : > { %s4148_s28 = sshll.u32 %s228_s27, 3  ;;  %s311_s12 = sadd.s32 (!%p4149_p7), 1, %s5501_s0 }
  0x56   : > { %s5457_s18 = scalar_lea.vmem %s6731_s3, %s4148_s28  ;;  %s312_s8 = sld [smem:[#allocation5 + %s311_s12]] (!%p4149_p7) }
  0x57   : > { %s321_s13 = sadd.s32 (!%p4149_p7), 2, %s5501_s0  ;;  %s303_s4 = sld [smem:[#allocation5 + %s5501_s0]] (!%p4149_p7) }
  0x58   : > { %v5461_v0 = vld [vmem:[%s5444_s7 + $0x10] sm:$0xff]  ;;  %v5464_v1 = vld [vmem:[%s5444_s7] sm:$0xff]  ;;  %v5467_v2 = vld [vmem:[%s5444_s7 + $0x18] sm:$0xff]  ;;  %s322_s14 = sld [smem:[#allocation5 + %s321_s13]]  ;;  %s331_s29 = sadd.s32 3, %s5501_s0  ;;  %v299_v16 = vlaneseq  ;;  %v5248_v20 = vmov 0.0  }
  0x59   : > { %v245_v3 = vmul.f32 %v5461_v0, %v5461_v0  ;;  %v243_v4 = vmul.f32 %v5464_v1, %v5464_v1  ;;  %v5474_v5 = vld [vmem:[%s5444_s7 + $0x8] sm:$0xff]  ;;  %v246_v6 = vmul.f32 %v5467_v2, %v5467_v2  ;;  %v5484_v9 = vld [vmem:[%s5444_s7 + $0x20] sm:$0xff]  ;;  %v5491_v12 = vld [vmem:[%s5444_s7 + $0x38] sm:$0xff]  ;;  %s332_s5 = sld [smem:[#allocation5 + %s331_s29]]  ;;  %s341_s9 = sadd.s32 4, %s5501_s0 }
  0x5a   : > { %v244_v7 = vmul.f32 %v5474_v5, %v5474_v5  ;;  %v5481_v8 = vld [vmem:[%s5444_s7 + $0x28] sm:$0xff]  ;;  %v247_v11 = vmul.f32 %v5484_v9, %v5484_v9  ;;  %v5494_v13 = vld [vmem:[%s5444_s7 + $0x30] sm:$0xff]  ;;  %v250_v14 = vmul.f32 %v5491_v12, %v5491_v12  ;;  %v300_v17 = vand.u32 127, %v299_v16  ;;  %s5508_s21 = sld [smem:[#allocation5 + %s341_s9]]  ;;  %s351_s27 = sadd.s32 5, %s5501_s0 }
  0x5b   : > { %255 = vadd.xlane.f32.xlu1 %v245_v3  ;;  %251 = vadd.xlane.f32.xlu0 %v243_v4  ;;  %v248_v10 = vmul.f32 %v5481_v8, %v5481_v8  ;;  %v249_v15 = vmul.f32 %v5494_v13, %v5494_v13  ;;  %s5511_s28 = sld [smem:[#allocation5 + %s351_s27]]  ;;  %s361_s15 = sadd.s32 6, %s5501_s0 }
  0x5c   : > { %s313_s30 = sadd.s32 8, %s312_s8  ;;  %vm310_vm0 = vcmp.ge.s32.totalorder %v300_v17, 8  ;;  %vm320_vm4 = vcmp.ge.s32.totalorder %v300_v17, 16  ;;  %s362_s8 = sld [smem:[#allocation5 + %s361_s15]]  ;;  %vm330_vm7 = vcmp.ge.s32.totalorder %v300_v17, 24  ;;  %vm340_vm10 = vcmp.ge.s32.totalorder %v300_v17, 32 }
  0x5d   : > { %v314_v18 = vstv %s313_s30  ;;  %v304_v19 = vstv %s303_s4  ;;  %s371_s13 = sadd.s32 7, %s5501_s0  ;;  %vm350_vm13 = vcmp.ge.s32.totalorder %v300_v17, 40 }
  0x5e   : > { %vm315_vm1 = vcmp.lt.s32.totalorder %v300_v17, %v314_v18  ;;  %vm305_vm2 = vcmp.lt.s32.totalorder %v300_v17, %v304_v19  ;;  %s323_s25 = sadd.s32 16, %s322_s14  ;;  %s372_s29 = sld [smem:[#allocation5 + %s371_s13]] }
  0x5f   : > { %257 = vadd.xlane.f32.xlu1 %v246_v6  ;;  %253 = vadd.xlane.f32.xlu0 %v244_v7  ;;  %vm316_vm3 = vmand %vm310_vm0, %vm315_vm1  ;;  %v4151_v21 = vsel %vm305_vm2, 1.0, %v5248_v20  ;;  %v324_v23 = vstv %s323_s25  ;;  %s333_s12 = sadd.s32 24, %s332_s5  ;;  %vm360_vm0 = vcmp.ge.s32.totalorder %v300_v17, 48 }
  0x60   : > { %v4152_v22 = vsel %vm316_vm3, 1.0, %v5248_v20  ;;  %vm325_vm5 = vcmp.lt.s32.totalorder %v300_v17, %v324_v23  ;;  %v334_v25 = vstv %s333_s12  ;;  %s343_s4 = sadd.s32 32, %s5508_s21  ;;  %vm370_vm3 = vcmp.ge.s32.totalorder %v300_v17, 56 }
  0x61   : > { %v319_v24 = vadd.f32 %v4152_v22, %v4151_v21  ;;  %vm326_vm6 = vmand %vm320_vm4, %vm325_vm5  ;;  %vm335_vm8 = vcmp.lt.s32.totalorder %v300_v17, %v334_v25  ;;  %v344_v27 = vstv %s343_s4  ;;  %s353_s14 = sadd.s32 40, %s5511_s28 }
  0x62   : > { %v4153_v26 = vsel %vm326_vm6, 1.0, %v5248_v20  ;;  %vm336_vm9 = vmand %vm330_vm7, %vm335_vm8  ;;  %vm345_vm11 = vcmp.lt.s32.totalorder %v300_v17, %v344_v27  ;;  %v354_v30 = vstv %s353_s14  ;;  %s363_s0 = sadd.s32 48, %s362_s8  ;;  %vm380_vm6 = vcmask 516096  }
  0x63   : > { %261 = vadd.xlane.f32.xlu1 %v248_v10  ;;  %259 = vadd.xlane.f32.xlu0 %v247_v11  ;;  %v329_v28 = vadd.f32 %v4153_v26, %v319_v24  ;;  %v4154_v29 = vsel %vm336_vm9, 1.0, %v5248_v20  ;;  %vm346_vm12 = vmand %vm340_vm10, %vm345_vm11  ;;  %vm355_vm14 = vcmp.lt.s32.totalorder %v300_v17, %v354_v30  ;;  %v364_v33 = vstv %s363_s0 }
  0x64   : > { %v4155_v32 = vsel %vm346_vm12, 1.0, %v5248_v20  ;;  %vm356_vm15 = vmand %vm350_vm13, %vm355_vm14  ;;  %vm365_vm1 = vcmp.lt.s32.totalorder %v300_v17, %v364_v33  ;;  %s373_s5 = sadd.s32 56, %s372_s29 }
  0x65   : > { %v339_v31 = vadd.f32 %v4154_v29, %v329_v28  ;;  %v4156_v35 = vsel %vm356_vm15, 1.0, %v5248_v20  ;;  %vm366_vm2 = vmand %vm360_vm0, %vm365_vm1  ;;  %v374_v36 = vstv %s373_s5 }
  0x66   : > { %v4157_v38 = vsel %vm366_vm2, 1.0, %v5248_v20  ;;  %vm375_vm4 = vcmp.lt.s32.totalorder %v300_v17, %v374_v36 }
  0x67   : > { %265 = vadd.xlane.f32.xlu1 %v250_v14  ;;  %263 = vadd.xlane.f32.xlu0 %v249_v15  ;;  %v349_v34 = vadd.f32 %v4155_v32, %v339_v31  ;;  %vm376_vm5 = vmand %vm370_vm3, %vm375_vm4 }
  0x68   : > { %v4158_v40 = vsel %vm376_vm5, 1.0, %v5248_v20 }
  0x69   : > { %v359_v37 = vadd.f32 %v4156_v35, %v349_v34 }
  0x6b   : > { %v369_v39 = vadd.f32 %v4157_v38, %v359_v37 }
  0x6d   : > { %v379_v41 = vadd.f32 %v4158_v40, %v369_v39 }
  0x6f   : > { %381 = vst.msk [vmem:[#allocation3] sm:$0x1] %vm380_vm6, %v379_v41 }
  0xe4   : > { %v256_v42 = vpop.xlane.xlu1 %255  ;;  %v252_v43 = vpop.xlane.xlu0 %251 }
  0xe5   : > { %v269_v44 = vadd.f32 1e-08, %v256_v42  ;;  %v267_v45 = vadd.f32 1e-08, %v252_v43 }
  0xe7   : > { %4739 = vrsqrt.f32 %v269_v44 }
  0xe8   : > { %4741 = vrsqrt.f32 %v267_v45  ;;  %v258_v46 = vpop.xlane.xlu1 %257  ;;  %v254_v47 = vpop.xlane.xlu0 %253 }
  0xe9   : > { %v270_v48 = vadd.f32 1e-08, %v258_v46  ;;  %v268_v49 = vadd.f32 1e-08, %v254_v47 }
  0xeb   : > { %4743 = vrsqrt.f32 %v270_v48 }
  0xec   : > { %4745 = vrsqrt.f32 %v268_v49  ;;  %v262_v50 = vpop.xlane.xlu1 %261  ;;  %v260_v51 = vpop.xlane.xlu0 %259 }
  0xed   : > { %v272_v52 = vadd.f32 1e-08, %v262_v50  ;;  %v271_v53 = vadd.f32 1e-08, %v260_v51 }
  0xef   : > { %4747 = vrsqrt.f32 %v272_v52 }
  0xf0   : > { %4749 = vrsqrt.f32 %v271_v53  ;;  %v266_v54 = vpop.xlane.xlu1 %265  ;;  %v264_v55 = vpop.xlane.xlu0 %263 }
  0xf1   : > { %v274_v56 = vadd.f32 1e-08, %v266_v54  ;;  %v273_v57 = vadd.f32 1e-08, %v264_v55 }
  0xf3   : > { %4751 = vrsqrt.f32 %v274_v56 }
  0xf4   : > { %v4740_v58 = vpop.eup %4739  ;;  %4753 = vrsqrt.f32 %v273_v57 }
  0xf5   : > { %v4742_v59 = vpop.eup %4741  ;;  %v285_v60 = vmul.f32 %v4740_v58, %v5461_v0 }
  0xf6   : > { %v283_v61 = vmul.f32 %v4742_v59, %v5464_v1 }
  0xf7   : > { %293 = vst [vmem:[#allocation2 + $0x18] sm:$0xff] %v285_v60 }
  0xf8   : > { %v4744_v62 = vpop.eup %4743  ;;  %291 = vst [vmem:[#allocation2 + $0x30] sm:$0xff] %v283_v61 }
  0xf9   : > { %v4746_v63 = vpop.eup %4745  ;;  %v286_v3 = vmul.f32 %v4744_v62, %v5467_v2 }
  0xfa   : > { %v284_v4 = vmul.f32 %v4746_v63, %v5474_v5 }
  0xfb   : > { %294 = vst [vmem:[#allocation2 + $0x10] sm:$0xff] %v286_v3 }
  0xfc   : > { %v4748_v6 = vpop.eup %4747  ;;  %292 = vst [vmem:[#allocation2] sm:$0xff] %v284_v4 }
  0xfd   : > { %v4750_v7 = vpop.eup %4749  ;;  %v288_v10 = vmul.f32 %v4748_v6, %v5481_v8 }
  0xfe   : > { %v287_v11 = vmul.f32 %v4750_v7, %v5484_v9 }
  0xff   : > { %296 = vst [vmem:[#allocation2 + $0x20] sm:$0xff] %v288_v10 }
 0x100   : > { %v4752_v0 = vpop.eup %4751  ;;  %295 = vst [vmem:[#allocation2 + $0x8] sm:$0xff] %v287_v11 }
 0x101   : > { %v4754_v1 = vpop.eup %4753  ;;  %v290_v14 = vmul.f32 %v4752_v0, %v5491_v12 }
 0x102   : > { %v289_v15 = vmul.f32 %v4754_v1, %v5494_v13 }
 0x103   : > { %298 = vst [vmem:[#allocation2 + $0x38] sm:$0xff] %v290_v14 }
 0x104   : > { %297 = vst [vmem:[#allocation2 + $0x28] sm:$0xff] %v289_v15 }
 0x105 PF: > { %v397_v2 = vld [vmem:[%s5444_s7 + $0x38] sm:$0xff]  ;;  %v396_v5 = vld [vmem:[%s5444_s7 + $0x30] sm:$0xff]  ;;  %v399_v8 = vlaneseq  ;;  %v382_v9 = vld [vmem:[%s5437_s1] sm:$0xff]  ;;  %v5249_v26 = vmov 1.0  }
 0x106   : > { %4411 = vmatprep.subr.mxu0 %v397_v2  ;;  %4427 = vmatprep.mubr.f32.mxu0 %v382_v9  ;;  %v395_v12 = vld [vmem:[%s5444_s7 + $0x28] sm:$0xff]  ;;  %v5540_v22 = vld [vmem:[#allocation3] ss:$0 sm:$0xff]  ;;  %v394_v24 = vld [vmem:[%s5444_s7 + $0x20] sm:$0xff] }
 0x107   : > { %4412 = vmatpush3.xpose.msra.mxu0 %v397_v2  ;;  %v5528_v16 = vshrl.u32 %v399_v8, 7  ;;  %v5530_v17 = vand.u32 127, %v399_v8  ;;  %3117 = vbcast.lane.b32.xlu1 %v5540_v22, 264  ;;  %v393_v29 = vld [vmem:[%s5444_s7 + $0x18] sm:$0xff]  ;;  %v392_v30 = vld [vmem:[%s5444_s7 + $0x10] sm:$0xff]  ;;  %v391_v31 = vld [vmem:[%s5444_s7 + $0x8] sm:$0xff] }
 0x108   : > { %4413 = vmatprep.subr.mxu0 %v396_v5  ;;  %3113 = vbcast.lane.b32.xlu0 %v5540_v22, 256  ;;  %v390_v32 = vld [vmem:[%s5444_s7] sm:$0xff]  ;;  %v5594_v33 = vld [vmem:[%s5437_s1 + $0x8] sm:$0xff]  ;;  %v5597_v34 = vld [vmem:[%s5437_s1 + $0x10] sm:$0xff] }
 0x109   : > { %6751 = vst [vmem:[#allocation13_spill] sm:$0xff] %v5528_v16  ;;  %6752 = vst [vmem:[#allocation14_spill] sm:$0xff] %v5530_v17  ;;  %v407_v13 = vadd.s32 56, %v5528_v16  ;;  %v5535_v18 = vmul.u32 8, %v5530_v17  ;;  %v419_v19 = vadd.s32 1, %v5530_v17  ;;  %v406_v20 = vadd.s32 48, %v5528_v16 }
 0x10a   : > { %v405_v21 = vadd.s32 40, %v5528_v16  ;;  %v5602_v35 = vld [vmem:[%s5437_s1 + $0x18] sm:$0xff]  ;;  %v5605_v36 = vld [vmem:[%s5437_s1 + $0x20] sm:$0xff]  ;;  %v5611_v37 = vld [vmem:[%s5437_s1 + $0x28] sm:$0xff]  ;;  %v404_v40 = vadd.s32 32, %v5528_v16  ;;  %v403_v41 = vadd.s32 24, %v5528_v16 }
 0x10b   : > { %4414 = vmatpush3.xpose.msra.mxu0 %v396_v5  ;;  %vm418_vm7 = vcmp.ge.s32.totalorder %v407_v13, %v5535_v18  ;;  %v5543_v23 = vmul.u32 8, %v419_v19  ;;  %vm417_vm8 = vcmp.ge.s32.totalorder %v406_v20, %v5535_v18  ;;  %3121 = vbcast.lane.b32.xlu1 %v5540_v22, 272  ;;  %v5614_v38 = vld [vmem:[%s5437_s1 + $0x30] sm:$0xff]  ;;  %v5619_v39 = vld [vmem:[%s5437_s1 + $0x38] sm:$0xff]  ;;  %v402_v43 = vadd.s32 16, %v5528_v16 }
 0x10c   : > { %4415 = vmatprep.subr.mxu0 %v395_v12  ;;  %vm416_vm11 = vcmp.ge.s32.totalorder %v405_v21, %v5535_v18  ;;  %3125 = vbcast.lane.b32.xlu0 %v5540_v22, 280  ;;  %vm415_vm0 = vcmp.ge.s32.totalorder %v404_v40, %v5535_v18  ;;  %vm414_vm3 = vcmp.ge.s32.totalorder %v403_v41, %v5535_v18  ;;  %v401_v45 = vadd.s32 8, %v5528_v16 }
 0x10d   : > { %vm428_vm9 = vcmp.lt.s32.totalorder %v407_v13, %v5543_v23  ;;  %vm427_vm10 = vcmp.lt.s32.totalorder %v406_v20, %v5543_v23  ;;  %vm426_vm12 = vcmp.lt.s32.totalorder %v405_v21, %v5543_v23  ;;  %vm425_vm1 = vcmp.lt.s32.totalorder %v404_v40, %v5543_v23 }
 0x10e   : > { %vm5553_vm13 = vmand %vm418_vm7, %vm428_vm9  ;;  %vm424_vm4 = vcmp.lt.s32.totalorder %v403_v41, %v5543_v23  ;;  %vm413_vm6 = vcmp.ge.s32.totalorder %v402_v43, %v5535_v18  ;;  %vm423_vm7 = vcmp.lt.s32.totalorder %v402_v43, %v5543_v23  ;;  %vm412_vm9 = vcmp.ge.s32.totalorder %v401_v45, %v5535_v18 }
 0x10f   : > { %4416 = vmatpush3.xpose.msra.mxu0 %v395_v12  ;;  %4439 = vmatprep.subr.msk.mxu1 %vm5553_vm13, %v5249_v26  ;;  %vm5560_vm14 = vmand %vm417_vm8, %vm427_vm10  ;;  %vm422_vm10 = vcmp.lt.s32.totalorder %v401_v45, %v5543_v23  ;;  %v455_v40 = vadd.s32 1, %v5528_v16 }
 0x110   : > { %4417 = vmatprep.subr.mxu0 %v394_v24  ;;  %4440 = vmatpush3.msk.msra.mxu1 %vm5553_vm13, %v5249_v26  ;;  %vm5567_vm15 = vmand %vm416_vm11, %vm426_vm12  ;;  %vm411_vm12 = vcmp.ge.s32.totalorder %v5528_v16, %v5535_v18 }
 0x111   : > { %4441 = vmatprep.subr.msk.mxu1 %vm5560_vm14, %v5249_v26  ;;  %3129 = vbcast.lane.b32.xlu1 %v5540_v22, 288  ;;  %vm5626_vm2 = vmand %vm415_vm0, %vm425_vm1  ;;  %vm421_vm0 = vcmp.lt.s32.totalorder %v5528_v16, %v5543_v23  ;;  %v456_v41 = vmul.u32 8, %v455_v40 }
 0x112   : > { %4442 = vmatpush3.msk.msra.mxu1 %vm5560_vm14, %v5249_v26  ;;  %3133 = vbcast.lane.b32.xlu0 %v5540_v22, 296  ;;  %vm5639_vm5 = vmand %vm414_vm3, %vm424_vm4 }
 0x113   : > { %4418 = vmatpush3.xpose.msra.mxu0 %v394_v24  ;;  %4443 = vmatprep.subr.msk.mxu1 %vm5567_vm15, %v5249_v26  ;;  %vm5652_vm8 = vmand %vm413_vm6, %vm423_vm7 }
 0x114   : > { %4419 = vmatprep.subr.mxu0 %v393_v29  ;;  %4444 = vmatpush3.msk.msra.mxu1 %vm5567_vm15, %v5249_v26  ;;  %vm5664_vm11 = vmand %vm412_vm9, %vm422_vm10  ;;  %vm612_vm9 = vcmask 523264  }
 0x115   : > { %3137 = vbcast.lane.b32.xlu1 %v5540_v22, 304  ;;  %4445 = vmatprep.subr.msk.mxu1 %vm5626_vm2, %v5249_v26  ;;  %vm5678_vm1 = vmand %vm411_vm12, %vm421_vm0 }
 0x116   : > { %3141 = vbcast.lane.b32.xlu0 %v5540_v22, 312  ;;  %4446 = vmatpush3.msk.msra.mxu1 %vm5626_vm2, %v5249_v26 }
 0x117   : > { %4420 = vmatpush3.xpose.msra.mxu0 %v393_v29  ;;  %4447 = vmatprep.subr.msk.mxu1 %vm5639_vm5, %v5249_v26 }
 0x118   : > { %4421 = vmatprep.subr.mxu0 %v392_v30  ;;  %4448 = vmatpush3.msk.msra.mxu1 %vm5639_vm5, %v5249_v26 }
 0x119   : > { %4449 = vmatprep.subr.msk.mxu1 %vm5652_vm8, %v5249_v26 }
 0x11a   : > { %4450 = vmatpush3.msk.msra.mxu1 %vm5652_vm8, %v5249_v26 }
 0x11b   : > { %4422 = vmatpush3.xpose.msra.mxu0 %v392_v30  ;;  %4451 = vmatprep.subr.msk.mxu1 %vm5664_vm11, %v5249_v26 }
 0x11c   : > { %4423 = vmatprep.subr.mxu0 %v391_v31  ;;  %4452 = vmatpush3.msk.msra.mxu1 %vm5664_vm11, %v5249_v26 }
 0x11d   : > { %4453 = vmatprep.subr.msk.mxu1 %vm5678_vm1, %v5249_v26 }
 0x11e   : > { %4454 = vmatpush3.msk.msra.mxu1 %vm5678_vm1, %v5249_v26 }
 0x11f   : > { %4424 = vmatpush3.xpose.msra.mxu0 %v391_v31 }
 0x120   : > { %4425 = vmatprep.subr.mxu0 %v390_v32 }
 0x123   : > { %4426 = vmatpush3.xpose.msra.mxu0 %v390_v32  ;;  %v453_v32 = vmul.u32 8, %v5528_v16 }
 0x124   : > { %4481 = vmatprep.subr.mxu0 %v382_v9 }
 0x126   : > { %4428 = vmatmul.mubr.f32.vlgmr.msra.gmra.mxu0 %v5594_v33 }
 0x127   : > { %4430 = vmatprep.mubr.f32.mxu0 %v5597_v34  ;;  %4482 = vmatpush3.msra.mxu0 %v382_v9 }
 0x128   : > { %4509 = vmatprep.subr.mxu0 %v5597_v34 }
 0x12a   : > { %4431 = vmatmul.mubr.f32.gmra.mxu0 %v5602_v35 }
 0x12b   : > { %4433 = vmatprep.mubr.f32.mxu0 %v5605_v36 }
 0x12e   : > { %4434 = vmatmul.mubr.f32.gmra.mxu0 %v5611_v37 }
 0x12f   : > { %4436 = vmatprep.mubr.f32.mxu0 %v5614_v38 }
 0x132   : > { %4437 = vmatmul.mubr.f32.gmra.mxu0 %v5619_v39 }
 0x1e6   : > { %v4429_v49 = vpop.f32.mrf.mxu0 }
 0x1e7   : > { %vm567_vm3 = vcmp.gt.f32.partialorder %v4429_v49, 0.0  ;;  %v575_v50 = vmul.f32 0.1, %v4429_v49 }
 0x1e8   : > { %v527_v51 = vpop.f32.mrf.mxu0 }
 0x1e9   : > { %v583_v52 = vsel %vm567_vm3, %v4429_v49, %v575_v50  ;;  %vm566_vm4 = vcmp.gt.f32.partialorder %v527_v51, 0.0  ;;  %v574_v53 = vmul.f32 0.1, %v527_v51 }
 0x1ea   : > { %v4432_v54 = vpop.f32.mrf.mxu0  ;;  %v5689_v55 = vmul.f32 %v5540_v22, %v583_v52 }
 0x1eb   : > { %v582_v56 = vsel %vm566_vm4, %v527_v51, %v574_v53  ;;  %vm569_vm6 = vcmp.gt.f32.partialorder %v4432_v54, 0.0  ;;  %v577_v57 = vmul.f32 0.1, %v4432_v54  ;;  %vm454_vm4 = vcmp.ge.s32.totalorder %v5530_v17, %v453_v32 }
 0x1ec   : > { %v537_v58 = vpop.f32.mrf.mxu0  ;;  %v5692_v59 = vmul.f32 %v5540_v22, %v582_v56  ;;  %v605_v4 = vmul.f32 %v5689_v55, %v5689_v55 }
 0x1ed   : > { %v585_v60 = vsel %vm569_vm6, %v4432_v54, %v577_v57  ;;  %vm568_vm7 = vcmp.gt.f32.partialorder %v537_v58, 0.0  ;;  %v576_v61 = vmul.f32 0.1, %v537_v58  ;;  %vm457_vm6 = vcmp.lt.s32.totalorder %v5530_v17, %v456_v41 }
 0x1ee   : > { %v5695_v62 = vmul.f32 %v5540_v22, %v585_v60  ;;  %v4435_v63 = vpop.f32.mrf.mxu0  ;;  %v604_v3 = vmul.f32 %v5692_v59, %v5692_v59 }
 0x1ef   : > { %v584_v6 = vsel %vm568_vm7, %v537_v58, %v576_v61  ;;  %vm571_vm10 = vcmp.gt.f32.partialorder %v4435_v63, 0.0  ;;  %v579_v7 = vmul.f32 0.1, %v4435_v63  ;;  %vm458_vm7 = vmand %vm454_vm4, %vm457_vm6  ;;  %vm3835_vm4 = vcmask 1044484  }
 0x1f0   : > { %v5702_v10 = vmul.f32 %v5540_v22, %v584_v6  ;;  %v547_v11 = vpop.f32.mrf.mxu0  ;;  %4455 = vmatprep.mubr.msk.f32.mxu1 %vm612_vm9, %v604_v3  ;;  %v607_v0 = vmul.f32 %v5695_v62, %v5695_v62  ;;  %4467 = vmatprep.subr.msk.mxu1 %vm458_vm7, %v5249_v26  ;;  %vm3837_vm6 = vcmask 1045509  }
 0x1f1   : > { %v587_v1 = vsel %vm571_vm10, %v4435_v63, %v579_v7  ;;  %vm570_vm12 = vcmp.gt.f32.partialorder %v547_v11, 0.0  ;;  %v578_v14 = vmul.f32 0.1, %v547_v11  ;;  %4456 = vmatmul.mubr.msk.f32.vlgmr.msra.gmra.mxu1 %vm612_vm9, %v605_v4  ;;  %vm750_vm10 = vcmask 64512  }
 0x1f2   : > { %v606_v15 = vmul.f32 %v5702_v10, %v5702_v10  ;;  %v5711_v2 = vmul.f32 %v5540_v22, %v587_v1  ;;  %v4438_v5 = vpop.f32.mrf.mxu0  ;;  %4468 = vmatpush3.msk.msra.mxu1 %vm458_vm7, %v5249_v26  ;;  %vm3839_vm7 = vcmask 1046534  }
 0x1f3   : > { %v586_v8 = vsel %vm570_vm12, %v547_v11, %v578_v14  ;;  %vm573_vm0 = vcmp.gt.f32.partialorder %v4438_v5, 0.0  ;;  %v581_v9 = vmul.f32 0.1, %v4438_v5  ;;  %4495 = vmatprep.subr.mxu1 %v5594_v33  ;;  %vm3829_vm12 = vcmask 1041409  }
 0x1f4   : > { %v5714_v12 = vmul.f32 %v5540_v22, %v586_v8  ;;  %v557_v13 = vpop.f32.mrf.mxu0  ;;  %4458 = vmatprep.mubr.msk.f32.mxu1 %vm612_vm9, %v606_v15  ;;  %v609_v18 = vmul.f32 %v5711_v2, %v5711_v2 }
 0x1f5   : > { %v589_v19 = vsel %vm573_vm0, %v4438_v5, %v581_v9  ;;  %vm572_vm3 = vcmp.gt.f32.partialorder %v557_v13, 0.0  ;;  %v580_v20 = vmul.f32 0.1, %v557_v13  ;;  %4459 = vmatmul.mubr.msk.f32.gmra.mxu1 %vm612_vm9, %v607_v0  ;;  %vm3831_vm0 = vcmask 1042434  }
 0x1f6   : > { %v608_v21 = vmul.f32 %v5714_v12, %v5714_v12  ;;  %v5723_v23 = vmul.f32 %v5540_v22, %v589_v19 }
 0x1f7   : > { %v588_v24 = vsel %vm572_vm3, %v557_v13, %v580_v20  ;;  %vm6734_vm3 = vcmask 1043459  }
 0x1f8   : > { %v5726_v29 = vmul.f32 %v5540_v22, %v588_v24  ;;  %4461 = vmatprep.mubr.msk.f32.mxu1 %vm612_vm9, %v608_v21  ;;  %v611_v30 = vmul.f32 %v5723_v23, %v5723_v23 }
 0x1f9   : > { %4462 = vmatmul.mubr.msk.f32.gmra.mxu1 %vm612_vm9, %v609_v18 }
 0x1fa   : > { %v610_v31 = vmul.f32 %v5726_v29, %v5726_v29 }
 0x1fc   : > { %4464 = vmatprep.mubr.msk.f32.mxu1 %vm612_vm9, %v610_v31 }
 0x1fd   : > { %4465 = vmatmul.mubr.msk.f32.gmra.mxu1 %vm612_vm9, %v611_v30 }
 0x2b1   : > { %v4457_v43 = vpop.f32.mrf.mxu1 }
 0x2b2   : > { %v709_v45 = vadd.f32 1e-08, %v4457_v43 }
 0x2b3   : > { %v703_v49 = vpop.f32.mrf.mxu1 }
 0x2b4   : > { %v704_v50 = vadd.f32 1e-08, %v703_v49 }
 0x2b5   : > { %v4460_v51 = vpop.f32.mrf.mxu1 }
 0x2b6   : > { %4757 = vrsqrt.f32 %v704_v50  ;;  %v719_v52 = vadd.f32 1e-08, %v4460_v51 }
 0x2b7   : > { %4759 = vrsqrt.f32 %v709_v45  ;;  %v713_v53 = vpop.f32.mrf.mxu1 }
 0x2b8   : > { %v714_v54 = vadd.f32 1e-08, %v713_v53  ;;  %4761 = vrsqrt.f32 %v719_v52 }
 0x2b9   : > { %v4463_v56 = vpop.f32.mrf.mxu1 }
 0x2ba   : > { %4763 = vrsqrt.f32 %v714_v54  ;;  %v729_v57 = vadd.f32 1e-08, %v4463_v56 }
 0x2bb   : > { %v723_v58 = vpop.f32.mrf.mxu1 }
 0x2bc   : > { %v724_v60 = vadd.f32 1e-08, %v723_v58  ;;  %4765 = vrsqrt.f32 %v729_v57 }
 0x2bd   : > { %v4466_v61 = vpop.f32.mrf.mxu1 }
 0x2be   : > { %4767 = vrsqrt.f32 %v724_v60  ;;  %v739_v63 = vadd.f32 1e-08, %v4466_v61 }
 0x2bf   : > { %v733_v3 = vpop.f32.mrf.mxu1 }
 0x2c0   : > { %v734_v4 = vadd.f32 1e-08, %v733_v3  ;;  %4769 = vrsqrt.f32 %v739_v63 }
 0x2c2   : > { %4771 = vrsqrt.f32 %v734_v4 }
 0x2c3   : > { %v4758_v6 = vpop.eup %4757 }
 0x2c4   : > { %v4760_v7 = vpop.eup %4759  ;;  %4469 = vmatprep.mubr.msk.f32.mxu1 %vm750_vm10, %v4758_v6 }
 0x2c5   : > { %4470 = vmatmul.mubr.msk.f32.vlgmr.msra.gmra.mxu1 %vm750_vm10, %v4760_v7  ;;  %v4762_v11 = vpop.eup %4761 }
 0x2c6   : > { %4496 = vmatpush3.msra.mxu1 %v5594_v33 }
 0x2c7   : > { %v4764_v0 = vpop.eup %4763  ;;  %4523 = vmatprep.subr.mxu1 %v5602_v35 }
 0x2c8   : > { %4472 = vmatprep.mubr.msk.f32.mxu1 %vm750_vm10, %v4764_v0 }
 0x2c9   : > { %4473 = vmatmul.mubr.msk.f32.gmra.mxu1 %vm750_vm10, %v4762_v11  ;;  %v4766_v1 = vpop.eup %4765 }
 0x2cb   : > { %v4768_v14 = vpop.eup %4767 }
 0x2cc   : > { %4475 = vmatprep.mubr.msk.f32.mxu1 %vm750_vm10, %v4768_v14 }
 0x2cd   : > { %4476 = vmatmul.mubr.msk.f32.gmra.mxu1 %vm750_vm10, %v4766_v1  ;;  %v4770_v15 = vpop.eup %4769 }
 0x2cf   : > { %v4772_v5 = vpop.eup %4771 }
 0x2d0   : > { %4478 = vmatprep.mubr.msk.f32.mxu1 %vm750_vm10, %v4772_v5 }
 0x2d1   : > { %4479 = vmatmul.mubr.msk.f32.gmra.mxu1 %vm750_vm10, %v4770_v15 }
 0x385   : > { %v4471_v33 = vpop.f32.mrf.mxu1 }
 0x386   : > { %v881_v8 = vmul.f32 %v4471_v33, %v5689_v55 }
 0x387   : > { %v841_v9 = vpop.f32.mrf.mxu1 }
 0x388   : > { %v889_v13 = vmul.f32 9.0, %v881_v8  ;;  %v880_v18 = vmul.f32 %v841_v9, %v5692_v59 }
 0x389   : > { %v4474_v19 = vpop.f32.mrf.mxu1 }
 0x38a   : > { %v903_v20 = vsel %vm612_vm9, %v889_v13, -inf  ;;  %v888_v21 = vmul.f32 9.0, %v880_v18  ;;  %v883_v24 = vmul.f32 %v4474_v19, %v5695_v62 }
 0x38b   : > { %v904_v30 = vrot.slane %v903_v20, 4  ;;  %v851_v31 = vpop.f32.mrf.mxu1 }
 0x38c   : > { %v896_v32 = vsel %vm612_vm9, %v888_v21, -inf  ;;  %v5758_v40 = vmul.f32 9.0, %v883_v24  ;;  %v882_v41 = vmul.f32 %v851_v31, %v5702_v10 }
 0x38d   : > { %v905_v43 = vmax.f32 %v903_v20, %v904_v30  ;;  %v897_v55 = vrot.slane %v896_v32, 4  ;;  %v4477_v45 = vpop.f32.mrf.mxu1 }
 0x38e   : > { %v917_v59 = vsel %vm612_vm9, %v5758_v40, -inf  ;;  %v5763_v49 = vmul.f32 9.0, %v882_v41  ;;  %v885_v50 = vmul.f32 %v4477_v45, %v5711_v2 }
 0x38f   : > { %v906_v51 = vrot.slane %v905_v43, 2  ;;  %v898_v62 = vmax.f32 %v896_v32, %v897_v55  ;;  %v918_v52 = vrot.slane %v917_v59, 4  ;;  %v861_v53 = vpop.f32.mrf.mxu1 }
 0x390   : > { %v910_v54 = vsel %vm612_vm9, %v5763_v49, -inf  ;;  %v5768_v56 = vmul.f32 9.0, %v885_v50  ;;  %v884_v10 = vmul.f32 %v861_v53, %v5714_v12 }
 0x391   : > { %v907_v57 = vmax.f32 %v905_v43, %v906_v51  ;;  %v899_v58 = vrot.slane %v898_v62, 2  ;;  %v919_v60 = vmax.f32 %v917_v59, %v918_v52  ;;  %v911_v61 = vrot.slane %v910_v54, 4  ;;  %v4480_v63 = vpop.f32.mrf.mxu1 }
 0x392   : > { %v931_v3 = vsel %vm612_vm9, %v5768_v56, -inf  ;;  %v892_v2 = vmul.f32 9.0, %v884_v10  ;;  %v887_v4 = vmul.f32 %v4480_v63, %v5723_v23 }
 0x393   : > { %v908_v6 = vrot.slane %v907_v57, 1  ;;  %v900_v7 = vmax.f32 %v898_v62, %v899_v58  ;;  %v920_v11 = vrot.slane %v919_v60, 2  ;;  %v912_v0 = vmax.f32 %v910_v54, %v911_v61  ;;  %v871_v1 = vpop.f32.mrf.mxu1 }
 0x394   : > { %v932_v14 = vrot.slane %v931_v3, 4  ;;  %v924_v15 = vsel %vm612_vm9, %v892_v2, -inf  ;;  %v895_v12 = vmul.f32 9.0, %v887_v4  ;;  %v886_v5 = vmul.f32 %v871_v1, %v5726_v29 }
 0x395   : > { %v909_v33 = vmax.f32 %v907_v57, %v908_v6  ;;  %v901_v8 = vrot.slane %v900_v7, 1  ;;  %v921_v9 = vmax.f32 %v919_v60, %v920_v11  ;;  %v913_v18 = vrot.slane %v912_v0, 2 }
 0x396   : > { %v933_v19 = vmax.f32 %v931_v3, %v932_v14  ;;  %v925_v20 = vrot.slane %v924_v15, 4  ;;  %v945_v24 = vsel %vm612_vm9, %v895_v12, -inf  ;;  %v894_v23 = vmul.f32 9.0, %v886_v5 }
 0x397   : > { %v953_v30 = vsub.f32 %v889_v13, %v909_v33  ;;  %v902_v31 = vmax.f32 %v900_v7, %v901_v8  ;;  %v922_v32 = vrot.slane %v921_v9, 1  ;;  %v914_v41 = vmax.f32 %v912_v0, %v913_v18 }
 0x398   : > { %v934_v43 = vrot.slane %v933_v19, 2  ;;  %v926_v55 = vmax.f32 %v924_v15, %v925_v20  ;;  %v946_v45 = vrot.slane %v945_v24, 4  ;;  %v938_v59 = vsel %vm612_vm9, %v894_v23, -inf }
 0x399   : > { %v962_v50 = vmul.f32 1.442695, %v953_v30  ;;  %v952_v29 = vsub.f32 %v888_v21, %v902_v31  ;;  %v923_v51 = vmax.f32 %v921_v9, %v922_v32  ;;  %v915_v62 = vrot.slane %v914_v41, 1 }
 0x39a   : > { %v935_v52 = vmax.f32 %v933_v19, %v934_v43  ;;  %v927_v53 = vrot.slane %v926_v55, 2  ;;  %v947_v54 = vmax.f32 %v945_v24, %v946_v45  ;;  %v939_v10 = vrot.slane %v938_v59, 4 }
 0x39b   : > { %4773 = vpow2.f32 %v962_v50  ;;  %v960_v57 = vmul.f32 1.442695, %v952_v29  ;;  %v955_v13 = vsub.f32 %v5758_v40, %v923_v51  ;;  %v916_v58 = vmax.f32 %v914_v41, %v915_v62 }
 0x39c   : > { %v936_v60 = vrot.slane %v935_v52, 1  ;;  %v928_v61 = vmax.f32 %v926_v55, %v927_v53  ;;  %v948_v63 = vrot.slane %v947_v54, 2  ;;  %v940_v3 = vmax.f32 %v938_v59, %v939_v10 }
 0x39d   : > { %4775 = vpow2.f32 %v960_v57  ;;  %v966_v4 = vmul.f32 1.442695, %v955_v13  ;;  %v954_v6 = vsub.f32 %v5763_v49, %v916_v58 }
 0x39e   : > { %v937_v21 = vmax.f32 %v935_v52, %v936_v60  ;;  %v929_v7 = vrot.slane %v928_v61, 1  ;;  %v949_v11 = vmax.f32 %v947_v54, %v948_v63  ;;  %v941_v0 = vrot.slane %v940_v3, 2 }
 0x39f   : > { %4777 = vpow2.f32 %v966_v4  ;;  %v964_v1 = vmul.f32 1.442695, %v954_v6 }
 0x3a0   : > { %v957_v14 = vsub.f32 %v5768_v56, %v937_v21  ;;  %v930_v15 = vmax.f32 %v928_v61, %v929_v7  ;;  %v950_v5 = vrot.slane %v949_v11, 1  ;;  %v942_v40 = vmax.f32 %v940_v3, %v941_v0 }
 0x3a1   : > { %4779 = vpow2.f32 %v964_v1 }
 0x3a2   : > { %v970_v33 = vmul.f32 1.442695, %v957_v14  ;;  %v956_v8 = vsub.f32 %v892_v2, %v930_v15  ;;  %v951_v9 = vmax.f32 %v949_v11, %v950_v5  ;;  %v943_v18 = vrot.slane %v942_v40, 1 }
 0x3a4   : > { %4781 = vpow2.f32 %v970_v33  ;;  %v968_v19 = vmul.f32 1.442695, %v956_v8  ;;  %v959_v20 = vsub.f32 %v895_v12, %v951_v9  ;;  %v944_v49 = vmax.f32 %v942_v40, %v943_v18 }
 0x3a6   : > { %4783 = vpow2.f32 %v968_v19  ;;  %v974_v24 = vmul.f32 1.442695, %v959_v20  ;;  %v958_v30 = vsub.f32 %v894_v23, %v944_v49 }
 0x3a8   : > { %v5781_v31 = vpop.eup %4773  ;;  %4785 = vpow2.f32 %v974_v24  ;;  %v972_v32 = vmul.f32 1.442695, %v958_v30 }
 0x3a9   : > { %v983_v56 = vsel %vm612_vm9, %v5781_v31, 0.0 }
 0x3aa   : > { %v5785_v41 = vpop.eup %4775  ;;  %v984_v43 = vrot.slane %v983_v56, 4  ;;  %4787 = vpow2.f32 %v972_v32 }
 0x3ab   : > { %v976_v2 = vsel %vm612_vm9, %v5785_v41, 0.0 }
 0x3ac   : > { %v5789_v55 = vpop.eup %4777  ;;  %v985_v12 = vadd.f32 %v984_v43, %v983_v56  ;;  %v977_v45 = vrot.slane %v976_v2, 4 }
 0x3ad   : > { %v997_v23 = vsel %vm612_vm9, %v5789_v55, 0.0 }
 0x3ae   : > { %v5793_v59 = vpop.eup %4779  ;;  %v978_v50 = vadd.f32 %v977_v45, %v976_v2  ;;  %v998_v29 = vrot.slane %v997_v23, 4  ;;  %v986_v51 = vrot.slane %v985_v12, 2 }
 0x3af   : > { %v990_v62 = vsel %vm612_vm9, %v5793_v59, 0.0 }
 0x3b0   : > { %v999_v52 = vadd.f32 %v998_v29, %v997_v23  ;;  %v991_v53 = vrot.slane %v990_v62, 4  ;;  %v987_v54 = vadd.f32 %v986_v51, %v985_v12  ;;  %v979_v10 = vrot.slane %v978_v50, 2 }
 0x3b1   : > { %v5797_v57 = vpop.eup %4781 }
 0x3b2   : > { %v992_v13 = vadd.f32 %v991_v53, %v990_v62  ;;  %v1011_v58 = vsel %vm612_vm9, %v5797_v57, 0.0  ;;  %v988_v60 = vrot.slane %v987_v54, 1  ;;  %v1000_v61 = vrot.slane %v999_v52, 2 }
 0x3b3   : > { %v5801_v63 = vpop.eup %4783  ;;  %v1012_v3 = vrot.slane %v1011_v58, 4  ;;  %v980_v4 = vadd.f32 %v979_v10, %v978_v50 }
 0x3b4   : > { %v1004_v6 = vsel %vm612_vm9, %v5801_v63, 0.0  ;;  %v989_v21 = vadd.f32 %v988_v60, %v987_v54  ;;  %v1001_v7 = vadd.f32 %v1000_v61, %v999_v52  ;;  %v993_v11 = vrot.slane %v992_v13, 2 }
 0x3b5   : > { %v5805_v0 = vpop.eup %4785  ;;  %v1013_v1 = vadd.f32 %v1012_v3, %v1011_v58  ;;  %v1005_v14 = vrot.slane %v1004_v6, 4  ;;  %v981_v15 = vrot.slane %v980_v4, 1 }
 0x3b6   : > { %v1025_v5 = vsel %vm612_vm9, %v5805_v0, 0.0  ;;  %4789 = vrcp.f32 %v989_v21  ;;  %v1002_v40 = vrot.slane %v1001_v7, 1  ;;  %v994_v33 = vadd.f32 %v993_v11, %v992_v13 }
 0x3b7   : > { %v5809_v8 = vpop.eup %4787  ;;  %v1006_v9 = vadd.f32 %v1005_v14, %v1004_v6  ;;  %v1026_v18 = vrot.slane %v1025_v5, 4  ;;  %v982_v19 = vadd.f32 %v981_v15, %v980_v4  ;;  %v1014_v20 = vrot.slane %v1013_v1, 2 }
 0x3b8   : > { %v1018_v49 = vsel %vm612_vm9, %v5809_v8, 0.0  ;;  %v1003_v24 = vadd.f32 %v1002_v40, %v1001_v7  ;;  %v995_v30 = vrot.slane %v994_v33, 1 }
 0x3b9   : > { %v1027_v32 = vadd.f32 %v1026_v18, %v1025_v5  ;;  %v1019_v56 = vrot.slane %v1018_v49, 4  ;;  %4791 = vrcp.f32 %v982_v19  ;;  %v1007_v43 = vrot.slane %v1006_v9, 2 }
 0x3ba   : > { %4793 = vrcp.f32 %v1003_v24  ;;  %v996_v2 = vadd.f32 %v995_v30, %v994_v33  ;;  %v1015_v12 = vadd.f32 %v1014_v20, %v1013_v1 }
 0x3bb   : > { %v1020_v45 = vadd.f32 %v1019_v56, %v1018_v49  ;;  %v1008_v23 = vadd.f32 %v1007_v43, %v1006_v9  ;;  %v1028_v50 = vrot.slane %v1027_v32, 2 }
 0x3bc   : > { %4795 = vrcp.f32 %v996_v2  ;;  %v1016_v29 = vrot.slane %v1015_v12, 1 }
 0x3bd   : > { %v1009_v51 = vrot.slane %v1008_v23, 1  ;;  %v1021_v62 = vrot.slane %v1020_v45, 2  ;;  %v1029_v52 = vadd.f32 %v1028_v50, %v1027_v32 }
 0x3be   : > { %v1017_v53 = vadd.f32 %v1016_v29, %v1015_v12 }
 0x3bf   : > { %v1010_v54 = vadd.f32 %v1009_v51, %v1008_v23  ;;  %v1022_v10 = vadd.f32 %v1021_v62, %v1020_v45  ;;  %v1030_v13 = vrot.slane %v1029_v52, 1 }
 0x3c0   : > { %4797 = vrcp.f32 %v1017_v53 }
 0x3c1   : > { %4799 = vrcp.f32 %v1010_v54  ;;  %v1023_v58 = vrot.slane %v1022_v10, 1  ;;  %v1031_v60 = vadd.f32 %v1030_v13, %v1029_v52 }
 0x3c3   : > { %v4790_v61 = vpop.eup %4789  ;;  %v1024_v3 = vadd.f32 %v1023_v58, %v1022_v10  ;;  %4801 = vrcp.f32 %v1031_v60 }
 0x3c4   : > { %v1041_v4 = vmul.f32 %v4790_v61, %v5781_v31  ;;  %v3216_v6 = vmul.f32 6.0, %v4790_v61 }
 0x3c5   : > { %4803 = vrcp.f32 %v1024_v3 }
 0x3c6   : > { %v4792_v21 = vpop.eup %4791  ;;  %v3225_v7 = vmul.f32 1.442695, %v3216_v6  ;;  %1080 = vxpose.xlu0.b32.start.end [1/1] (short) (narrow) %v1041_v4, 64 }
 0x3c7   : > { %v4794_v11 = vpop.eup %4793  ;;  %v3215_v1 = vmul.f32 6.0, %v4792_v21  ;;  %v1040_v6 = vmul.f32 %v4792_v21, %v5785_v41 }
 0x3c8   : > { %4805 = vpow2.f32 %v3225_v7  ;;  %v1043_v14 = vmul.f32 %v4794_v11, %v5789_v55  ;;  %v3218_v15 = vmul.f32 6.0, %v4794_v11 }
 0x3c9   : > { %v4796_v5 = vpop.eup %4795  ;;  %v3223_v40 = vmul.f32 1.442695, %v3215_v1 }
 0x3ca   : > { %v3229_v33 = vmul.f32 1.442695, %v3218_v15  ;;  %1144 = vxpose.xlu1.b32.start.end [1/1] (short) (narrow) %v1043_v14, 64  ;;  %v3217_v9 = vmul.f32 6.0, %v4796_v5 }
 0x3cb   : > { %4807 = vpow2.f32 %v3223_v40 }
 0x3cc   : > { %4809 = vpow2.f32 %v3229_v33  ;;  %v3227_v18 = vmul.f32 1.442695, %v3217_v9  ;;  %v1042_v9 = vmul.f32 %v4796_v5, %v5793_v59 }
 0x3cd   : > { %v4798_v31 = vpop.eup %4797 }
 0x3ce   : > { %v4800_v19 = vpop.eup %4799  ;;  %4811 = vpow2.f32 %v3227_v18  ;;  %v3220_v20 = vmul.f32 6.0, %v4798_v31  ;;  %v1045_v59 = vmul.f32 %v4798_v31, %v5797_v57 }
 0x3cf   : > { %v3219_v49 = vmul.f32 6.0, %v4800_v19 }
 0x3d0   : > { %v4802_v24 = vpop.eup %4801  ;;  %v3233_v30 = vmul.f32 1.442695, %v3220_v20 }
 0x3d1   : > { %v3231_v32 = vmul.f32 1.442695, %v3219_v49  ;;  %v3222_v56 = vmul.f32 6.0, %v4802_v24  ;;  %v1047_v5 = vmul.f32 %v4802_v24, %v5805_v0 }
 0x3d2   : > { %v4804_v43 = vpop.eup %4803  ;;  %4813 = vpow2.f32 %v3233_v30 }
 0x3d3   : > { %4815 = vpow2.f32 %v3231_v32  ;;  %v3221_v55 = vmul.f32 6.0, %v4804_v43  ;;  %v3237_v2 = vmul.f32 1.442695, %v3222_v56  ;;  %v1044_v56 = vmul.f32 %v4800_v19, %v5801_v63 }
 0x3d5   : > { %v4806_v12 = vpop.eup %4805  ;;  %v3235_v45 = vmul.f32 1.442695, %v3221_v55  ;;  %4817 = vpow2.f32 %v3237_v2  ;;  %v5838_v55 = vpop.permute.xlu0 %3113 }
 0x3d6   : > { %v3240_v23 = vmul.f32 %v4806_v12, %v5540_v22  ;;  %v5840_v2 = vpop.permute.xlu1 %3117 }
 0x3d7   : > { %4819 = vpow2.f32 %v3235_v45 }
 0x3d8   : > { %v4808_v50 = vpop.eup %4807  ;;  %v3923_v29 = vrot.slane %v3240_v23, 7 }
 0x3d9   : > { %v4810_v51 = vpop.eup %4809  ;;  %v3239_v62 = vmul.f32 %v4808_v50, %v5540_v22  ;;  %v5842_v12 = vpop.permute.xlu0 %3125 }
 0x3da   : > { %v3242_v53 = vmul.f32 %v4810_v51, %v5540_v22  ;;  %v5844_v45 = vpop.permute.xlu1 %3121 }
 0x3db   : > { %v4812_v52 = vpop.eup %4811  ;;  %v3924_v54 = vsel %vm3829_vm12, %v3923_v29, %v3239_v62 }
 0x3dc   : > { %v3241_v10 = vmul.f32 %v4812_v52, %v5540_v22  ;;  %v3927_v60 = vrot.slane %v3242_v53, 5 }
 0x3dd   : > { %v5846_v23 = vpop.permute.xlu0 %3133 }
 0x3de   : > { %v3925_v13 = vrot.slane %v3241_v10, 6  ;;  %v5848_v63 = vpop.permute.xlu1 %3129 }
 0x3df   : > { %v4814_v58 = vpop.eup %4813 }
 0x3e0   : > { %v4816_v61 = vpop.eup %4815  ;;  %v3244_v3 = vmul.f32 %v4814_v58, %v5540_v22  ;;  %v3926_v4 = vsel %vm3831_vm0, %v3925_v13, %v3924_v54 }
 0x3e1   : > { %v3243_v7 = vmul.f32 %v4816_v61, %v5540_v22  ;;  %v3928_v11 = vsel %vm6734_vm3, %v3927_v60, %v3926_v4  ;;  %vm3841_vm3 = vcmask 1047559   ;;  %v5850_v57 = vpop.permute.xlu0 %3141 }
 0x3e2   : > { %v4818_v1 = vpop.eup %4817  ;;  %v3931_v33 = vrot.slane %v3244_v3, 3  ;;  %v5852_v31 = vpop.permute.xlu1 %3137 }
 0x3e3   : > { %1048 = vxpose.xlu0.b32.start.end [1/1] (short) (narrow) %v1040_v6, 64  ;;  %v3929_v14 = vrot.slane %v3243_v7, 4  ;;  %v3246_v40 = vmul.f32 %v4818_v1, %v5540_v22 }
 0x3e4   : > { %v4820_v15 = vpop.eup %4819 }
 0x3e5   : > { %v3245_v18 = vmul.f32 %v4820_v15, %v5540_v22  ;;  %v3930_v20 = vsel %vm3835_vm4, %v3929_v14, %v3928_v11  ;;  %v3935_v49 = vrot.slane %v3246_v40, 1  ;;  %v1046_v22 = vmul.f32 %v4804_v43, %v5809_v8 }
 0x3e6   : > { %v3932_v41 = vsel %vm3837_vm6, %v3931_v33, %v3930_v20 }
 0x3e7   : > { %1112 = vxpose.xlu1.b32.start.end [1/1] (short) (narrow) %v1042_v9, 64  ;;  %v3933_v21 = vrot.slane %v3245_v18, 2 }
 0x3e9   : > { %v3934_v30 = vsel %vm3839_vm7, %v3933_v21, %v3932_v41 }
 0x3ea   : > { %v5832_v32 = vsel %vm3841_vm3, %v3935_v49, %v3934_v30 }
 0x400   : > { %1176 = vxpose.xlu0.b32.start.end [1/1] (short) (narrow) %v1044_v56, 64 }
 0x404   : > { %1208 = vxpose.xlu1.b32.start.end [1/1] (short) (narrow) %v1045_v59, 64 }
 0x41d   : > { %1240 = vxpose.xlu0.b32.start.end [1/1] (short) (narrow) %v1046_v22, 64 }
 0x421   : > { %1272 = vxpose.xlu1.b32.start.end [1/1] (short) (narrow) %v1047_v5, 64 }
 0x442   : > { %v1096_v8 = vpop.trf.xlu0 }
 0x443   : > { %4497 = vmatprep.mubr.msk.f32.mxu1 %vm750_vm10, %v1096_v8 }
 0x446   : > { %v1097_v0 = vpop.trf.xlu0  ;;  %v1160_v19 = vpop.trf.xlu1 }
 0x447   : > { %4498 = vmatmul.mubr.msk.f32.vlgmr.msra.gmra.mxu1 %vm750_vm10, %v1097_v0 }
 0x448   : > { %4524 = vmatpush3.msra.mxu1 %v5602_v35 }
 0x449   : > { %4551 = vmatprep.subr.mxu1 %v5611_v37 }
 0x44a   : > { %v1098_v24 = vpop.trf.xlu0  ;;  %v1161_v43 = vpop.trf.xlu1 }
 0x44b   : > { %4500 = vmatprep.mubr.msk.f32.mxu1 %vm750_vm10, %v1098_v24 }
 0x44e   : > { %v1099_v50 = vpop.trf.xlu0  ;;  %v1162_v29 = vpop.trf.xlu1 }
 0x44f   : > { %4501 = vmatmul.mubr.msk.f32.gmra.mxu1 %vm750_vm10, %v1099_v50 }
 0x452   : > { %v1100_v51 = vpop.trf.xlu0  ;;  %v1163_v62 = vpop.trf.xlu1 }
 0x453   : > { %4503 = vmatprep.mubr.msk.f32.mxu1 %vm750_vm10, %v1100_v51 }
 0x456   : > { %v1101_v52 = vpop.trf.xlu0  ;;  %v1164_v53 = vpop.trf.xlu1 }
 0x457   : > { %4504 = vmatmul.mubr.msk.f32.gmra.mxu1 %vm750_vm10, %v1101_v52 }
 0x45a   : > { %v1102_v54 = vpop.trf.xlu0  ;;  %v1165_v35 = vpop.trf.xlu1 }
 0x45b   : > { %4506 = vmatprep.mubr.msk.f32.mxu1 %vm750_vm10, %v1102_v54 }
 0x45e   : > { %v1103_v10 = vpop.trf.xlu0  ;;  %v1166_v13 = vpop.trf.xlu1 }
 0x45f   : > { %4507 = vmatmul.mubr.msk.f32.gmra.mxu1 %vm750_vm10, %v1103_v10 }
 0x460   : > { %4525 = vmatprep.mubr.msk.f32.mxu1 %vm750_vm10, %v1160_v19 }
 0x462   : > { %v1064_v58 = vpop.trf.xlu0  ;;  %v1167_v60 = vpop.trf.xlu1 }
 0x463   : > { %4483 = vmatprep.mubr.msk.f32.mxu0 %vm750_vm10, %v1064_v58  ;;  %4526 = vmatmul.mubr.msk.f32.vlgmr.msra.gmra.mxu1 %vm750_vm10, %v1161_v43 }
 0x464   : > { %4528 = vmatprep.mubr.msk.f32.mxu1 %vm750_vm10, %v1162_v29  ;;  %4552 = vmatpush3.msra.mxu1 %v5611_v37 }
 0x465   : > { %4579 = vmatprep.subr.mxu1 %v5619_v39 }
 0x466   : > { %v1065_v61 = vpop.trf.xlu0  ;;  %v1128_v3 = vpop.trf.xlu1 }
 0x467   : > { %4484 = vmatmul.mubr.msk.f32.vlgmr.msra.gmra.mxu0 %vm750_vm10, %v1065_v61  ;;  %4529 = vmatmul.mubr.msk.f32.gmra.mxu1 %vm750_vm10, %v1163_v62 }
 0x468   : > { %4531 = vmatprep.mubr.msk.f32.mxu1 %vm750_vm10, %v1164_v53  ;;  %4510 = vmatpush3.msra.mxu0 %v5597_v34 }
 0x469   : > { %4537 = vmatprep.subr.mxu0 %v5605_v36 }
 0x46a   : > { %v1129_v4 = vpop.trf.xlu1  ;;  %v1066_v6 = vpop.trf.xlu0 }
 0x46b   : > { %4486 = vmatprep.mubr.msk.f32.mxu0 %vm750_vm10, %v1066_v6  ;;  %4532 = vmatmul.mubr.msk.f32.gmra.mxu1 %vm750_vm10, %v1165_v35  ;;  %v5996_v35 = vld [vmem:[#allocation2] sm:$0xff] }
 0x46c   : > { %4534 = vmatprep.mubr.msk.f32.mxu1 %vm750_vm10, %v1166_v13  ;;  %v5998_v13 = vld [vmem:[#allocation2 + $0x30] sm:$0xff] }
 0x46e   : > { %v1130_v37 = vpop.trf.xlu1  ;;  %v1067_v7 = vpop.trf.xlu0 }
 0x46f   : > { %4487 = vmatmul.mubr.msk.f32.gmra.mxu0 %vm750_vm10, %v1067_v7  ;;  %4535 = vmatmul.mubr.msk.f32.gmra.mxu1 %vm750_vm10, %v1167_v60 }
 0x472   : > { %v1131_v11 = vpop.trf.xlu1  ;;  %v1068_v1 = vpop.trf.xlu0 }
 0x473   : > { %4489 = vmatprep.mubr.msk.f32.mxu0 %vm750_vm10, %v1068_v1 }
 0x476   : > { %v1132_v34 = vpop.trf.xlu1  ;;  %v1069_v14 = vpop.trf.xlu0 }
 0x477   : > { %4490 = vmatmul.mubr.msk.f32.gmra.mxu0 %vm750_vm10, %v1069_v14 }
 0x47a   : > { %v1133_v15 = vpop.trf.xlu1  ;;  %v1070_v40 = vpop.trf.xlu0 }
 0x47b   : > { %4492 = vmatprep.mubr.msk.f32.mxu0 %vm750_vm10, %v1070_v40 }
 0x47e   : > { %v1134_v33 = vpop.trf.xlu1  ;;  %v1071_v9 = vpop.trf.xlu0 }
 0x47f   : > { %4493 = vmatmul.mubr.msk.f32.gmra.mxu0 %vm750_vm10, %v1071_v9 }
 0x480   : > { %4511 = vmatprep.mubr.msk.f32.mxu0 %vm750_vm10, %v1128_v3 }
 0x482   : > { %v1135_v18 = vpop.trf.xlu1  ;;  %v1192_v20 = vpop.trf.xlu0 }
 0x483   : > { %4512 = vmatmul.mubr.msk.f32.vlgmr.msra.gmra.mxu0 %vm750_vm10, %v1129_v4 }
 0x484   : > { %4514 = vmatprep.mubr.msk.f32.mxu0 %vm750_vm10, %v1130_v37  ;;  %4538 = vmatpush3.msra.mxu0 %v5605_v36  ;;  %v5250_v36 = vmov 0.0  }
 0x485   : > { %4565 = vmatprep.subr.mxu0 %v5614_v38 }
 0x486   : > { %v1224_v41 = vpop.trf.xlu1  ;;  %v1193_v21 = vpop.trf.xlu0 }
 0x487   : > { %4553 = vmatprep.mubr.msk.f32.mxu1 %vm750_vm10, %v1224_v41  ;;  %4515 = vmatmul.mubr.msk.f32.gmra.mxu0 %vm750_vm10, %v1131_v11 }
 0x488   : > { %4517 = vmatprep.mubr.msk.f32.mxu0 %vm750_vm10, %v1132_v34 }
 0x48a   : > { %v1225_v49 = vpop.trf.xlu1  ;;  %v1194_v30 = vpop.trf.xlu0 }
 0x48b   : > { %4554 = vmatmul.mubr.msk.f32.vlgmr.msra.gmra.mxu1 %vm750_vm10, %v1225_v49  ;;  %4518 = vmatmul.mubr.msk.f32.gmra.mxu0 %vm750_vm10, %v1133_v15 }
 0x48c   : > { %4580 = vmatpush3.msra.mxu1 %v5619_v39  ;;  %4520 = vmatprep.mubr.msk.f32.mxu0 %vm750_vm10, %v1134_v33  ;;  %v6006_v33 = vld [vmem:[#allocation2 + $0x10] sm:$0xff] }
 0x48d   : > { %4612 = vmatprep.subr.mxu1 %v5250_v36 }
 0x48e   : > { %v1226_v56 = vpop.trf.xlu1  ;;  %v1195_v59 = vpop.trf.xlu0 }
 0x48f   : > { %4556 = vmatprep.mubr.msk.f32.mxu1 %vm750_vm10, %v1226_v56  ;;  %4521 = vmatmul.mubr.msk.f32.gmra.mxu0 %vm750_vm10, %v1135_v18  ;;  %v6008_v18 = vld [vmem:[#allocation2 + $0x18] sm:$0xff] }
 0x490   : > { %4539 = vmatprep.mubr.msk.f32.mxu0 %vm750_vm10, %v1192_v20 }
 0x492   : > { %v1227_v22 = vpop.trf.xlu1  ;;  %v1196_v5 = vpop.trf.xlu0 }
 0x493   : > { %4557 = vmatmul.mubr.msk.f32.gmra.mxu1 %vm750_vm10, %v1227_v22  ;;  %4540 = vmatmul.mubr.msk.f32.vlgmr.msra.gmra.mxu0 %vm750_vm10, %v1193_v21 }
 0x494   : > { %4542 = vmatprep.mubr.msk.f32.mxu0 %vm750_vm10, %v1194_v30  ;;  %4566 = vmatpush3.msra.mxu0 %v5614_v38 }
 0x495   : > { %4593 = vmatprep.subr.mxu0 %v5250_v36 }
 0x496   : > { %v1228_v39 = vpop.trf.xlu1  ;;  %v1197_v8 = vpop.trf.xlu0 }
 0x497   : > { %4559 = vmatprep.mubr.msk.f32.mxu1 %vm750_vm10, %v1228_v39  ;;  %4543 = vmatmul.mubr.msk.f32.gmra.mxu0 %vm750_vm10, %v1195_v59 }
 0x498   : > { %4545 = vmatprep.mubr.msk.f32.mxu0 %vm750_vm10, %v1196_v5 }
 0x49a   : > { %v1229_v0 = vpop.trf.xlu1  ;;  %v1198_v19 = vpop.trf.xlu0 }
 0x49b   : > { %4560 = vmatmul.mubr.msk.f32.gmra.mxu1 %vm750_vm10, %v1229_v0  ;;  %4546 = vmatmul.mubr.msk.f32.gmra.mxu0 %vm750_vm10, %v1197_v8 }
 0x49c   : > { %4548 = vmatprep.mubr.msk.f32.mxu0 %vm750_vm10, %v1198_v19 }
 0x49e   : > { %v1230_v24 = vpop.trf.xlu1  ;;  %v1199_v38 = vpop.trf.xlu0 }
 0x49f   : > { %4562 = vmatprep.mubr.msk.f32.mxu1 %vm750_vm10, %v1230_v24  ;;  %4549 = vmatmul.mubr.msk.f32.gmra.mxu0 %vm750_vm10, %v1199_v38  ;;  %v6023_v38 = vld [vmem:[#allocation2 + $0x8] sm:$0xff] }
 0x4a2   : > { %v1231_v43 = vpop.trf.xlu1  ;;  %v1256_v50 = vpop.trf.xlu0 }
 0x4a3   : > { %4563 = vmatmul.mubr.msk.f32.gmra.mxu1 %vm750_vm10, %v1231_v43  ;;  %4567 = vmatprep.mubr.msk.f32.mxu0 %vm750_vm10, %v1256_v50 }
 0x4a6   : > { %v1288_v29 = vpop.trf.xlu1  ;;  %v1257_v51 = vpop.trf.xlu0 }
 0x4a7   : > { %4581 = vmatprep.mubr.msk.f32.mxu1 %vm750_vm10, %v1288_v29  ;;  %4568 = vmatmul.mubr.msk.f32.vlgmr.msra.gmra.mxu0 %vm750_vm10, %v1257_v51  ;;  %v6028_v29 = vld [vmem:[#allocation2 + $0x20] sm:$0xff] }
 0x4a8   : > { %4594 = vmatpush3.msk.msra.mxu0 %vm5553_vm13, %v5249_v26 }
 0x4a9   : > { %4595 = vmatprep.subr.mxu0 %v5250_v36 }
 0x4aa   : > { %v1289_v62 = vpop.trf.xlu1  ;;  %4596 = vmatpush3.msk.msra.mxu0 %vm5560_vm14, %v5249_v26  ;;  %v1258_v53 = vpop.trf.xlu0 }
 0x4ab   : > { %4582 = vmatmul.mubr.msk.f32.vlgmr.msra.gmra.mxu1 %vm750_vm10, %v1289_v62  ;;  %4597 = vmatprep.subr.mxu0 %v5250_v36 }
 0x4ac   : > { %4613 = vmatpush3.msk.msra.mxu1 %vm5553_vm13, %v5249_v26  ;;  %4598 = vmatpush3.msk.msra.mxu0 %vm5567_vm15, %v5249_v26  ;;  %vm5251_vm13 = vmmov 0  }
 0x4ad   : > { %4614 = vmatprep.subr.mxu1 %v5250_v36  ;;  %4599 = vmatprep.subr.mxu0 %v5250_v36 }
 0x4ae   : > { %v1290_v52 = vpop.trf.xlu1  ;;  %4615 = vmatpush3.msk.msra.mxu1 %vm5560_vm14, %v5249_v26  ;;  %4600 = vmatpush3.msk.msra.mxu0 %vm5626_vm2, %v5249_v26  ;;  %v1259_v27 = vpop.trf.xlu0  ;;  %vm3512_vm14 = vcmask 130112  }
 0x4af   : > { %4584 = vmatprep.mubr.msk.f32.mxu1 %vm750_vm10, %v1290_v52  ;;  %4616 = vmatprep.subr.mxu1 %v5250_v36 }
 0x4b0   : > { %4617 = vmatpush3.msk.msra.mxu1 %vm5567_vm15, %v5249_v26  ;;  %4570 = vmatprep.mubr.msk.f32.mxu0 %vm750_vm10, %v1258_v53  ;;  %vm3519_vm15 = vcmask 195712  }
 0x4b1   : > { %4618 = vmatprep.subr.mxu1 %v5250_v36  ;;  %4601 = vmatprep.subr.mxu0 %v5250_v36 }
 0x4b2   : > { %v1291_v25 = vpop.trf.xlu1  ;;  %4619 = vmatpush3.msk.msra.mxu1 %vm5626_vm2, %v5249_v26  ;;  %4602 = vmatpush3.msk.msra.mxu0 %vm5639_vm5, %v5249_v26  ;;  %v1260_v46 = vpop.trf.xlu0  ;;  %vm3526_vm2 = vcmask 261312  }
 0x4b3   : > { %4585 = vmatmul.mubr.msk.f32.gmra.mxu1 %vm750_vm10, %v1291_v25  ;;  %4620 = vmatprep.subr.mxu1 %v5250_v36 }
 0x4b4   : > { %4621 = vmatpush3.msk.msra.mxu1 %vm5639_vm5, %v5249_v26  ;;  %4571 = vmatmul.mubr.msk.f32.gmra.mxu0 %vm750_vm10, %v1259_v27  ;;  %vm3533_vm5 = vcmask 326912  }
 0x4b5   : > { %4622 = vmatprep.subr.mxu1 %v5250_v36  ;;  %4603 = vmatprep.subr.mxu0 %v5250_v36 }
 0x4b6   : > { %v1292_v28 = vpop.trf.xlu1  ;;  %4623 = vmatpush3.msk.msra.mxu1 %vm5652_vm8, %v5249_v26  ;;  %4604 = vmatpush3.msk.msra.mxu0 %vm5652_vm8, %v5249_v26  ;;  %v1261_v54 = vpop.trf.xlu0  ;;  %vm3540_vm8 = vcmask 392512  }
 0x4b7   : > { %4587 = vmatprep.mubr.msk.f32.mxu1 %vm750_vm10, %v1292_v28  ;;  %4624 = vmatprep.subr.mxu1 %v5250_v36 }
 0x4b8   : > { %4625 = vmatpush3.msk.msra.mxu1 %vm5664_vm11, %v5249_v26  ;;  %4605 = vmatprep.subr.mxu0 %v5250_v36 }
 0x4b9   : > { %4626 = vmatprep.subr.mxu1 %v5250_v36  ;;  %4606 = vmatpush3.msk.msra.mxu0 %vm5664_vm11, %v5249_v26  ;;  %vm3547_vm11 = vcmask 458112  }
 0x4ba   : > { %v1293_v42 = vpop.trf.xlu1  ;;  %4627 = vmatpush3.msk.msra.mxu1 %vm5678_vm1, %v5249_v26  ;;  %4607 = vmatprep.subr.mxu0 %v5250_v36  ;;  %v1262_v48 = vpop.trf.xlu0 }
 0x4bb   : > { %4588 = vmatmul.mubr.msk.f32.gmra.mxu1 %vm750_vm10, %v1293_v42  ;;  %4608 = vmatpush3.msk.msra.mxu0 %vm5678_vm1, %v5249_v26  ;;  %vm3554_vm1 = vcmask 523712  }
 0x4bc   : > { %4573 = vmatprep.mubr.msk.f32.mxu0 %vm750_vm10, %v1260_v46 }
 0x4bd   : > { %4574 = vmatmul.mubr.msk.f32.gmra.mxu0 %vm750_vm10, %v1261_v54 }
 0x4be   : > { %v1294_v44 = vpop.trf.xlu1  ;;  %4576 = vmatprep.mubr.msk.f32.mxu0 %vm750_vm10, %v1262_v48  ;;  %v1263_v26 = vpop.trf.xlu0 }
 0x4bf   : > { %4590 = vmatprep.mubr.msk.f32.mxu1 %vm750_vm10, %v1294_v44 }
 0x4c1   : > { %4577 = vmatmul.mubr.msk.f32.gmra.mxu0 %vm750_vm10, %v1263_v26 }
 0x4c2   : > { %v1295_v47 = vpop.trf.xlu1  ;;  %4609 = vmatprep.mubr.msk.f32.mxu0 %vm5251_vm13, %v5250_v36 }
 0x4c3   : > { %4591 = vmatmul.mubr.msk.f32.gmra.mxu1 %vm750_vm10, %v1295_v47  ;;  %v6040_v47 = vld [vmem:[#allocation2 + $0x28] sm:$0xff] }
 0x4c4   : > { %4628 = vmatprep.mubr.msk.f32.mxu1 %vm5251_vm13, %v5250_v36 }
 0x4c7   : > { %4629 = vmatmul.mubr.msk.f32.vlgmr.msra.gmra.mxu1 %vm612_vm9, %v5832_v32 }
 0x507   : > { %v4499_v10 = vpop.f32.mrf.mxu1 }
 0x508   : > { %v2353_v58 = vmul.f32 %v4499_v10, %v5996_v35  ;;  %v2545_v32 = vmul.f32 %v4499_v10, %v4499_v10 }
 0x509   : > { %v1523_v60 = vpop.f32.mrf.mxu1 }
 0x50a   : > { %2426 = vadd.xlane.f32.xlu1 %v2353_v58  ;;  %v2352_v61 = vmul.f32 %v5998_v13, %v1523_v60  ;;  %v2544_v3 = vmul.f32 %v1523_v60, %v1523_v60 }
 0x50c   : > { %2424 = vadd.xlane.f32.xlu0 %v2352_v61 }
 0x50e   : > { %2618 = vadd.xlane.f32.xlu1 %v2545_v32  ;;  %v6048_v32 = vld [vmem:[#allocation2 + $0x38] sm:$0xff] }
 0x50f   : > { %v4502_v4 = vpop.f32.mrf.mxu1 }
 0x510   : > { %2616 = vadd.xlane.f32.xlu0 %v2544_v3  ;;  %v2355_v20 = vmul.f32 %v4502_v4, %v6006_v33  ;;  %v2547_v36 = vmul.f32 %v4502_v4, %v4502_v4 }
 0x511   : > { %v1533_v6 = vpop.f32.mrf.mxu1 }
 0x512   : > { %v2354_v21 = vmul.f32 %v6008_v18, %v1533_v6  ;;  %v2546_v56 = vmul.f32 %v1533_v6, %v1533_v6 }
 0x517   : > { %v4505_v37 = vpop.f32.mrf.mxu1 }
 0x518   : > { %v2549_v24 = vmul.f32 %v4505_v37, %v4505_v37  ;;  %v2357_v53 = vmul.f32 %v4505_v37, %v6028_v29 }
 0x519   : > { %v1543_v14 = vpop.f32.mrf.mxu1 }
 0x51a   : > { %v2356_v51 = vmul.f32 %v6023_v38, %v1543_v14  ;;  %v2548_v27 = vmul.f32 %v1543_v14, %v1543_v14 }
 0x51f   : > { %v6004_v40 = vpop.f32.mrf.mxu1 }
 0x520   : > { %v2359_v6 = vmul.f32 %v6004_v40, %v6048_v32 }
 0x521   : > { %v6011_v41 = vpop.f32.mrf.mxu1 }
 0x522   : > { %v2358_v10 = vmul.f32 %v6040_v47, %v6011_v41 }
 0x523   : > { %v6014_v30 = vpop.f32.mrf.mxu1 }
 0x525   : > { %v6017_v5 = vpop.f32.mrf.mxu1 }
 0x527   : > { %v4485_v7 = vpop.f32.mrf.mxu0  ;;  %v6019_v39 = vpop.f32.mrf.mxu1 }
 0x528   : > { %v2345_v11 = vmul.f32 %v4485_v7, %v5996_v35  ;;  %v2537_v15 = vmul.f32 %v4485_v7, %v4485_v7 }
 0x529   : > { %v1394_v1 = vpop.f32.mrf.mxu0  ;;  %v6021_v19 = vpop.f32.mrf.mxu1 }
 0x52a   : > { %2410 = vadd.xlane.f32.xlu1 %v2345_v11  ;;  %v2344_v34 = vmul.f32 %v5998_v13, %v1394_v1  ;;  %v2536_v9 = vmul.f32 %v1394_v1, %v1394_v1  ;;  %v2551_v11 = vmul.f32 %v6004_v40, %v6004_v40  ;;  %v2561_v1 = vmul.f32 %v6014_v30, %v6014_v30 }
 0x52b   : > { %v6025_v43 = vpop.f32.mrf.mxu1  ;;  %v2368_v40 = vmul.f32 %v5998_v13, %v6017_v5 }
 0x52c   : > { %2408 = vadd.xlane.f32.xlu0 %v2344_v34 }
 0x52d   : > { %v6031_v52 = vpop.f32.mrf.mxu1 }
 0x52e   : > { %2602 = vadd.xlane.f32.xlu1 %v2537_v15 }
 0x52f   : > { %v4488_v49 = vpop.f32.mrf.mxu0  ;;  %v6034_v25 = vpop.f32.mrf.mxu1 }
 0x530   : > { %2600 = vadd.xlane.f32.xlu0 %v2536_v9  ;;  %v2347_v59 = vmul.f32 %v4488_v49, %v6006_v33  ;;  %v2539_v0 = vmul.f32 %v4488_v49, %v4488_v49 }
 0x531   : > { %v1404_v22 = vpop.f32.mrf.mxu0  ;;  %v6037_v44 = vpop.f32.mrf.mxu1 }
 0x532   : > { %2430 = vadd.xlane.f32.xlu1 %v2355_v20  ;;  %v2538_v8 = vmul.f32 %v1404_v22, %v1404_v22  ;;  %v2346_v50 = vmul.f32 %v6008_v18, %v1404_v22  ;;  %v2550_v20 = vmul.f32 %v6011_v41, %v6011_v41 }
 0x534   : > { %2428 = vadd.xlane.f32.xlu0 %v2354_v21 }
 0x536   : > { %2622 = vadd.xlane.f32.xlu1 %v2547_v36  ;;  %v2369_v36 = vmul.f32 %v6014_v30, %v5996_v35  ;;  %v2563_v30 = vmul.f32 %v6019_v39, %v6019_v39 }
 0x537   : > { %v4491_v62 = vpop.f32.mrf.mxu0 }
 0x538   : > { %2620 = vadd.xlane.f32.xlu0 %v2546_v56  ;;  %v2349_v28 = vmul.f32 %v4491_v62, %v6028_v29  ;;  %v2541_v48 = vmul.f32 %v4491_v62, %v4491_v62  ;;  %v2370_v62 = vmul.f32 %v6008_v18, %v6021_v19 }
 0x539   : > { %v1414_v42 = vpop.f32.mrf.mxu0 }
 0x53a   : > { %2414 = vadd.xlane.f32.xlu1 %v2347_v59  ;;  %v2348_v46 = vmul.f32 %v6023_v38, %v1414_v42  ;;  %v2540_v60 = vmul.f32 %v1414_v42, %v1414_v42 }
 0x53c   : > { %2604 = vadd.xlane.f32.xlu0 %v2538_v8 }
 0x53e   : > { %2606 = vadd.xlane.f32.xlu1 %v2539_v0 }
 0x53f   : > { %v4494_v26 = vpop.f32.mrf.mxu0 }
 0x540   : > { %2626 = vadd.xlane.f32.xlu0 %v2549_v24  ;;  %v2543_v61 = vmul.f32 %v4494_v26, %v4494_v26  ;;  %v2351_v34 = vmul.f32 %v4494_v26, %v6048_v32  ;;  %v2560_v24 = vmul.f32 %v6017_v5, %v6017_v5  ;;  %v2562_v5 = vmul.f32 %v6021_v19, %v6021_v19 }
 0x541   : > { %v1424_v3 = vpop.f32.mrf.mxu0  ;;  %v2373_v19 = vmul.f32 %v6025_v43, %v6028_v29 }
 0x542   : > { %2412 = vadd.xlane.f32.xlu1 %v2346_v50  ;;  %v2350_v37 = vmul.f32 %v6040_v47, %v1424_v3  ;;  %v2542_v15 = vmul.f32 %v1424_v3, %v1424_v3 }
 0x543   : > { %v4513_v21 = vpop.f32.mrf.mxu0 }
 0x544   : > { %2432 = vadd.xlane.f32.xlu0 %v2356_v51  ;;  %v2553_v56 = vmul.f32 %v4513_v21, %v4513_v21  ;;  %v2361_v59 = vmul.f32 %v4513_v21, %v5996_v35  ;;  %v2371_v51 = vmul.f32 %v6019_v39, %v6006_v33 }
 0x545   : > { %v1652_v22 = vpop.f32.mrf.mxu0 }
 0x546   : > { %2434 = vadd.xlane.f32.xlu1 %v2357_v53  ;;  %v2360_v41 = vmul.f32 %v5998_v13, %v1652_v22 }
 0x547   : > { %v4516_v53 = vpop.f32.mrf.mxu0 }
 0x548   : > { %2624 = vadd.xlane.f32.xlu0 %v2548_v27  ;;  %v2363_v42 = vmul.f32 %v4516_v53, %v6006_v33 }
 0x54a   : > { %2418 = vadd.xlane.f32.xlu1 %v2349_v28  ;;  %v2552_v28 = vmul.f32 %v1652_v22, %v1652_v22  ;;  %v2375_v22 = vmul.f32 %v6034_v25, %v6048_v32 }
 0x54b   : > { %v6042_v54 = vpop.f32.mrf.mxu1 }
 0x54c   : > { %2416 = vadd.xlane.f32.xlu0 %v2348_v46  ;;  %v1662_v46 = vpop.f32.mrf.mxu0 }
 0x54d   : > { %v6046_v58 = vpop.f32.mrf.mxu1  ;;  %v2362_v39 = vmul.f32 %v6008_v18, %v1662_v46 }
 0x54e   : > { %2610 = vadd.xlane.f32.xlu1 %v2541_v48  ;;  %v4519_v3 = vpop.f32.mrf.mxu0 }
 0x550   : > { %2436 = vadd.xlane.f32.xlu0 %v2358_v10  ;;  %v2555_v10 = vmul.f32 %v4516_v53, %v4516_v53 }
 0x552   : > { %2608 = vadd.xlane.f32.xlu1 %v2540_v60  ;;  %v2554_v60 = vmul.f32 %v1662_v46, %v1662_v46  ;;  %v2385_v46 = vmul.f32 %v6042_v54, %v5996_v35 }
 0x553   : > { %v6050_v4 = vpop.f32.mrf.mxu1 }
 0x554   : > { %2614 = vadd.xlane.f32.xlu0 %v2543_v61 }
 0x555   : > { %v6055_v7 = vpop.f32.mrf.mxu1 }
 0x556   : > { %2438 = vadd.xlane.f32.xlu1 %v2359_v6  ;;  %v2372_v6 = vmul.f32 %v6023_v38, %v6031_v52 }
 0x558   : > { %2420 = vadd.xlane.f32.xlu0 %v2350_v37 }
 0x55a   : > { %2630 = vadd.xlane.f32.xlu1 %v2551_v11  ;;  %v2565_v11 = vmul.f32 %v6025_v43, %v6025_v43 }
 0x55b   : > { %v6062_v14 = vpop.f32.mrf.mxu1 }
 0x55c   : > { %2650 = vadd.xlane.f32.xlu0 %v2561_v1  ;;  %v2557_v1 = vmul.f32 %v4519_v3, %v4519_v3 }
 0x55d   : > { %v6064_v9 = vpop.f32.mrf.mxu1 }
 0x55e   : > { %2422 = vadd.xlane.f32.xlu1 %v2351_v34 }
 0x560   : > { %2612 = vadd.xlane.f32.xlu0 %v2542_v15  ;;  %v2365_v15 = vmul.f32 %v4519_v3, %v6028_v29 }
 0x562   : > { %2628 = vadd.xlane.f32.xlu1 %v2550_v20  ;;  %v1672_v20 = vpop.f32.mrf.mxu0 }
 0x563   : > { %v6070_v49 = vpop.f32.mrf.mxu1 }
 0x564   : > { %2456 = vadd.xlane.f32.xlu0 %v2368_v40  ;;  %v4522_v43 = vpop.f32.mrf.mxu0 }
 0x565   : > { %v6075_v8 = vpop.f32.mrf.mxu1  ;;  %v2367_v53 = vmul.f32 %v4522_v43, %v6048_v32 }
 0x566   : > { %2458 = vadd.xlane.f32.xlu1 %v2369_v36  ;;  %v2364_v36 = vmul.f32 %v6023_v38, %v1672_v20 }
 0x568   : > { %2634 = vadd.xlane.f32.xlu0 %v2553_v56  ;;  %v2564_v56 = vmul.f32 %v6031_v52, %v6031_v52  ;;  %v2567_v52 = vmul.f32 %v6034_v25, %v6034_v25 }
 0x56a   : > { %2442 = vadd.xlane.f32.xlu1 %v2361_v59  ;;  %v2374_v59 = vmul.f32 %v6040_v47, %v6037_v44 }
 0x56b   : > { %v6078_v0 = vpop.f32.mrf.mxu1 }
 0x56c   : > { %2440 = vadd.xlane.f32.xlu0 %v2360_v41  ;;  %v1682_v41 = vpop.f32.mrf.mxu0 }
 0x56d   : > { %v6084_v50 = vpop.f32.mrf.mxu1 }
 0x56e   : > { %2648 = vadd.xlane.f32.xlu1 %v2560_v24  ;;  %v2566_v24 = vmul.f32 %v6037_v44, %v6037_v44  ;;  %v2559_v44 = vmul.f32 %v4522_v43, %v4522_v43 }
 0x570   : > { %2654 = vadd.xlane.f32.xlu0 %v2563_v30  ;;  %v2556_v30 = vmul.f32 %v1672_v20, %v1672_v20 }
 0x572   : > { %2462 = vadd.xlane.f32.xlu1 %v2371_v51  ;;  %v2366_v51 = vmul.f32 %v6040_v47, %v1682_v41 }
 0x573   : > { %v6090_v27 = vpop.f32.mrf.mxu1 }
 0x574   : > { %2460 = vadd.xlane.f32.xlu0 %v2370_v62  ;;  %v2558_v62 = vmul.f32 %v1682_v41, %v1682_v41 }
 0x575   : > { %v6095_v48 = vpop.f32.mrf.mxu1 }
 0x576   : > { %2632 = vadd.xlane.f32.xlu1 %v2552_v28  ;;  %v2384_v28 = vmul.f32 %v5998_v13, %v6046_v58 }
 0x578   : > { %2652 = vadd.xlane.f32.xlu0 %v2562_v5  ;;  %v4541_v5 = vpop.f32.mrf.mxu0 }
 0x579   : > { %v2377_v3 = vmul.f32 %v4541_v5, %v5996_v35 }
 0x57a   : > { %2446 = vadd.xlane.f32.xlu1 %v2363_v42  ;;  %v2569_v42 = vmul.f32 %v4541_v5, %v4541_v5  ;;  %v1910_v25 = vpop.f32.mrf.mxu0 }
 0x57b   : > { %v6098_v26 = vpop.f32.mrf.mxu1  ;;  %v2568_v43 = vmul.f32 %v1910_v25, %v1910_v25 }
 0x57c   : > { %2444 = vadd.xlane.f32.xlu0 %v2362_v39  ;;  %v2576_v39 = vmul.f32 %v6046_v58, %v6046_v58  ;;  %v2387_v58 = vmul.f32 %v6050_v4, %v6006_v33 }
 0x57d   : > { %v6100_v61 = vpop.f32.mrf.mxu1 }
 0x57e   : > { %2638 = vadd.xlane.f32.xlu1 %v2555_v10  ;;  %v2577_v10 = vmul.f32 %v6042_v54, %v6042_v54 }
 0x580   : > { %2636 = vadd.xlane.f32.xlu0 %v2554_v60  ;;  %v2376_v60 = vmul.f32 %v5998_v13, %v1910_v25  ;;  %v2578_v25 = vmul.f32 %v6055_v7, %v6055_v7 }
 0x582   : > { %2466 = vadd.xlane.f32.xlu1 %v2373_v19 }
 0x583   : > { %v6106_v37 = vpop.f32.mrf.mxu1 }
 0x584   : > { %2464 = vadd.xlane.f32.xlu0 %v2372_v6 }
 0x585   : > { %v6110_v34 = vpop.f32.mrf.mxu1 }
 0x586   : > { %2658 = vadd.xlane.f32.xlu1 %v2565_v11  ;;  %v2386_v11 = vmul.f32 %v6008_v18, %v6055_v7 }
 0x587   : > { %v6113_v21 = vpop.f32.mrf.mxu1 }
 0x588   : > { %6769 = vst [vmem:[#allocation15_spill] sm:$0xff] %v6113_v21  ;;  %2642 = vadd.xlane.f32.xlu0 %v2557_v1  ;;  %v4544_v1 = vpop.f32.mrf.mxu0 }
 0x589   : > { %v4630_v40 = vpop.f32.mrf.mxu1 }
 0x58a   : > { %2450 = vadd.xlane.f32.xlu1 %v2365_v15  ;;  %v2571_v15 = vmul.f32 %v4544_v1, %v4544_v1  ;;  %v1920_v40 = vpop.f32.mrf.mxu0 }
 0x58b   : > { %v2570_v7 = vmul.f32 %v1920_v40, %v1920_v40 }
 0x58c   : > { %2448 = vadd.xlane.f32.xlu0 %v2364_v36 }
 0x58e   : > { %2656 = vadd.xlane.f32.xlu1 %v2564_v56  ;;  %v5252_v56 = vmov 0  }
 0x58f   : > { %4756 = vset.pattern.permute.xlu0 %v5252_v56  ;;  %4755 = vset.pattern.permute.xlu1 %v5252_v56 }
 0x590   : > { %2468 = vadd.xlane.f32.xlu0 %v2374_v59  ;;  %v2378_v59 = vmul.f32 %v6008_v18, %v1920_v40  ;;  %v2581_v40 = vmul.f32 %v6062_v14, %v6062_v14 }
 0x592   : > { %2470 = vadd.xlane.f32.xlu1 %v2375_v22 }
 0x593   : > { %v6137_v19 = vpop.xlane.xlu1 %2426 }
 0x594   : > { %2660 = vadd.xlane.f32.xlu0 %v2566_v24  ;;  %v2579_v24 = vmul.f32 %v6050_v4, %v6050_v4 }
 0x595   : > { %v6140_v6 = vpop.xlane.xlu0 %2424 }
 0x596   : > { %2640 = vadd.xlane.f32.xlu1 %v2556_v30  ;;  %v2388_v30 = vmul.f32 %v6023_v38, %v6064_v9 }
 0x597   : > { %v6146_v54 = vpop.xlane.xlu1 %2618 }
 0x598   : > { %2452 = vadd.xlane.f32.xlu0 %v2366_v51 }
 0x599   : > { %v6148_v20 = vpop.xlane.xlu0 %2616 }
 0x59a   : > { %2662 = vadd.xlane.f32.xlu1 %v2567_v52 }
 0x59c   : > { %2644 = vadd.xlane.f32.xlu0 %v2558_v62  ;;  %v6155_v62 = vpop.f32.mrf.mxu0 }
 0x59e   : > { %2454 = vadd.xlane.f32.xlu1 %v2367_v53  ;;  %v2379_v53 = vmul.f32 %v4544_v1, %v6006_v33 }
 0x5a0   : > { %2488 = vadd.xlane.f32.xlu0 %v2384_v28 }
 0x5a2   : > { %2646 = vadd.xlane.f32.xlu1 %v2559_v44  ;;  %v2580_v44 = vmul.f32 %v6064_v9, %v6064_v9 }
 0x5a4   : > { %2666 = vadd.xlane.f32.xlu0 %v2569_v42  ;;  %v1930_v42 = vpop.f32.mrf.mxu0 }
 0x5a5   : > { %v2572_v1 = vmul.f32 %v1930_v42, %v1930_v42 }
 0x5a6   : > { %2490 = vadd.xlane.f32.xlu1 %v2385_v46 }
 0x5a8   : > { %2680 = vadd.xlane.f32.xlu0 %v2576_v39 }
 0x5aa   : > { %2682 = vadd.xlane.f32.xlu1 %v2577_v10  ;;  %v2380_v10 = vmul.f32 %v6023_v38, %v1930_v42  ;;  %v4550_v42 = vpop.f32.mrf.mxu0 }
 0x5ac   : > { %2472 = vadd.xlane.f32.xlu0 %v2376_v60 }
 0x5ae   : > { %2474 = vadd.xlane.f32.xlu1 %v2377_v3  ;;  %v2389_v3 = vmul.f32 %v6062_v14, %v6028_v29  ;;  %v1940_v14 = vpop.f32.mrf.mxu0 }
 0x5b0   : > { %2492 = vadd.xlane.f32.xlu0 %v2386_v11 }
 0x5b2   : > { %2494 = vadd.xlane.f32.xlu1 %v2387_v58 }
 0x5b3   : > { %v2411_v36 = vpop.xlane.xlu1 %2410 }
 0x5b4   : > { %2670 = vadd.xlane.f32.xlu0 %v2571_v15 }
 0x5b5   : > { %v2409_v22 = vpop.xlane.xlu0 %2408 }
 0x5b6   : > { %2664 = vadd.xlane.f32.xlu1 %v2568_v43 }
 0x5b7   : > { %v2603_v41 = vpop.xlane.xlu1 %2602 }
 0x5b8   : > { %v2729_v51 = vadd.f32 1e-08, %v2603_v41  ;;  %2476 = vadd.xlane.f32.xlu0 %v2378_v59  ;;  %v2583_v59 = vmul.f32 %v6070_v49, %v6070_v49 }
 0x5b9   : > { %v2601_v52 = vpop.xlane.xlu0 %2600 }
 0x5ba   : > { %4821 = vrsqrt.f32 %v2729_v51  ;;  %v2728_v28 = vadd.f32 1e-08, %v2601_v52  ;;  %2686 = vadd.xlane.f32.xlu1 %v2579_v24 }
 0x5bb   : > { %v2431_v5 = vpop.xlane.xlu1 %2430 }
 0x5bc   : > { %4823 = vrsqrt.f32 %v2728_v28  ;;  %2496 = vadd.xlane.f32.xlu0 %v2388_v30 }
 0x5bd   : > { %v2429_v4 = vpop.xlane.xlu0 %2428 }
 0x5be   : > { %2478 = vadd.xlane.f32.xlu1 %v2379_v53 }
 0x5bf   : > { %v2623_v46 = vpop.xlane.xlu1 %2622 }
 0x5c0   : > { %v2739_v39 = vadd.f32 1e-08, %v2623_v46  ;;  %2688 = vadd.xlane.f32.xlu0 %v2580_v44  ;;  %v2390_v44 = vmul.f32 %v6040_v47, %v6075_v8 }
 0x5c1   : > { %v2621_v60 = vpop.xlane.xlu0 %2620 }
 0x5c2   : > { %4825 = vrsqrt.f32 %v2739_v39  ;;  %v2738_v11 = vadd.f32 1e-08, %v2621_v60  ;;  %2684 = vadd.xlane.f32.xlu1 %v2578_v25 }
 0x5c3   : > { %v2415_v9 = vpop.xlane.xlu1 %2414 }
 0x5c4   : > { %4827 = vrsqrt.f32 %v2738_v11  ;;  %2480 = vadd.xlane.f32.xlu0 %v2380_v10  ;;  %v2575_v10 = vmul.f32 %v4550_v42, %v4550_v42 }
 0x5c5   : > { %v2605_v58 = vpop.xlane.xlu0 %2604 }
 0x5c6   : > { %v2730_v15 = vadd.f32 1e-08, %v2605_v58  ;;  %2498 = vadd.xlane.f32.xlu1 %v2389_v3 }
 0x5c7   : > { %v4822_v56 = vpop.eup %4821  ;;  %v2607_v43 = vpop.xlane.xlu1 %2606 }
 0x5c8   : > { %v6167_v41 = vmul.f32 %v4822_v56, %v2411_v36  ;;  %4829 = vrsqrt.f32 %v2730_v15  ;;  %v2731_v24 = vadd.f32 1e-08, %v2607_v43  ;;  %2672 = vadd.xlane.f32.xlu0 %v2572_v1  ;;  %v2573_v15 = vmul.f32 %v6155_v62, %v6155_v62 }
 0x5c9   : > { %v4824_v30 = vpop.eup %4823  ;;  %v2627_v51 = vpop.xlane.xlu0 %2626  ;;  %v2382_v56 = vmul.f32 %v6040_v47, %v1940_v14  ;;  %v2391_v43 = vmul.f32 %v6070_v49, %v6048_v32 }
 0x5ca   : > { %v6169_v52 = vmul.f32 %v4824_v30, %v2409_v22  ;;  %4831 = vrsqrt.f32 %v2731_v24  ;;  %v2741_v53 = vadd.f32 1e-08, %v2627_v51  ;;  %2668 = vadd.xlane.f32.xlu1 %v2570_v7  ;;  %v2381_v22 = vmul.f32 %v6155_v62, %v6028_v29 }
 0x5cb   : > { %v2413_v28 = vpop.xlane.xlu1 %2412  ;;  %v2593_v30 = vmul.f32 %v6078_v0, %v6078_v0  ;;  %v2921_v21 = vmul.f32 6.0, %v6167_v41 }
 0x5cc   : > { %4833 = vrsqrt.f32 %v2741_v53  ;;  %2694 = vadd.xlane.f32.xlu0 %v2583_v59 }
 0x5cd   : > { %v2433_v36 = vpop.xlane.xlu0 %2432 }
 0x5ce   : > { %2690 = vadd.xlane.f32.xlu1 %v2581_v40 }
 0x5cf   : > { %v4826_v46 = vpop.eup %4825  ;;  %v2435_v25 = vpop.xlane.xlu1 %2434 }
 0x5d0   : > { %v6177_v39 = vmul.f32 %v4826_v46, %v2431_v5  ;;  %2500 = vadd.xlane.f32.xlu0 %v2390_v44  ;;  %v2383_v46 = vmul.f32 %v4550_v42, %v6048_v32 }
 0x5d1   : > { %v4828_v60 = vpop.eup %4827  ;;  %v2625_v3 = vpop.xlane.xlu0 %2624 }
 0x5d2   : > { %v6179_v11 = vmul.f32 %v4828_v60, %v2429_v4  ;;  %v2740_v1 = vadd.f32 1e-08, %v2625_v3  ;;  %2482 = vadd.xlane.f32.xlu1 %v2381_v22  ;;  %v2574_v60 = vmul.f32 %v1940_v14, %v1940_v14 }
 0x5d3   : > { %v2419_v58 = vpop.xlane.xlu1 %2418 }
 0x5d4   : > { %4835 = vrsqrt.f32 %v2740_v1  ;;  %2678 = vadd.xlane.f32.xlu0 %v2575_v10  ;;  %v4569_v10 = vpop.f32.mrf.mxu0  ;;  %v2582_v1 = vmul.f32 %v6075_v8, %v6075_v8 }
 0x5d5   : > { %v4830_v7 = vpop.eup %4829  ;;  %v2417_v5 = vpop.xlane.xlu0 %2416 }
 0x5d6   : > { %v6186_v59 = vmul.f32 %v4830_v7, %v2413_v28  ;;  %2674 = vadd.xlane.f32.xlu1 %v2573_v15  ;;  %v2401_v7 = vmul.f32 %v6078_v0, %v5996_v35 }
 0x5d7   : > { %v4832_v4 = vpop.eup %4831  ;;  %v2611_v24 = vpop.xlane.xlu1 %2610 }
 0x5d8   : > { %v6190_v51 = vmul.f32 %v4832_v4, %v2415_v9  ;;  %v2733_v62 = vadd.f32 1e-08, %v2611_v24  ;;  %2484 = vadd.xlane.f32.xlu0 %v2382_v56  ;;  %v2168_v56 = vpop.f32.mrf.mxu0 }
 0x5d9   : > { %v4834_v53 = vpop.eup %4833  ;;  %v6192_v40 = vpop.xlane.xlu0 %2436  ;;  %v2392_v8 = vmul.f32 %v5998_v13, %v2168_v56 }
 0x5da   : > { %v6194_v44 = vmul.f32 %v4834_v53, %v2435_v25  ;;  %4837 = vrsqrt.f32 %v2733_v62  ;;  %2502 = vadd.xlane.f32.xlu1 %v2391_v43  ;;  %v2400_v25 = vmul.f32 %v5998_v13, %v6084_v50  ;;  %v2402_v13 = vmul.f32 %v6008_v18, %v6095_v48 }
 0x5db   : > { %v2609_v49 = vpop.xlane.xlu1 %2608 }
 0x5dc   : > { %v2732_v28 = vadd.f32 1e-08, %v2609_v49  ;;  %2714 = vadd.xlane.f32.xlu0 %v2593_v30  ;;  %v2393_v30 = vmul.f32 %v4569_v10, %v5996_v35 }
 0x5dd   : > { %v2615_v22 = vpop.xlane.xlu0 %2614 }
 0x5de   : > { %v2735_v3 = vadd.f32 1e-08, %v2615_v22  ;;  %2486 = vadd.xlane.f32.xlu1 %v2383_v46  ;;  %4839 = vrsqrt.f32 %v2732_v28  ;;  %v2585_v22 = vmul.f32 %v4569_v10, %v4569_v10 }
 0x5df   : > { %v2439_v9 = vpop.xlane.xlu1 %2438 }
 0x5e0   : > { %2676 = vadd.xlane.f32.xlu0 %v2574_v60  ;;  %4841 = vrsqrt.f32 %v2735_v3  ;;  %v4572_v3 = vpop.f32.mrf.mxu0 }
 0x5e1   : > { %v4836_v42 = vpop.eup %4835  ;;  %v6201_v15 = vpop.xlane.xlu0 %2420 }
 0x5e2   : > { %v6205_v14 = vmul.f32 %v4836_v42, %v2433_v36  ;;  %2692 = vadd.xlane.f32.xlu1 %v2582_v1  ;;  %v2584_v36 = vmul.f32 %v2168_v56, %v2168_v56  ;;  %v2592_v42 = vmul.f32 %v6084_v50, %v6084_v50  ;;  %v2594_v56 = vmul.f32 %v6095_v48, %v6095_v48 }
 0x5e3   : > { %v2631_v43 = vpop.xlane.xlu1 %2630 }
 0x5e4   : > { %v2743_v4 = vadd.f32 1e-08, %v2631_v43  ;;  %2520 = vadd.xlane.f32.xlu0 %v2400_v25 }
 0x5e5   : > { %v6208_v24 = vpop.xlane.xlu0 %2650 }
 0x5e6   : > { %4843 = vrsqrt.f32 %v2743_v4  ;;  %2522 = vadd.xlane.f32.xlu1 %v2401_v7  ;;  %v2403_v7 = vmul.f32 %v6090_v27, %v6006_v33 }
 0x5e7   : > { %v4838_v62 = vpop.eup %4837  ;;  %v2423_v53 = vpop.xlane.xlu1 %2422 }
 0x5e8   : > { %v6211_v46 = vmul.f32 %v4838_v62, %v2419_v58  ;;  %2504 = vadd.xlane.f32.xlu0 %v2392_v8  ;;  %v2595_v62 = vmul.f32 %v6090_v27, %v6090_v27  ;;  %v2404_v27 = vmul.f32 %v6023_v38, %v6100_v61 }
 0x5e9   : > { %v6213_v0 = vpop.xlane.xlu0 %2612 }
 0x5ea   : > { %2506 = vadd.xlane.f32.xlu1 %v2393_v30  ;;  %v2734_v41 = vadd.f32 1e-08, %v6213_v0 }
 0x5eb   : > { %v6215_v49 = vpop.xlane.xlu1 %2628  ;;  %v4840_v28 = vpop.eup %4839 }
 0x5ec   : > { %2696 = vadd.xlane.f32.xlu0 %v2584_v36  ;;  %v6219_v60 = vmul.f32 %v4840_v28, %v2417_v5  ;;  %v2178_v5 = vpop.f32.mrf.mxu0  ;;  %v2395_v28 = vmul.f32 %v4572_v3, %v6006_v33  ;;  %v2742_v0 = vadd.f32 1e-08, %v6215_v49 }
 0x5ed   : > { %v6221_v35 = vpop.xlane.xlu0 %2456  ;;  %v4842_v58 = vpop.eup %4841  ;;  %v2394_v30 = vmul.f32 %v6008_v18, %v2178_v5  ;;  %v2597_v18 = vmul.f32 %v6098_v26, %v6098_v26 }
 0x5ee   : > { %2698 = vadd.xlane.f32.xlu1 %v2585_v22  ;;  %v6223_v1 = vmul.f32 %v4842_v58, %v2423_v53  ;;  %v2586_v53 = vmul.f32 %v2178_v5, %v2178_v5  ;;  %v2587_v58 = vmul.f32 %v4572_v3, %v4572_v3  ;;  %v2405_v5 = vmul.f32 %v6098_v26, %v6028_v29 }
 0x5ef   : > { %v6225_v25 = vpop.xlane.xlu1 %2458 }
 0x5f0   : > { %2524 = vadd.xlane.f32.xlu0 %v2402_v13 }
 0x5f1   : > { %v6231_v10 = vpop.xlane.xlu0 %2634 }
 0x5f2   : > { %2712 = vadd.xlane.f32.xlu1 %v2592_v42  ;;  %v2737_v42 = vadd.f32 1e-08, %v6146_v54 }
 0x5f3   : > { %v4844_v43 = vpop.eup %4843  ;;  %v6235_v4 = vpop.xlane.xlu1 %2442 }
 0x5f4   : > { %v6237_v8 = vmul.f32 %v4844_v43, %v2439_v9  ;;  %2716 = vadd.xlane.f32.xlu0 %v2594_v56  ;;  %v4575_v56 = vpop.f32.mrf.mxu0  ;;  %4845 = vrsqrt.f32 %v2737_v42 }
 0x5f5   : > { %v6240_v50 = vpop.xlane.xlu0 %2440  ;;  %v2397_v3 = vmul.f32 %v4575_v56, %v6028_v29  ;;  %v2407_v29 = vmul.f32 %v6106_v37, %v6048_v32 }
 0x5f6   : > { %2526 = vadd.xlane.f32.xlu1 %v2403_v7  ;;  %v2736_v7 = vadd.f32 1e-08, %v6148_v20 }
 0x5f7   : > { %v6242_v48 = vpop.xlane.xlu1 %2648 }
 0x5f8   : > { %2508 = vadd.xlane.f32.xlu0 %v2394_v30  ;;  %v2589_v30 = vmul.f32 %v4575_v56, %v4575_v56  ;;  %4847 = vrsqrt.f32 %v2736_v7 }
 0x5f9   : > { %v6246_v36 = vpop.xlane.xlu0 %2654 }
 0x5fa   : > { %2718 = vadd.xlane.f32.xlu1 %v2595_v62 }
 0x5fb   : > { %v6249_v9 = vpop.xlane.xlu1 %2462 }
 0x5fc   : > { %2700 = vadd.xlane.f32.xlu0 %v2586_v53  ;;  %v2188_v53 = vpop.f32.mrf.mxu0 }
 0x5fd   : > { %v6253_v13 = vpop.xlane.xlu0 %2460  ;;  %v2396_v26 = vmul.f32 %v6023_v38, %v2188_v53 }
 0x5fe   : > { %2510 = vadd.xlane.f32.xlu1 %v2395_v28 }
 0x5ff   : > { %v6255_v22 = vpop.xlane.xlu1 %2632 }
 0x600   : > { %2722 = vadd.xlane.f32.xlu0 %v2597_v18  ;;  %v2596_v18 = vmul.f32 %v6100_v61, %v6100_v61  ;;  %v4578_v61 = vpop.f32.mrf.mxu0 }
 0x601   : > { %v6260_v33 = vpop.xlane.xlu0 %2652  ;;  %v4846_v38 = vpop.eup %4845 }
 0x602   : > { %2702 = vadd.xlane.f32.xlu1 %v2587_v58  ;;  %v2588_v58 = vmul.f32 %v2188_v53, %v2188_v53  ;;  %v2865_v53 = vmul.f32 %v4846_v38, %v6137_v19  ;;  %v2198_v17 = vpop.f32.mrf.mxu0 }
 0x603   : > { %v6265_v43 = vpop.xlane.xlu1 %2446  ;;  %v2398_v38 = vmul.f32 %v6040_v47, %v2198_v17 }
 0x604   : > { %2528 = vadd.xlane.f32.xlu0 %v2404_v27 }
 0x605   : > { %v6267_v62 = vpop.xlane.xlu0 %2444 }
 0x606   : > { %2530 = vadd.xlane.f32.xlu1 %v2405_v5  ;;  %v2406_v5 = vmul.f32 %v6040_v47, %v6110_v34  ;;  %v2920_v47 = vmul.f32 6.0, %v6169_v52 }
 0x607   : > { %v6270_v54 = vpop.xlane.xlu1 %2638 }
 0x608   : > { %2706 = vadd.xlane.f32.xlu0 %v2589_v30  ;;  %v4848_v30 = vpop.eup %4847 }
 0x609   : > { %v6272_v28 = vpop.xlane.xlu0 %2636 }
 0x60a   : > { %2514 = vadd.xlane.f32.xlu1 %v2397_v3  ;;  %v2599_v3 = vmul.f32 %v6106_v37, %v6106_v37  ;;  %v2753_v37 = vadd.f32 1e-08, %v6208_v24 }
 0x60b   : > { %v6275_v20 = vpop.xlane.xlu1 %2466 }
 0x60c   : > { %2512 = vadd.xlane.f32.xlu0 %v2396_v26  ;;  %4849 = vrsqrt.f32 %v2753_v37  ;;  %v2755_v37 = vadd.f32 1e-08, %v6246_v36  ;;  %v2754_v36 = vadd.f32 1e-08, %v6260_v33  ;;  %v2927_v33 = vmul.f32 6.0, %v6223_v1 }
 0x60d   : > { %v6279_v27 = vpop.xlane.xlu0 %2464 }
 0x60e   : > { %2720 = vadd.xlane.f32.xlu1 %v2596_v18  ;;  %v2598_v18 = vmul.f32 %v6110_v34, %v6110_v34  ;;  %v2998_v1 = vmul.f32 1.442695, %v2927_v33 }
 0x60f   : > { %v6283_v42 = vpop.xlane.xlu1 %2658 }
 0x610   : > { %2704 = vadd.xlane.f32.xlu0 %v2588_v58  ;;  %v2399_v58 = vmul.f32 %v4578_v61, %v6048_v32 }
 0x611   : > { %v6285_v56 = vpop.xlane.xlu0 %2642 }
 0x612   : > { %2534 = vadd.xlane.f32.xlu1 %v2407_v29  ;;  %v2864_v29 = vmul.f32 %v4848_v30, %v6140_v6  ;;  %v2923_v6 = vmul.f32 6.0, %v6190_v51  ;;  %v2591_v30 = vmul.f32 %v4578_v61, %v4578_v61  ;;  %v2922_v51 = vmul.f32 6.0, %v6186_v59 }
 0x613   : > { %v6289_v7 = vpop.xlane.xlu1 %2450  ;;  %v2931_v59 = vmul.f32 6.0, %v6177_v39  ;;  %v2930_v39 = vmul.f32 6.0, %v6179_v11 }
 0x614   : > { %2532 = vadd.xlane.f32.xlu0 %v2406_v5  ;;  %v2929_v5 = vmul.f32 6.0, %v2865_v53  ;;  %v2928_v34 = vmul.f32 6.0, %v2864_v29  ;;  %v2744_v53 = vadd.f32 1e-08, %v6255_v22  ;;  %v2590_v29 = vmul.f32 %v2198_v17, %v2198_v17 }
 0x615   : > { %v6294_v26 = vpop.xlane.xlu0 %2448  ;;  %v2984_v22 = vmul.f32 1.442695, %v2920_v47  ;;  %v2988_v52 = vmul.f32 1.442695, %v2922_v51  ;;  %v2745_v17 = vadd.f32 1e-08, %v6231_v10 }
 0x616   : > { %6770 = vst [vmem:[#allocation16_spill] sm:$0xff] %v6294_v26  ;;  %2726 = vadd.xlane.f32.xlu1 %v2599_v3  ;;  %v2986_v26 = vmul.f32 1.442695, %v2921_v21  ;;  %v3002_v3 = vmul.f32 1.442695, %v2929_v5  ;;  %v2933_v5 = vmul.f32 6.0, %v6194_v44 }
 0x617   : > { %v6301_v16 = vpop.xlane.xlu1 %2656  ;;  %v3004_v51 = vmul.f32 1.442695, %v2930_v39 }
 0x618   : > { %2724 = vadd.xlane.f32.xlu0 %v2598_v18  ;;  %v3000_v18 = vmul.f32 1.442695, %v2928_v34  ;;  %4851 = vpow2.f32 %v2986_v26 }
 0x619   : > { %v6304_v19 = vpop.xlane.xlu0 %2468  ;;  %4853 = vrsqrt.f32 %v2734_v41  ;;  %v2932_v41 = vmul.f32 6.0, %v6205_v14  ;;  %v4850_v44 = vpop.eup %4849 }
 0x61a   : > { %2518 = vadd.xlane.f32.xlu1 %v2399_v58  ;;  %v2990_v58 = vmul.f32 1.442695, %v2923_v6  ;;  %4855 = vpow2.f32 %v3002_v3  ;;  %v3010_v6 = vmul.f32 1.442695, %v2933_v5  ;;  %v2925_v3 = vmul.f32 6.0, %v6211_v46 }
 0x61b   : > { %v6307_v32 = vpop.xlane.xlu1 %2470  ;;  %4857 = vrsqrt.f32 %v2744_v53  ;;  %v2746_v53 = vadd.f32 1e-08, %v6272_v28  ;;  %v3008_v47 = vmul.f32 1.442695, %v2932_v41  ;;  %v2881_v11 = vmul.f32 %v4850_v44, %v6225_v25 }
 0x61c   : > { %2516 = vadd.xlane.f32.xlu0 %v2398_v38  ;;  %4859 = vpow2.f32 %v3000_v18  ;;  %v2752_v38 = vadd.f32 1e-08, %v6242_v48  ;;  %v2747_v48 = vadd.f32 1e-08, %v6270_v54  ;;  %v2749_v5 = vadd.f32 1e-08, %v6285_v56 }
 0x61d   : > { %v6311_v24 = vpop.xlane.xlu0 %2660  ;;  %4861 = vpow2.f32 %v2990_v58  ;;  %v2945_v25 = vmul.f32 6.0, %v2881_v11  ;;  %v2935_v56 = vmul.f32 6.0, %v6237_v8 }
 0x61e   : > { %2710 = vadd.xlane.f32.xlu1 %v2591_v30  ;;  %4863 = vrsqrt.f32 %v2742_v0  ;;  %v3006_v30 = vmul.f32 1.442695, %v2931_v59  ;;  %v2994_v0 = vmul.f32 1.442695, %v2925_v3  ;;  %v2758_v39 = vadd.f32 1e-08, %v6311_v24 }
 0x61f   : > { %v6315_v21 = vpop.xlane.xlu1 %2640  ;;  %4865 = vrsqrt.f32 %v2755_v37 }
 0x620   : > { %4867 = vpow2.f32 %v2984_v22 }
 0x621   : > { %v6319_v61 = vpop.xlane.xlu0 %2452  ;;  %4869 = vpow2.f32 %v2988_v52 }
 0x622   : > { %2708 = vadd.xlane.f32.xlu1 %v2590_v29  ;;  %4871 = vrsqrt.f32 %v2745_v17  ;;  %v2924_v17 = vmul.f32 6.0, %v6219_v60 }
 0x623   : > { %v6322_v26 = vpop.xlane.xlu1 %2662  ;;  %4873 = vrsqrt.f32 %v2752_v38  ;;  %v2757_v38 = vadd.f32 1e-08, %v6283_v42 }
 0x624   : > { %4875 = vrsqrt.f32 %v2754_v36 }
 0x625   : > { %v6327_v49 = vpop.xlane.xlu0 %2644  ;;  %v4852_v14 = vpop.eup %4851  ;;  %4877 = vpow2.f32 %v3010_v6 }
 0x626   : > { %v4854_v58 = vpop.eup %4853  ;;  %4879 = vpow2.f32 %v3006_v30  ;;  %v3152_v28 = vmul.f32 %v4852_v14, %v5840_v2  ;;  %v2756_v30 = vadd.f32 1e-08, %v6301_v16 }
 0x627   : > { %v6331_v34 = vpop.xlane.xlu1 %2454  ;;  %v4856_v46 = vpop.eup %4855  ;;  %4881 = vrsqrt.f32 %v2747_v48  ;;  %v2862_v52 = vmul.f32 %v4854_v58, %v6201_v15  ;;  %v3034_v48 = vmul.f32 1.442695, %v2945_v25  ;;  %v2750_v58 = vadd.f32 1e-08, %v6327_v49 }
 0x628   : > { %v4858_v54 = vpop.eup %4857  ;;  %4883 = vrsqrt.f32 %v2746_v53  ;;  %v3160_v6 = vmul.f32 %v4856_v46, %v5840_v2  ;;  %v3014_v46 = vmul.f32 1.442695, %v2935_v56  ;;  %v2748_v49 = vadd.f32 1e-08, %v6315_v21 }
 0x629   : > { %v6335_v10 = vpop.xlane.xlu0 %2488  ;;  %v4860_v22 = vpop.eup %4859  ;;  %4885 = vpow2.f32 %v3008_v47  ;;  %v2872_v44 = vmul.f32 %v4858_v54, %v6240_v50  ;;  %v2926_v3 = vmul.f32 6.0, %v2862_v52  ;;  %v2992_v50 = vmul.f32 1.442695, %v2924_v17 }
 0x62a   : > { %v4862_v59 = vpop.eup %4861  ;;  %4887 = vpow2.f32 %v3004_v51  ;;  %v3159_v8 = vmul.f32 %v4860_v22, %v5838_v55  ;;  %v2759_v21 = vadd.f32 1e-08, %v6322_v26 }
 0x62b   : > { %v6341_v18 = vpop.xlane.xlu1 %2646  ;;  %v4864_v41 = vpop.eup %4863  ;;  %4889 = vpow2.f32 %v2994_v0  ;;  %v3154_v33 = vmul.f32 %v4862_v59, %v5842_v12  ;;  %v2936_v11 = vmul.f32 6.0, %v2872_v44  ;;  %v2996_v54 = vmul.f32 1.442695, %v2926_v3 }
 0x62c   : > { %v4866_v15 = vpop.eup %4865  ;;  %4891 = vpow2.f32 %v2998_v1  ;;  %v2870_v16 = vmul.f32 %v4864_v41, %v6192_v40 }
 0x62d   : > { %v6344_v29 = vpop.xlane.xlu0 %2666  ;;  %v4868_v42 = vpop.eup %4867  ;;  %4893 = vrsqrt.f32 %v2749_v5  ;;  %v2883_v24 = vmul.f32 %v4866_v15, %v6249_v9 }
 0x62e   : > { %v4870_v53 = vpop.eup %4869  ;;  %4895 = vrsqrt.f32 %v2757_v38  ;;  %v2934_v9 = vmul.f32 6.0, %v2870_v16  ;;  %v3016_v38 = vmul.f32 1.442695, %v2936_v11  ;;  %v2761_v44 = vadd.f32 1e-08, %v6344_v29 }
 0x62f   : > { %v6346_v37 = vpop.xlane.xlu1 %2490  ;;  %v4872_v47 = vpop.eup %4871  ;;  %4897 = vrsqrt.f32 %v2756_v30  ;;  %v3153_v1 = vmul.f32 %v4870_v53, %v5844_v45  ;;  %v2947_v17 = vmul.f32 6.0, %v2883_v24  ;;  %v2751_v16 = vadd.f32 1e-08, %v6341_v18 }
 0x630   : > { %v4874_v51 = vpop.eup %4873  ;;  %4899 = vrsqrt.f32 %v2758_v39  ;;  %v2873_v52 = vmul.f32 %v4872_v47, %v6235_v4  ;;  %v3012_v56 = vmul.f32 1.442695, %v2934_v9 }
 0x631   : > { %v6353_v36 = vpop.xlane.xlu0 %2680  ;;  %v4876_v40 = vpop.eup %4875  ;;  %4901 = vpow2.f32 %v3034_v48  ;;  %v2880_v59 = vmul.f32 %v4874_v51, %v6221_v35 }
 0x632   : > { %3315 = vperm.xlu0 %4756, %v3152_v28   ;;  %v3151_v28 = vmul.f32 %v4868_v42, %v5838_v55  ;;  %v4878_v22 = vpop.eup %4877  ;;  %4903 = vpow2.f32 %v2992_v50  ;;  %v2882_v41 = vmul.f32 %v4876_v40, %v6253_v13  ;;  %v2937_v39 = vmul.f32 6.0, %v2873_v52 }
 0x633   : > { %v6360_v60 = vpop.xlane.xlu1 %2682  ;;  %3339 = vperm.xlu1 %4755, %v3160_v6   ;;  %v4880_v5 = vpop.eup %4879  ;;  %4905 = vrsqrt.f32 %v2750_v58  ;;  %v3164_v15 = vmul.f32 %v4878_v22, %v5846_v23  ;;  %v2944_v13 = vmul.f32 6.0, %v2880_v59  ;;  %v2768_v24 = vadd.f32 1e-08, %v6353_v36 }
 0x634   : > { %v4882_v6 = vpop.eup %4881  ;;  %4907 = vpow2.f32 %v3014_v46  ;;  %v3162_v3 = vmul.f32 %v4880_v5, %v5842_v12  ;;  %v2946_v50 = vmul.f32 6.0, %v2882_v41  ;;  %v3018_v51 = vmul.f32 1.442695, %v2937_v39 }
 0x635   : > { %v6364_v14 = vpop.xlane.xlu0 %2472  ;;  %v4884_v4 = vpop.eup %4883  ;;  %4909 = vpow2.f32 %v2996_v54  ;;  %v2875_v29 = vmul.f32 %v4882_v6, %v6265_v43 }
 0x636   : > { %3321 = vperm.xlu0 %4756, %v3154_v33   ;;  %v4886_v35 = vpop.eup %4885  ;;  %4911 = vrsqrt.f32 %v2748_v49  ;;  %v3038_v33 = vmul.f32 1.442695, %v2947_v17  ;;  %v2874_v26 = vmul.f32 %v4884_v4, %v6267_v62  ;;  %v3032_v62 = vmul.f32 1.442695, %v2944_v13 }
 0x637   : > { %v6369_v0 = vpop.xlane.xlu1 %2474  ;;  %3336 = vperm.xlu1 %4755, %v3159_v8   ;;  %v4888_v48 = vpop.eup %4887  ;;  %4913 = vpow2.f32 %v3016_v38  ;;  %v3163_v11 = vmul.f32 %v4886_v35, %v5848_v63  ;;  %v2939_v18 = vmul.f32 6.0, %v2875_v29  ;;  %v2769_v17 = vadd.f32 1e-08, %v6360_v60 }
 0x638   : > { %v4890_v53 = vpop.eup %4889  ;;  %4915 = vrsqrt.f32 %v2761_v44  ;;  %v3161_v46 = vmul.f32 %v4888_v48, %v5844_v45 }
 0x639   : > { %v6375_v25 = vpop.xlane.xlu0 %2492  ;;  %v4892_v47 = vpop.eup %4891  ;;  %4917 = vrsqrt.f32 %v2759_v21  ;;  %v3156_v6 = vmul.f32 %v4890_v53, %v5846_v23  ;;  %v3022_v44 = vmul.f32 1.442695, %v2939_v18 }
 0x63a   : > { %3318 = vperm.xlu0 %4756, %v3153_v1   ;;  %v4894_v58 = vpop.eup %4893  ;;  %4919 = vpow2.f32 %v3012_v56  ;;  %v3036_v1 = vmul.f32 1.442695, %v2946_v50  ;;  %v3158_v49 = vmul.f32 %v4892_v47, %v5850_v57 }
 0x63b   : > { %v6380_v30 = vpop.xlane.xlu1 %2494  ;;  %3312 = vperm.xlu1 %4755, %v3151_v28   ;;  %v4896_v40 = vpop.eup %4895  ;;  %4921 = vpow2.f32 %v3038_v33  ;;  %v2938_v28 = vmul.f32 6.0, %v2874_v26  ;;  %v2877_v9 = vmul.f32 %v4894_v58, %v6289_v7 }
 0x63c   : > { %v4898_v54 = vpop.eup %4897  ;;  %4923 = vrsqrt.f32 %v2751_v16  ;;  %v2885_v59 = vmul.f32 %v4896_v40, %v6275_v20 }
 0x63d   : > { %v2671_v42 = vpop.xlane.xlu0 %2670  ;;  %v4900_v36 = vpop.eup %4899  ;;  %4925 = vrsqrt.f32 %v2768_v24  ;;  %v2884_v4 = vmul.f32 %v4898_v54, %v6279_v27  ;;  %v3020_v21 = vmul.f32 1.442695, %v2938_v28  ;;  %v2941_v60 = vmul.f32 6.0, %v2877_v9 }
 0x63e   : > { %3351 = vperm.xlu0 %4756, %v3164_v15   ;;  %v2763_v52 = vadd.f32 1e-08, %v2671_v42  ;;  %v4902_v5 = vpop.eup %4901  ;;  %4927 = vpow2.f32 %v3018_v51  ;;  %v2886_v15 = vmul.f32 %v4900_v36, %v6304_v19  ;;  %v2949_v42 = vmul.f32 6.0, %v2885_v59  ;;  %v6771_v51 = vld [vmem:[#allocation16_spill] sm:$0xff] }
 0x63f   : > { %v2665_v8 = vpop.xlane.xlu1 %2664  ;;  %3345 = vperm.xlu1 %4755, %v3162_v3   ;;  %v4904_v41 = vpop.eup %4903  ;;  %4929 = vpow2.f32 %v3032_v62  ;;  %v3176_v56 = vmul.f32 %v4902_v5, %v5840_v2  ;;  %v2948_v33 = vmul.f32 6.0, %v2884_v4  ;;  %v3026_v24 = vmul.f32 1.442695, %v2941_v60 }
 0x640   : > { %v4906_v7 = vpop.eup %4905  ;;  %4931 = vpow2.f32 %v3036_v1  ;;  %v2760_v3 = vadd.f32 1e-08, %v2665_v8  ;;  %v3155_v27 = vmul.f32 %v4904_v41, %v5848_v63  ;;  %v2950_v50 = vmul.f32 6.0, %v2886_v15 }
 0x641   : > { %v6390_v43 = vpop.xlane.xlu0 %2476  ;;  %v4908_v20 = vpop.eup %4907  ;;  %4933 = vrsqrt.f32 %v2763_v52  ;;  %v2878_v19 = vmul.f32 %v4906_v7, %v6319_v61  ;;  %v3042_v58 = vmul.f32 1.442695, %v2949_v42  ;;  %v3040_v18 = vmul.f32 1.442695, %v2948_v33 }
 0x642   : > { %3348 = vperm.xlu0 %4756, %v3163_v11   ;;  %v4910_v39 = vpop.eup %4909  ;;  %4935 = vrsqrt.f32 %v2769_v17  ;;  %v3166_v61 = vmul.f32 %v4908_v20, %v5850_v57  ;;  %v3044_v28 = vmul.f32 1.442695, %v2950_v50 }
 0x643   : > { %v2687_v22 = vpop.xlane.xlu1 %2686  ;;  %3342 = vperm.xlu1 %4755, %v3161_v46   ;;  %v4912_v13 = vpop.eup %4911  ;;  %4937 = vpow2.f32 %v3022_v44  ;;  %v3157_v8 = vmul.f32 %v4910_v39, %v5852_v31  ;;  %v2942_v54 = vmul.f32 6.0, %v2878_v19 }
 0x644   : > { %v4914_v53 = vpop.eup %4913  ;;  %4939 = vpow2.f32 %v3020_v21  ;;  %v2771_v26 = vadd.f32 1e-08, %v2687_v22  ;;  %v2876_v46 = vmul.f32 %v4912_v13, %v6771_v51 }
 0x645   : > { %v6397_v38 = vpop.xlane.xlu0 %2496  ;;  %v4916_v47 = vpop.eup %4915  ;;  %v3167_v5 = vmul.f32 %v4914_v53, %v5838_v55 }
 0x646   : > { %3333 = vperm.xlu0 %4756, %v3158_v49   ;;  %v4918_v11 = vpop.eup %4917  ;;  %v2889_v22 = vmul.f32 %v4916_v47, %v6369_v0  ;;  %v2940_v17 = vmul.f32 6.0, %v2876_v46  ;;  %v3028_v0 = vmul.f32 1.442695, %v2942_v54 }
 0x647   : > { %v6402_v35 = vpop.xlane.xlu1 %2478  ;;  %3327 = vperm.xlu1 %4755, %v3156_v6   ;;  %v4920_v62 = vpop.eup %4919  ;;  %v2887_v52 = vmul.f32 %v4918_v11, %v6307_v32 }
 0x648   : > { %v4922_v1 = vpop.eup %4921  ;;  %v3165_v41 = vmul.f32 %v4920_v62, %v5852_v31  ;;  %v2953_v15 = vmul.f32 6.0, %v2889_v22 }
 0x649   : > { %v2689_v48 = vpop.xlane.xlu0 %2688  ;;  %v4924_v9 = vpop.eup %4923  ;;  %v3178_v20 = vmul.f32 %v4922_v1, %v5842_v12 }
 0x64a   : > { %v2772_v29 = vadd.f32 1e-08, %v2689_v48  ;;  %3387 = vperm.xlu0 %4756, %v3176_v56   ;;  %v4926_v59 = vpop.eup %4925  ;;  %v2879_v21 = vmul.f32 %v4924_v9, %v6331_v34  ;;  %v2951_v56 = vmul.f32 6.0, %v2887_v52  ;;  %v3024_v48 = vmul.f32 1.442695, %v2940_v17 }
 0x64b   : > { %v2685_v16 = vpop.xlane.xlu1 %2684  ;;  %3324 = vperm.xlu1 %4755, %v3155_v27   ;;  %v4928_v44 = vpop.eup %4927  ;;  %v2896_v39 = vmul.f32 %v4926_v59, %v6335_v10  ;;  %v3050_v53 = vmul.f32 1.442695, %v2953_v15 }
 0x64c   : > { %4941 = vrsqrt.f32 %v2772_v29  ;;  %v2770_v49 = vadd.f32 1e-08, %v2685_v16  ;;  %v4930_v7 = vpop.eup %4929  ;;  %v3168_v13 = vmul.f32 %v4928_v44, %v5840_v2  ;;  %v2943_v29 = vmul.f32 6.0, %v2879_v21 }
 0x64d   : > { %4943 = vrsqrt.f32 %v2760_v3  ;;  %v6409_v40 = vpop.xlane.xlu0 %2480  ;;  %v4932_v60 = vpop.eup %4931  ;;  %v3046_v16 = vmul.f32 1.442695, %v2951_v56  ;;  %v2960_v47 = vmul.f32 6.0, %v2896_v39  ;;  %v3175_v46 = vmul.f32 %v4930_v7, %v5838_v55 }
 0x64e   : > { %3330 = vperm.xlu0 %4756, %v3157_v8   ;;  %4945 = vrsqrt.f32 %v2771_v26  ;;  %v4934_v3 = vpop.eup %4933  ;;  %v3177_v10 = vmul.f32 %v4932_v60, %v5844_v45  ;;  %v3030_v62 = vmul.f32 1.442695, %v2943_v29 }
 0x64f   : > { %v6413_v36 = vpop.xlane.xlu1 %2498  ;;  %3357 = vperm.xlu1 %4755, %v3166_v61   ;;  %4947 = vpow2.f32 %v3026_v24  ;;  %v4936_v33 = vpop.eup %4935  ;;  %v2891_v24 = vmul.f32 %v4934_v3, %v6402_v35  ;;  %v3064_v1 = vmul.f32 1.442695, %v2960_v47 }
 0x650   : > { %4949 = vpow2.f32 %v3042_v58  ;;  %v4938_v19 = vpop.eup %4937  ;;  %v2897_v11 = vmul.f32 %v4936_v33, %v6346_v37 }
 0x651   : > { %v2673_v6 = vpop.xlane.xlu0 %2672  ;;  %4951 = vpow2.f32 %v3040_v18  ;;  %v4940_v26 = vpop.eup %4939 }
 0x652   : > { %v2764_v4 = vadd.f32 1e-08, %v2673_v6  ;;  %3360 = vperm.xlu0 %4756, %v3167_v5   ;;  %4953 = vpow2.f32 %v3044_v28  ;;  %v2955_v28 = vmul.f32 6.0, %v2891_v24  ;;  %v3169_v37 = vmul.f32 %v4940_v26, %v5844_v45 }
 0x653   : > { %v2669_v32 = vpop.xlane.xlu1 %2668  ;;  %3354 = vperm.xlu1 %4755, %v3165_v41   ;;  %4955 = vrsqrt.f32 %v2770_v49  ;;  %v2961_v9 = vmul.f32 6.0, %v2897_v11  ;;  %v3170_v5 = vmul.f32 %v4938_v19, %v5842_v12 }
 0x654   : > { %v2762_v42 = vadd.f32 1e-08, %v2669_v32  ;;  %4957 = vrsqrt.f32 %v2764_v4  ;;  %v3054_v4 = vmul.f32 1.442695, %v2955_v28 }
 0x655   : > { %v2695_v27 = vpop.xlane.xlu0 %2694  ;;  %4959 = vpow2.f32 %v3028_v0  ;;  %v3066_v15 = vmul.f32 1.442695, %v2961_v9 }
 0x656   : > { %v2775_v34 = vadd.f32 1e-08, %v2695_v27  ;;  %3393 = vperm.xlu0 %4756, %v3178_v20   ;;  %4961 = vrsqrt.f32 %v2762_v42 }
 0x657   : > { %v2691_v50 = vpop.xlane.xlu1 %2690  ;;  %3363 = vperm.xlu1 %4755, %v3168_v13  }
 0x658   : > { %4963 = vrsqrt.f32 %v2775_v34  ;;  %v2773_v58 = vadd.f32 1e-08, %v2691_v50 }
 0x659   : > { %v4942_v8 = vpop.eup %4941  ;;  %4965 = vpow2.f32 %v3024_v48  ;;  %v6425_v51 = vpop.xlane.xlu0 %2500 }
 0x65a   : > { %v4944_v61 = vpop.eup %4943  ;;  %3390 = vperm.xlu0 %4756, %v3177_v10   ;;  %4967 = vpow2.f32 %v3050_v53  ;;  %v2900_v18 = vmul.f32 %v4942_v8, %v6397_v38 }
 0x65b   : > { %v6429_v54 = vpop.xlane.xlu1 %2482  ;;  %3384 = vperm.xlu1 %4755, %v3175_v46   ;;  %v4946_v35 = vpop.eup %4945  ;;  %4969 = vpow2.f32 %v3046_v16  ;;  %v2888_v52 = vmul.f32 %v4944_v61, %v6364_v14 }
 0x65c   : > { %v4948_v22 = vpop.eup %4947  ;;  %4971 = vrsqrt.f32 %v2773_v58  ;;  %v2899_v6 = vmul.f32 %v4946_v35, %v6380_v30  ;;  %v2964_v41 = vmul.f32 6.0, %v2900_v18 }
 0x65d   : > { %v2679_v49 = vpop.xlane.xlu0 %2678  ;;  %v4950_v59 = vpop.eup %4949  ;;  %4973 = vpow2.f32 %v3030_v62  ;;  %v3172_v14 = vmul.f32 %v4948_v22, %v5846_v23  ;;  %v2952_v32 = vmul.f32 6.0, %v2888_v52 }
 0x65e   : > { %v2767_v17 = vadd.f32 1e-08, %v2679_v49  ;;  %3366 = vperm.xlu0 %4756, %v3169_v37   ;;  %v4952_v38 = vpop.eup %4951  ;;  %4975 = vpow2.f32 %v3064_v1  ;;  %v3180_v60 = vmul.f32 %v4950_v59, %v5846_v23  ;;  %v2963_v39 = vmul.f32 6.0, %v2899_v6 }
 0x65f   : > { %v2675_v44 = vpop.xlane.xlu1 %2674  ;;  %3369 = vperm.xlu1 %4755, %v3170_v5   ;;  %v4954_v0 = vpop.eup %4953  ;;  %v3072_v42 = vmul.f32 1.442695, %v2964_v41  ;;  %v3179_v33 = vmul.f32 %v4952_v38, %v5848_v63  ;;  %v3048_v19 = vmul.f32 1.442695, %v2952_v32 }
 0x660   : > { %v2765_v7 = vadd.f32 1e-08, %v2675_v44  ;;  %v4956_v21 = vpop.eup %4955  ;;  %4977 = vrsqrt.f32 %v2767_v17  ;;  %v3181_v13 = vmul.f32 %v4954_v0, %v5852_v31 }
 0x661   : > { %v6436_v20 = vpop.xlane.xlu0 %2484  ;;  %v4958_v56 = vpop.eup %4957  ;;  %v2898_v29 = vmul.f32 %v4956_v21, %v6375_v25 }
 0x662   : > { %3375 = vperm.xlu0 %4756, %v3172_v14   ;;  %v4960_v30 = vpop.eup %4959  ;;  %v2892_v3 = vmul.f32 %v4958_v56, %v6409_v40  ;;  %4979 = vrsqrt.f32 %v2765_v7  ;;  %v3070_v40 = vmul.f32 1.442695, %v2963_v39 }
 0x663   : > { %v2503_v48 = vpop.xlane.xlu1 %2502  ;;  %3399 = vperm.xlu1 %4755, %v3180_v60   ;;  %v4962_v27 = vpop.eup %4961  ;;  %4981 = vpow2.f32 %v3054_v4  ;;  %v3173_v24 = vmul.f32 %v4960_v30, %v5852_v31  ;;  %v2962_v25 = vmul.f32 6.0, %v2898_v29 }
 0x664   : > { %4983 = vpow2.f32 %v3066_v15  ;;  %v2956_v53 = vmul.f32 6.0, %v2892_v3  ;;  %v2890_v58 = vmul.f32 %v4962_v27, %v6390_v43 }
 0x665   : > { %v4964_v34 = vpop.eup %4963  ;;  %v2715_v50 = vpop.xlane.xlu0 %2714  ;;  %4985 = vpow2.f32 %v3072_v42  ;;  %v3068_v5 = vmul.f32 1.442695, %v2962_v25 }
 0x666   : > { %v4966_v10 = vpop.eup %4965  ;;  %v2903_v26 = vmul.f32 %v4964_v34, %v2503_v48  ;;  %v2785_v16 = vadd.f32 1e-08, %v2715_v50  ;;  %3402 = vperm.xlu0 %4756, %v3181_v13   ;;  %v3056_v11 = vmul.f32 1.442695, %v2956_v53  ;;  %v2954_v9 = vmul.f32 6.0, %v2890_v58 }
 0x667   : > { %v2487_v47 = vpop.xlane.xlu1 %2486  ;;  %3396 = vperm.xlu1 %4755, %v3179_v33   ;;  %v4968_v8 = vpop.eup %4967  ;;  %v3171_v18 = vmul.f32 %v4966_v10, %v5848_v63 }
 0x668   : > { %v2967_v46 = vmul.f32 6.0, %v2903_v26  ;;  %4987 = vrsqrt.f32 %v2785_v16  ;;  %v4970_v61 = vpop.eup %4969  ;;  %v3184_v37 = vmul.f32 %v4968_v8, %v5840_v2  ;;  %v3052_v4 = vmul.f32 1.442695, %v2954_v9 }
 0x669   : > { %4989 = vpow2.f32 %v3048_v19  ;;  %v2677_v62 = vpop.xlane.xlu0 %2676  ;;  %v4972_v35 = vpop.eup %4971  ;;  %v3182_v38 = vmul.f32 %v4970_v61, %v5850_v57 }
 0x66a   : > { %v2766_v1 = vadd.f32 1e-08, %v2677_v62  ;;  %3378 = vperm.xlu0 %4756, %v3173_v24   ;;  %4991 = vpow2.f32 %v3070_v40  ;;  %v4974_v22 = vpop.eup %4973  ;;  %v3078_v43 = vmul.f32 1.442695, %v2967_v46  ;;  %v2901_v59 = vmul.f32 %v4972_v35, %v6413_v36 }
 0x66b   : > { %v2693_v28 = vpop.xlane.xlu1 %2692  ;;  %3372 = vperm.xlu1 %4755, %v3171_v18   ;;  %4993 = vpow2.f32 %v3056_v11  ;;  %v4976_v49 = vpop.eup %4975  ;;  %v3174_v14 = vmul.f32 %v4974_v22, %v5850_v57 }
 0x66c   : > { %v2774_v52 = vadd.f32 1e-08, %v2693_v28  ;;  %4995 = vrsqrt.f32 %v2766_v1  ;;  %v3191_v7 = vmul.f32 %v4976_v49, %v5838_v55  ;;  %v2965_v36 = vmul.f32 6.0, %v2901_v59 }
 0x66d   : > { %v6448_v17 = vpop.xlane.xlu0 %2520  ;;  %v4978_v6 = vpop.eup %4977 }
 0x66e   : > { %4997 = vrsqrt.f32 %v2774_v52  ;;  %3411 = vperm.xlu0 %4756, %v3184_v37   ;;  %v2895_v41 = vmul.f32 %v4978_v6, %v2487_v47  ;;  %v3074_v27 = vmul.f32 1.442695, %v2965_v36 }
 0x66f   : > { %v2523_v44 = vpop.xlane.xlu1 %2522  ;;  %3405 = vperm.xlu1 %4755, %v3182_v38   ;;  %v4980_v0 = vpop.eup %4979  ;;  %4999 = vpow2.f32 %v3078_v43 }
 0x670   : > { %v4982_v21 = vpop.eup %4981  ;;  %5001 = vpow2.f32 %v3068_v5  ;;  %v2893_v15 = vmul.f32 %v4980_v0, %v6429_v54  ;;  %v2959_v32 = vmul.f32 6.0, %v2895_v41 }
 0x671   : > { %v6454_v60 = vpop.xlane.xlu0 %2504  ;;  %v4984_v56 = vpop.eup %4983  ;;  %5003 = vpow2.f32 %v3052_v4  ;;  %v3186_v3 = vmul.f32 %v4982_v21, %v5842_v12 }
 0x672   : > { %3432 = vperm.xlu0 %4756, %v3191_v7   ;;  %v3062_v30 = vmul.f32 1.442695, %v2959_v32  ;;  %v4986_v42 = vpop.eup %4985  ;;  %v2957_v13 = vmul.f32 6.0, %v2893_v15  ;;  %v3192_v54 = vmul.f32 %v4984_v56, %v5840_v2 }
 0x673   : > { %v6456_v39 = vpop.xlane.xlu1 %2506  ;;  %3381 = vperm.xlu1 %4755, %v3174_v14   ;;  %v3195_v16 = vmul.f32 %v4986_v42, %v5848_v63 }
 0x674   : > { %5005 = vpow2.f32 %v3062_v30  ;;  %v3058_v47 = vmul.f32 1.442695, %v2957_v13 }
 0x675   : > { %v4988_v48 = vpop.eup %4987  ;;  %v2697_v33 = vpop.xlane.xlu0 %2696 }
 0x676   : > { %v4990_v34 = vpop.eup %4989  ;;  %v2913_v19 = vmul.f32 %v4988_v48, %v2523_v44  ;;  %v2776_v29 = vadd.f32 1e-08, %v2697_v33  ;;  %3417 = vperm.xlu0 %4756, %v3186_v3  }
 0x677   : > { %v2699_v53 = vpop.xlane.xlu1 %2698  ;;  %3435 = vperm.xlu1 %4755, %v3192_v54   ;;  %v4992_v50 = vpop.eup %4991  ;;  %v3183_v8 = vmul.f32 %v4990_v34, %v5838_v55 }
 0x678   : > { %v2977_v10 = vmul.f32 6.0, %v2913_v19  ;;  %5007 = vrsqrt.f32 %v2776_v29  ;;  %v2777_v26 = vadd.f32 1e-08, %v2699_v53  ;;  %v4994_v40 = vpop.eup %4993  ;;  %v3194_v22 = vmul.f32 %v4992_v50, %v5842_v12 }
 0x679   : > { %5009 = vpow2.f32 %v3074_v27  ;;  %v6461_v24 = vpop.xlane.xlu0 %2524  ;;  %v4996_v11 = vpop.eup %4995  ;;  %v3187_v35 = vmul.f32 %v4994_v40, %v5848_v63 }
 0x67a   : > { %v3098_v58 = vmul.f32 1.442695, %v2977_v10  ;;  %5011 = vrsqrt.f32 %v2777_v26  ;;  %3444 = vperm.xlu0 %4756, %v3195_v16   ;;  %v2894_v61 = vmul.f32 %v4996_v11, %v6436_v20 }
 0x67b   : > { %v4998_v46 = vpop.eup %4997  ;;  %v2713_v25 = vpop.xlane.xlu1 %2712  ;;  %3408 = vperm.xlu1 %4755, %v3183_v8  }
 0x67c   : > { %v2902_v62 = vmul.f32 %v4998_v46, %v6425_v51  ;;  %5013 = vpow2.f32 %v3098_v58  ;;  %v2784_v18 = vadd.f32 1e-08, %v2713_v25  ;;  %v5000_v1 = vpop.eup %4999  ;;  %v2958_v28 = vmul.f32 6.0, %v2894_v61 }
 0x67d   : > { %5015 = vpow2.f32 %v3058_v47  ;;  %v2717_v37 = vpop.xlane.xlu0 %2716  ;;  %v5002_v9 = vpop.eup %5001  ;;  %v3198_v5 = vmul.f32 %v5000_v1, %v5850_v57 }
 0x67e   : > { %v2966_v43 = vmul.f32 6.0, %v2902_v62  ;;  %5017 = vrsqrt.f32 %v2784_v18  ;;  %v2786_v52 = vadd.f32 1e-08, %v2717_v37  ;;  %3420 = vperm.xlu0 %4756, %v3187_v35   ;;  %v3060_v20 = vmul.f32 1.442695, %v2958_v28  ;;  %v5004_v59 = vpop.eup %5003 }
 0x67f   : > { %v6468_v49 = vpop.xlane.xlu1 %2526  ;;  %3441 = vperm.xlu1 %4755, %v3194_v22   ;;  %v3193_v6 = vmul.f32 %v5002_v9, %v5844_v45  ;;  %v3185_v21 = vmul.f32 %v5004_v59, %v5844_v45 }
 0x680   : > { %v3076_v51 = vmul.f32 1.442695, %v2966_v43  ;;  %5019 = vrsqrt.f32 %v2786_v52 }
 0x681   : > { %5021 = vpow2.f32 %v3060_v20  ;;  %v6471_v38 = vpop.xlane.xlu0 %2508  ;;  %v5006_v41 = vpop.eup %5005 }
 0x682   : > { %5023 = vpow2.f32 %v3076_v51  ;;  %3453 = vperm.xlu0 %4756, %v3198_v5   ;;  %v3190_v4 = vmul.f32 %v5006_v41, %v5850_v57 }
 0x683   : > { %v2719_v44 = vpop.xlane.xlu1 %2718  ;;  %3438 = vperm.xlu1 %4755, %v3193_v6  }
 0x684   : > { %v2787_v0 = vadd.f32 1e-08, %v2719_v44 }
 0x685   : > { %v5008_v7 = vpop.eup %5007  ;;  %v2701_v14 = vpop.xlane.xlu0 %2700 }
 0x686   : > { %v5010_v36 = vpop.eup %5009  ;;  %v2904_v15 = vmul.f32 %v5008_v7, %v6454_v60  ;;  %5025 = vrsqrt.f32 %v2787_v0  ;;  %v2778_v32 = vadd.f32 1e-08, %v2701_v14  ;;  %3429 = vperm.xlu0 %4756, %v3190_v4  }
 0x687   : > { %v5012_v56 = vpop.eup %5011  ;;  %v6477_v30 = vpop.xlane.xlu1 %2510  ;;  %3414 = vperm.xlu1 %4755, %v3185_v21   ;;  %v3196_v13 = vmul.f32 %v5010_v36, %v5846_v23 }
 0x688   : > { %v2968_v42 = vmul.f32 6.0, %v2904_v15  ;;  %v2905_v3 = vmul.f32 %v5012_v56, %v6456_v39  ;;  %5027 = vrsqrt.f32 %v2778_v32 }
 0x689   : > { %v5014_v48 = vpop.eup %5013  ;;  %v2723_v27 = vpop.xlane.xlu0 %2722 }
 0x68a   : > { %v5016_v33 = vpop.eup %5015  ;;  %v3080_v54 = vmul.f32 1.442695, %v2968_v42  ;;  %v2969_v34 = vmul.f32 6.0, %v2905_v3  ;;  %v2789_v19 = vadd.f32 1e-08, %v2723_v27  ;;  %v3208_v60 = vmul.f32 %v5014_v48, %v5840_v2 }
 0x68b   : > { %v5018_v29 = vpop.eup %5017  ;;  %v2703_v53 = vpop.xlane.xlu1 %2702  ;;  %3447 = vperm.xlu1 %4755, %v3196_v13   ;;  %v3188_v40 = vmul.f32 %v5016_v33, %v5846_v23 }
 0x68c   : > { %5029 = vpow2.f32 %v3080_v54  ;;  %v3082_v50 = vmul.f32 1.442695, %v2969_v34  ;;  %v2912_v10 = vmul.f32 %v5018_v29, %v6448_v17  ;;  %v2779_v26 = vadd.f32 1e-08, %v2703_v53  ;;  %3483 = vperm.xlu0 %4756, %v3208_v60  }
 0x68d   : > { %v5020_v39 = vpop.eup %5019  ;;  %5031 = vrsqrt.f32 %v2789_v19  ;;  %v6483_v16 = vpop.xlane.xlu0 %2528 }
 0x68e   : > { %v5022_v47 = vpop.eup %5021  ;;  %5033 = vpow2.f32 %v3082_v50  ;;  %v2976_v8 = vmul.f32 6.0, %v2912_v10  ;;  %v2914_v11 = vmul.f32 %v5020_v39, %v6461_v24 }
 0x68f   : > { %v5024_v58 = vpop.eup %5023  ;;  %5035 = vrsqrt.f32 %v2779_v26  ;;  %v2531_v46 = vpop.xlane.xlu1 %2530  ;;  %3423 = vperm.xlu1 %4755, %v3188_v40   ;;  %v3189_v61 = vmul.f32 %v5022_v47, %v5852_v31 }
 0x690   : > { %v3096_v17 = vmul.f32 1.442695, %v2976_v8  ;;  %v2978_v25 = vmul.f32 6.0, %v2914_v11  ;;  %v3197_v62 = vmul.f32 %v5024_v58, %v5852_v31 }
 0x691   : > { %3426 = vperm.xlu0 %4756, %v3189_v61   ;;  %v2707_v18 = vpop.xlane.xlu0 %2706 }
 0x692   : > { %5037 = vpow2.f32 %v3096_v17  ;;  %v3100_v35 = vmul.f32 1.442695, %v2978_v25  ;;  %v2781_v1 = vadd.f32 1e-08, %v2707_v18 }
 0x693   : > { %v5026_v28 = vpop.eup %5025  ;;  %v2515_v37 = vpop.xlane.xlu1 %2514  ;;  %3450 = vperm.xlu1 %4755, %v3197_v62  }
 0x694   : > { %5039 = vpow2.f32 %v3100_v35  ;;  %v2915_v24 = vmul.f32 %v5026_v28, %v6468_v49 }
 0x695   : > { %v5028_v22 = vpop.eup %5027  ;;  %5041 = vrsqrt.f32 %v2781_v1  ;;  %v6490_v9 = vpop.xlane.xlu0 %2512 }
 0x696   : > { %v2979_v43 = vmul.f32 6.0, %v2915_v24  ;;  %v2906_v52 = vmul.f32 %v5028_v22, %v6471_v38  ;;  %v6772_v24 = vld [vmem:[#allocation14_spill] sm:$0xff] }
 0x697   : > { %v2721_v20 = vpop.xlane.xlu1 %2720 }
 0x698   : > { %v3102_v51 = vmul.f32 1.442695, %v2979_v43  ;;  %v2970_v5 = vmul.f32 6.0, %v2906_v52  ;;  %v2788_v59 = vadd.f32 1e-08, %v2721_v20 }
 0x699   : > { %v5030_v6 = vpop.eup %5029  ;;  %v2705_v41 = vpop.xlane.xlu0 %2704 }
 0x69a   : > { %v5032_v44 = vpop.eup %5031  ;;  %5043 = vpow2.f32 %v3102_v51  ;;  %v3084_v0 = vmul.f32 1.442695, %v2970_v5  ;;  %v2780_v4 = vadd.f32 1e-08, %v2705_v41  ;;  %v3199_v7 = vmul.f32 %v5030_v6, %v5838_v55 }
 0x69b   : > { %v5034_v49 = vpop.eup %5033  ;;  %v2917_v14 = vmul.f32 %v5032_v44, %v2531_v46  ;;  %5045 = vrsqrt.f32 %v2788_v59  ;;  %v6494_v21 = vpop.xlane.xlu1 %2534  ;;  %v3514_v6 = vadd.s32 4294967280, %v6772_v24 }
 0x69c   : > { %v5036_v36 = vpop.eup %5035  ;;  %5047 = vpow2.f32 %v3084_v0  ;;  %3456 = vperm.xlu0 %4756, %v3199_v7   ;;  %v3200_v38 = vmul.f32 %v5034_v49, %v5840_v2  ;;  %v3521_v0 = vadd.s32 4294967272, %v6772_v24 }
 0x69d   : > { %v2907_v15 = vmul.f32 %v5036_v36, %v6477_v30  ;;  %v2981_v32 = vmul.f32 6.0, %v2917_v14  ;;  %5049 = vrsqrt.f32 %v2780_v4  ;;  %v2533_v56 = vpop.xlane.xlu0 %2532 }
 0x69e   : > { %3459 = vperm.xlu1 %4755, %v3200_v38  }
 0x69f   : > { %v5038_v42 = vpop.eup %5037  ;;  %v2971_v3 = vmul.f32 6.0, %v2907_v15  ;;  %v3106_v48 = vmul.f32 1.442695, %v2981_v32  ;;  %v2727_v27 = vpop.xlane.xlu1 %2726 }
 0x6a0   : > { %v3207_v13 = vmul.f32 %v5038_v42, %v5838_v55  ;;  %v2791_v53 = vadd.f32 1e-08, %v2727_v27 }
 0x6a1   : > { %v5040_v33 = vpop.eup %5039  ;;  %v3086_v54 = vmul.f32 1.442695, %v2971_v3  ;;  %5051 = vpow2.f32 %v3106_v48  ;;  %v2725_v34 = vpop.xlane.xlu0 %2724 }
 0x6a2   : > { %v5042_v19 = vpop.eup %5041  ;;  %v2790_v60 = vadd.f32 1e-08, %v2725_v34  ;;  %3480 = vperm.xlu1 %4755, %v3207_v13   ;;  %v3209_v2 = vmul.f32 %v5040_v33, %v5844_v45 }
 0x6a3   : > { %5053 = vpow2.f32 %v3086_v54  ;;  %v2909_v30 = vmul.f32 %v5042_v19, %v2515_v37  ;;  %v6500_v29 = vpop.xlane.xlu1 %2518 }
 0x6a4   : > { %5055 = vrsqrt.f32 %v2790_v60  ;;  %3486 = vperm.xlu0 %4756, %v3209_v2  }
 0x6a5   : > { %v2973_v50 = vmul.f32 6.0, %v2909_v30  ;;  %5057 = vrsqrt.f32 %v2791_v53  ;;  %v6504_v58 = vpop.xlane.xlu0 %2516 }
 0x6a7   : > { %v5044_v10 = vpop.eup %5043  ;;  %v3090_v26 = vmul.f32 1.442695, %v2973_v50  ;;  %v2711_v55 = vpop.xlane.xlu1 %2710  ;;  %v3528_v50 = vadd.s32 4294967264, %v6772_v24 }
 0x6a8   : > { %v5046_v39 = vpop.eup %5045  ;;  %v2783_v40 = vadd.f32 1e-08, %v2711_v55  ;;  %v3210_v47 = vmul.f32 %v5044_v10, %v5842_v12  ;;  %v3535_v10 = vadd.s32 4294967256, %v6772_v24 }
 0x6a9   : > { %v5048_v8 = vpop.eup %5047  ;;  %5059 = vpow2.f32 %v3090_v26  ;;  %v2916_v11 = vmul.f32 %v5046_v39, %v6483_v16  ;;  %v3507_v16 = vadd.s32 4294967288, %v6772_v24 }
 0x6aa   : > { %v5050_v46 = vpop.eup %5049  ;;  %5061 = vrsqrt.f32 %v2783_v40  ;;  %3489 = vperm.xlu1 %4755, %v3210_v47   ;;  %v3201_v61 = vmul.f32 %v5048_v8, %v5844_v45  ;;  %v6773_v45 = vld [vmem:[#allocation13_spill] sm:$0xff] }
 0x6ab   : > { %v2980_v17 = vmul.f32 6.0, %v2916_v11  ;;  %v2908_v25 = vmul.f32 %v5050_v46, %v6490_v9  ;;  %v2709_v62 = vpop.xlane.xlu1 %2708  ;;  %v6512_v51 = vsub.s32 %v6772_v24, %v6773_v45  ;;  %v6517_v44 = vsub.s32 %v3507_v16, %v6773_v45 }
 0x6ac   : > { %v2782_v18 = vadd.f32 1e-08, %v2709_v62  ;;  %3462 = vperm.xlu0 %4756, %v3201_v61   ;;  %v6523_v38 = vsub.s32 %v3514_v6, %v6773_v45 }
 0x6ad   : > { %v3104_v35 = vmul.f32 1.442695, %v2980_v17  ;;  %v2972_v1 = vmul.f32 6.0, %v2908_v25  ;;  %v3316_v28 = vpop.permute.xlu0 %3315  ;;  %v6544_v17 = vsub.s32 %v3528_v50, %v6773_v45  ;;  %v6547_v25 = vsub.s32 %v3535_v10, %v6773_v45 }
 0x6ae   : > { %v5052_v37 = vpop.eup %5051  ;;  %5063 = vrsqrt.f32 %v2782_v18  ;;  %v3511_v48 = vrot.slane %v3316_v28, %v6517_v44 }
 0x6af   : > { %5065 = vpow2.f32 %v3104_v35  ;;  %v3088_v22 = vmul.f32 1.442695, %v2972_v1  ;;  %v3340_v43 = vpop.permute.xlu1 %3339  ;;  %v3212_v52 = vmul.f32 %v5052_v37, %v5846_v23 }
 0x6b0   : > { %v5054_v20 = vpop.eup %5053  ;;  %v3563_v49 = vrot.slane %v3340_v43, %v6517_v44  ;;  %v3542_v43 = vadd.s32 4294967248, %v6772_v24 }
 0x6b1   : > { %v5056_v9 = vpop.eup %5055  ;;  %5067 = vpow2.f32 %v3088_v22  ;;  %3495 = vperm.xlu0 %4756, %v3212_v52   ;;  %v3322_v5 = vpop.permute.xlu0 %3321  ;;  %v3202_v59 = vmul.f32 %v5054_v20, %v5842_v12  ;;  %v3549_v20 = vadd.s32 4294967240, %v6772_v24 }
 0x6b2   : > { %v2918_v41 = vmul.f32 %v5056_v9, %v2533_v56  ;;  %v5058_v36 = vpop.eup %5057  ;;  %v6526_v56 = vsub.s32 %v3521_v0, %v6773_v45 }
 0x6b3   : > { %3465 = vperm.xlu1 %4755, %v3202_v59   ;;  %v3337_v4 = vpop.permute.xlu1 %3336  ;;  %v2919_v33 = vmul.f32 %v5058_v36, %v6494_v21 }
 0x6b4   : > { %v2982_v7 = vmul.f32 6.0, %v2918_v41  ;;  %v3559_v14 = vrot.slane %v3337_v4, %v6512_v51  ;;  %v3525_v30 = vrot.slane %v3322_v5, %v6526_v56  ;;  %v6562_v4 = vsub.s32 %v3542_v43, %v6773_v45 }
 0x6b5   : > { %v3319_v12 = vpop.permute.xlu0 %3318  ;;  %v2983_v55 = vmul.f32 6.0, %v2919_v33 }
 0x6b6   : > { %v5060_v15 = vpop.eup %5059  ;;  %v3108_v32 = vmul.f32 1.442695, %v2982_v7  ;;  %v3564_v42 = vsel %vm3512_vm14, %v3563_v49, %v3559_v14  ;;  %v3518_v19 = vrot.slane %v3319_v12, %v6523_v38  ;;  %v6565_v7 = vsub.s32 %v3549_v20, %v6773_v45 }
 0x6b7   : > { %v5062_v3 = vpop.eup %5061  ;;  %v3313_v27 = vpop.permute.xlu1 %3312  ;;  %v3204_v13 = vmul.f32 %v5060_v15, %v5846_v23  ;;  %v3110_v35 = vmul.f32 1.442695, %v2983_v55 }
 0x6b8   : > { %5069 = vpow2.f32 %v3108_v32  ;;  %v2911_v54 = vmul.f32 %v5062_v3, %v6500_v29  ;;  %v3506_v34 = vrot.slane %v3313_v27, %v6512_v51 }
 0x6b9   : > { %3471 = vperm.xlu0 %4756, %v3204_v13   ;;  %v3352_v60 = vpop.permute.xlu0 %3351 }
 0x6ba   : > { %v2975_v2 = vmul.f32 6.0, %v2911_v54  ;;  %v3513_v53 = vsel %vm3512_vm14, %v3511_v48, %v3506_v34  ;;  %v3583_v52 = vrot.slane %v3352_v60, %v6547_v25 }
 0x6bb   : > { %v5064_v23 = vpop.eup %5063  ;;  %v3520_v21 = vsel %vm3519_vm15, %v3518_v19, %v3513_v53  ;;  %v3346_v29 = vpop.permute.xlu1 %3345 }
 0x6bc   : > { %v5066_v26 = vpop.eup %5065  ;;  %v3094_v39 = vmul.f32 1.442695, %v2975_v2  ;;  %v2910_v40 = vmul.f32 %v5064_v23, %v6504_v58  ;;  %v3527_v47 = vsel %vm3526_vm2, %v3525_v30, %v3520_v21  ;;  %v3573_v28 = vrot.slane %v3346_v29, %v6526_v56 }
 0x6bd   : > { %v3349_v8 = vpop.permute.xlu0 %3348  ;;  %v3211_v11 = vmul.f32 %v5066_v26, %v5848_v63 }
 0x6be   : > { %v5068_v46 = vpop.eup %5067  ;;  %5071 = vpow2.f32 %v3094_v39  ;;  %v2974_v61 = vmul.f32 6.0, %v2910_v40  ;;  %v3578_v16 = vrot.slane %v3349_v8, %v6544_v17 }
 0x6bf   : > { %3492 = vperm.xlu1 %4755, %v3211_v11   ;;  %v3343_v62 = vpop.permute.xlu1 %3342  ;;  %v3203_v18 = vmul.f32 %v5068_v46, %v5848_v63 }
 0x6c0   : > { %v3092_v58 = vmul.f32 1.442695, %v2974_v61  ;;  %v3568_v1 = vrot.slane %v3343_v62, %v6523_v38 }
 0x6c1   : > { %3468 = vperm.xlu0 %4756, %v3203_v18   ;;  %v3334_v37 = vpop.permute.xlu0 %3333 }
 0x6c2   : > { %5073 = vpow2.f32 %v3092_v58  ;;  %v3569_v22 = vsel %vm3519_vm15, %v3568_v1, %v3564_v42  ;;  %v3553_v42 = vrot.slane %v3334_v37, %v6565_v7 }
 0x6c3   : > { %v3574_v63 = vsel %vm3526_vm2, %v3573_v28, %v3569_v22  ;;  %v3328_v9 = vpop.permute.xlu1 %3327  ;;  %5075 = vpow2.f32 %v3110_v35 }
 0x6c4   : > { %v3579_v5 = vsel %vm3533_vm5, %v3578_v16, %v3574_v63  ;;  %v3539_v24 = vrot.slane %v3328_v9, %v6547_v25 }
 0x6c5   : > { %v5070_v59 = vpop.eup %5069  ;;  %v3388_v6 = vpop.permute.xlu0 %3387  ;;  %v3584_v41 = vsel %vm3540_vm8, %v3583_v52, %v3579_v5 }
 0x6c6   : > { %v3213_v0 = vmul.f32 %v5070_v59, %v5852_v31 }
 0x6c7   : > { %v3325_v49 = vpop.permute.xlu1 %3324 }
 0x6c8   : > { %v3532_v14 = vrot.slane %v3325_v49, %v6544_v17  ;;  %3498 = vperm.xlu0 %4756, %v3213_v0  }
 0x6c9   : > { %v3331_v36 = vpop.permute.xlu0 %3330 }
 0x6ca   : > { %v3534_v12 = vsel %vm3533_vm5, %v3532_v14, %v3527_v47  ;;  %v3546_v15 = vrot.slane %v3331_v36, %v6562_v4  ;;  %v3641_v47 = vrot.slane %v3388_v6, %v6517_v44 }
 0x6cb   : > { %v5072_v32 = vpop.eup %5071  ;;  %v3541_v3 = vsel %vm3540_vm8, %v3539_v24, %v3534_v12  ;;  %v3358_v45 = vpop.permute.xlu1 %3357 }
 0x6cc   : > { %v3548_v48 = vsel %vm3547_vm11, %v3546_v15, %v3541_v3  ;;  %v3206_v27 = vmul.f32 %v5072_v32, %v5850_v57  ;;  %v3593_v30 = vrot.slane %v3358_v45, %v6565_v7 }
 0x6cd   : > { %v3555_v13 = vsel %vm3554_vm1, %v3553_v42, %v3548_v48  ;;  %v3361_v33 = vpop.permute.xlu0 %3360 }
 0x6ce   : > { %3477 = vperm.xlu1 %4755, %v3206_v27   ;;  %v3598_v10 = vrot.slane %v3361_v33, %v6512_v51 }
 0x6cf   : > { %v5074_v54 = vpop.eup %5073  ;;  %v3355_v34 = vpop.permute.xlu1 %3354 }
 0x6d0   : > { %v3588_v19 = vrot.slane %v3355_v34, %v6562_v4  ;;  %v3205_v60 = vmul.f32 %v5074_v54, %v5852_v31  ;;  %v5076_v2 = vpop.eup %5075 }
 0x6d1   : > { %v3394_v53 = vpop.permute.xlu0 %3393  ;;  %v3214_v26 = vmul.f32 %v5076_v2, %v5850_v57 }
 0x6d2   : > { %v3589_v50 = vsel %vm3547_vm11, %v3588_v19, %v3584_v41  ;;  %3474 = vperm.xlu1 %4755, %v3205_v60   ;;  %v3651_v61 = vrot.slane %v3394_v53, %v6526_v56 }
 0x6d3   : > { %v3594_v23 = vsel %vm3554_vm1, %v3593_v30, %v3589_v50  ;;  %v3364_v21 = vpop.permute.xlu1 %3363 }
 0x6d4   : > { %v3602_v29 = vrot.slane %v3364_v21, %v6517_v44  ;;  %v3830_v55 = vsel %vm3829_vm12, %v3594_v23, %v3555_v13  ;;  %vm6774_vm12 = vcmask 1043459  }
 0x6d5   : > { %v3391_v39 = vpop.permute.xlu0 %3390 }
 0x6d6   : > { %v3603_v31 = vsel %vm3512_vm14, %v3602_v29, %v3598_v10  ;;  %3501 = vperm.xlu1 %4755, %v3214_v26   ;;  %v3646_v11 = vrot.slane %v3391_v39, %v6523_v38 }
 0x6d7   : > { %v3385_v40 = vpop.permute.xlu1 %3384 }
 0x6d8   : > { %v3637_v8 = vrot.slane %v3385_v40, %v6512_v51 }
 0x6d9   : > { %v3367_v46 = vpop.permute.xlu0 %3366 }
 0x6da   : > { %v3642_v62 = vsel %vm3512_vm14, %v3641_v47, %v3637_v8  ;;  %v3607_v57 = vrot.slane %v3367_v46, %v6523_v38 }
 0x6db   : > { %v3647_v18 = vsel %vm3519_vm15, %v3646_v11, %v3642_v62  ;;  %v3370_v35 = vpop.permute.xlu1 %3369 }
 0x6dc   : > { %v3608_v58 = vsel %vm3519_vm15, %v3607_v57, %v3603_v31  ;;  %v3612_v1 = vrot.slane %v3370_v35, %v6526_v56  ;;  %v3652_v28 = vsel %vm3526_vm2, %v3651_v61, %v3647_v18 }
 0x6dd   : > { %v3376_v37 = vpop.permute.xlu0 %3375 }
 0x6de   : > { %v3613_v16 = vsel %vm3526_vm2, %v3612_v1, %v3608_v58  ;;  %v3622_v49 = vrot.slane %v3376_v37, %v6547_v25 }
 0x6df   : > { %v3400_v22 = vpop.permute.xlu1 %3399 }
 0x6e0   : > { %v3661_v20 = vrot.slane %v3400_v22, %v6547_v25 }
 0x6e1   : > { %v3403_v43 = vpop.permute.xlu0 %3402 }
 0x6e2   : > { %v3666_v9 = vrot.slane %v3403_v43, %v6562_v4 }
 0x6e3   : > { %v3397_v52 = vpop.permute.xlu1 %3396 }
 0x6e4   : > { %v3656_v63 = vrot.slane %v3397_v52, %v6544_v17 }
 0x6e5   : > { %v3379_v12 = vpop.permute.xlu0 %3378 }
 0x6e6   : > { %v3657_v5 = vsel %vm3533_vm5, %v3656_v63, %v3652_v28  ;;  %v3627_v42 = vrot.slane %v3379_v12, %v6562_v4 }
 0x6e7   : > { %v3662_v59 = vsel %vm3540_vm8, %v3661_v20, %v3657_v5  ;;  %v3373_v6 = vpop.permute.xlu1 %3372 }
 0x6e8   : > { %v3617_v41 = vrot.slane %v3373_v6, %v6544_v17  ;;  %v3667_v0 = vsel %vm3547_vm11, %v3666_v9, %v3662_v59 }
 0x6e9   : > { %v3412_v54 = vpop.permute.xlu0 %3411 }
 0x6ea   : > { %v3618_v14 = vsel %vm3533_vm5, %v3617_v41, %v3613_v16  ;;  %v3680_v58 = vrot.slane %v3412_v54, %v6517_v44 }
 0x6eb   : > { %v3623_v24 = vsel %vm3540_vm8, %v3622_v49, %v3618_v14  ;;  %v3406_v36 = vpop.permute.xlu1 %3405 }
 0x6ec   : > { %v3671_v15 = vrot.slane %v3406_v36, %v6565_v7  ;;  %v3628_v48 = vsel %vm3547_vm11, %v3627_v42, %v3623_v24 }
 0x6ed   : > { %v3433_v34 = vpop.permute.xlu0 %3432 }
 0x6ee   : > { %v3672_v32 = vsel %vm3554_vm1, %v3671_v15, %v3667_v0  ;;  %v3715_v37 = vrot.slane %v3433_v34, %v6512_v51 }
 0x6ef   : > { %v3382_v3 = vpop.permute.xlu1 %3381 }
 0x6f0   : > { %v3632_v45 = vrot.slane %v3382_v3, %v6565_v7 }
 0x6f1   : > { %v3418_v60 = vpop.permute.xlu0 %3417 }
 0x6f2   : > { %v3633_v27 = vsel %vm3554_vm1, %v3632_v45, %v3628_v48  ;;  %v3690_v63 = vrot.slane %v3418_v60, %v6526_v56 }
 0x6f3   : > { %v3832_v13 = vsel %vm3831_vm0, %v3633_v27, %v3830_v55  ;;  %v3436_v19 = vpop.permute.xlu1 %3435 }
 0x6f4   : > { %v6615_v33 = vsel %vm6774_vm12, %v3672_v32, %v3832_v13  ;;  %v3719_v1 = vrot.slane %v3436_v19, %v6517_v44 }
 0x6f5   : > { %v3445_v30 = vpop.permute.xlu0 %3444 }
 0x6f6   : > { %v3720_v20 = vsel %vm3512_vm14, %v3719_v1, %v3715_v37  ;;  %v3734_v54 = vrot.slane %v3445_v30, %v6544_v17 }
 0x6f7   : > { %v3409_v2 = vpop.permute.xlu1 %3408 }
 0x6f8   : > { %v3676_v62 = vrot.slane %v3409_v2, %v6512_v51 }
 0x6f9   : > { %v3421_v50 = vpop.permute.xlu0 %3420 }
 0x6fa   : > { %v3681_v16 = vsel %vm3512_vm14, %v3680_v58, %v3676_v62  ;;  %v3695_v41 = vrot.slane %v3421_v50, %v6544_v17 }
 0x6fb   : > { %v3442_v53 = vpop.permute.xlu1 %3441 }
 0x6fc   : > { %v3729_v5 = vrot.slane %v3442_v53, %v6526_v56 }
 0x6fd   : > { %v6617_v21 = vpop.permute.xlu0 %3453 }
 0x6ff   : > { %v3439_v23 = vpop.permute.xlu1 %3438 }
 0x700   : > { %v3724_v28 = vrot.slane %v3439_v23, %v6523_v38 }
 0x701   : > { %v6619_v29 = vpop.permute.xlu0 %3429 }
 0x702   : > { %v3725_v9 = vsel %vm3519_vm15, %v3724_v28, %v3720_v20 }
 0x703   : > { %v3415_v10 = vpop.permute.xlu1 %3414  ;;  %v3730_v24 = vsel %vm3526_vm2, %v3729_v5, %v3725_v9 }
 0x704   : > { %v3685_v57 = vrot.slane %v3415_v10, %v6523_v38 }
 0x706   : > { %v3686_v22 = vsel %vm3519_vm15, %v3685_v57, %v3681_v16 }
 0x707   : > { %v3448_v26 = vpop.permute.xlu1 %3447  ;;  %v3484_v39 = vpop.permute.xlu0 %3483  ;;  %v3691_v59 = vsel %vm3526_vm2, %v3690_v63, %v3686_v22  ;;  %v6775_v63 = vld [vmem:[#allocation15_spill] sm:$0xff] }
 0x708   : > { %v3696_v15 = vsel %vm3533_vm5, %v3695_v41, %v3691_v59  ;;  %v3739_v45 = vrot.slane %v3448_v26, %v6547_v25  ;;  %v3797_v48 = vrot.slane %v3484_v39, %v6517_v44  ;;  %v3710_v26 = vrot.slane %v6619_v29, %v6565_v7 }
 0x709   : > { %v4012_v20 = vmax.f32 %v6775_v63, 1e-30 }
 0x70b   : > { %v3424_v55 = vpop.permute.xlu1 %3423  ;;  %5077 = vlog2.f32 %v4012_v20 }
 0x70c   : > { %v3427_v31 = vpop.permute.xlu0 %3426  ;;  %v3700_v6 = vrot.slane %v3424_v55, %v6547_v25 }
 0x70d   : > { %v3705_v32 = vrot.slane %v3427_v31, %v6562_v4 }
 0x70e   : > { %v3701_v27 = vsel %vm3540_vm8, %v3700_v6, %v3696_v15 }
 0x70f   : > { %v3451_v40 = vpop.permute.xlu1 %3450  ;;  %v3706_v23 = vsel %vm3547_vm11, %v3705_v32, %v3701_v27 }
 0x710   : > { %v3744_v34 = vrot.slane %v3451_v40, %v6562_v4 }
 0x717   : > { %v3457_v47 = vpop.permute.xlu0 %3456 }
 0x718   : > { %v3754_v42 = vrot.slane %v3457_v47, %v6512_v51 }
 0x719   : > { %v3460_v8 = vpop.permute.xlu1 %3459 }
 0x71a   : > { %v3758_v0 = vrot.slane %v3460_v8, %v6517_v44  ;;  %v3735_v44 = vsel %vm3533_vm5, %v3734_v54, %v3730_v24  ;;  %v3749_v8 = vrot.slane %v6617_v21, %v6565_v7 }
 0x71c   : > { %v3759_v19 = vsel %vm3512_vm14, %v3758_v0, %v3754_v42 }
 0x71d   : > { %v3481_v61 = vpop.permute.xlu1 %3480 }
 0x71e   : > { %v3793_v36 = vrot.slane %v3481_v61, %v6512_v51 }
 0x71f   : > { %v3487_v11 = vpop.permute.xlu0 %3486 }
 0x720   : > { %v3802_v60 = vrot.slane %v3487_v11, %v6523_v38  ;;  %v3798_v51 = vsel %vm3512_vm14, %v3797_v48, %v3793_v36 }
 0x722   : > { %v3803_v31 = vsel %vm3519_vm15, %v3802_v60, %v3798_v51 }
 0x725   : > { %v3490_v18 = vpop.permute.xlu1 %3489 }
 0x726   : > { %v3807_v53 = vrot.slane %v3490_v18, %v6526_v56 }
 0x727   : > { %v3463_v46 = vpop.permute.xlu0 %3462 }
 0x728   : > { %v3763_v12 = vrot.slane %v3463_v46, %v6523_v38  ;;  %v3740_v38 = vsel %vm3540_vm8, %v3739_v45, %v3735_v44  ;;  %v3808_v11 = vsel %vm3526_vm2, %v3807_v53, %v3803_v31 }
 0x72a   : > { %v3764_v50 = vsel %vm3519_vm15, %v3763_v12, %v3759_v19 }
 0x72c   : > { %v6623_v35 = vpop.permute.xlu0 %3495 }
 0x72d   : > { %v3817_v58 = vrot.slane %v6623_v35, %v6547_v25 }
 0x72e   : > { %v3466_v43 = vpop.permute.xlu1 %3465 }
 0x72f   : > { %v3768_v3 = vrot.slane %v3466_v43, %v6526_v56  ;;  %v3745_v56 = vsel %vm3547_vm11, %v3744_v34, %v3740_v38 }
 0x730   : > { %v3750_v18 = vsel %vm3554_vm1, %v3749_v8, %v3745_v56 }
 0x731   : > { %v3769_v10 = vsel %vm3526_vm2, %v3768_v3, %v3764_v50 }
 0x734   : > { %v3472_v52 = vpop.permute.xlu0 %3471 }
 0x735   : > { %v3778_v40 = vrot.slane %v3472_v52, %v6547_v25 }
 0x73a   : > { %v3493_v49 = vpop.permute.xlu1 %3492 }
 0x73b   : > { %v3812_v30 = vrot.slane %v3493_v49, %v6544_v17 }
 0x73c   : > { %v3469_v14 = vpop.permute.xlu0 %3468 }
 0x73d   : > { %v3773_v13 = vrot.slane %v3469_v14, %v6544_v17  ;;  %v3711_v17 = vsel %vm3554_vm1, %v3710_v26, %v3706_v23  ;;  %v3813_v46 = vsel %vm3533_vm5, %v3812_v30, %v3808_v11 }
 0x73e   : > { %v3836_v37 = vsel %vm3835_vm4, %v3711_v17, %v6615_v33  ;;  %v3818_v16 = vsel %vm3540_vm8, %v3817_v58, %v3813_v46 }
 0x73f   : > { %v3774_v39 = vsel %vm3533_vm5, %v3773_v13, %v3769_v10  ;;  %v3838_v22 = vsel %vm3837_vm6, %v3750_v18, %v3836_v37 }
 0x740   : > { %v3779_v57 = vsel %vm3540_vm8, %v3778_v40, %v3774_v39 }
 0x743   : > { %v3499_v55 = vpop.permute.xlu0 %3498 }
 0x744   : > { %v3822_v61 = vrot.slane %v3499_v55, %v6562_v4 }
 0x746   : > { %v3823_v43 = vsel %vm3547_vm11, %v3822_v61, %v3818_v16 }
 0x749   : > { %v3478_v2 = vpop.permute.xlu1 %3477 }
 0x74a   : > { %v3788_v62 = vrot.slane %v3478_v2, %v6565_v7 }
 0x74d   : > { %v3475_v47 = vpop.permute.xlu1 %3474 }
 0x74e   : > { %v3783_v29 = vrot.slane %v3475_v47, %v6562_v4 }
 0x750   : > { %v3784_v21 = vsel %vm3547_vm11, %v3783_v29, %v3779_v57 }
 0x751   : > { %v3789_v1 = vsel %vm3554_vm1, %v3788_v62, %v3784_v21  ;;  %v3502_v28 = vpop.permute.xlu1 %3501 }
 0x752   : > { %v3827_v4 = vrot.slane %v3502_v28, %v6565_v7  ;;  %v3840_v25 = vsel %vm3839_vm7, %v3789_v1, %v3838_v22  ;;  %v5078_v7 = vpop.eup %5077 }
 0x753   : > { %v4014_v59 = vmul.f32 0.6931472, %v5078_v7 }
 0x754   : > { %v3828_v52 = vsel %vm3554_vm1, %v3827_v4, %v3823_v43 }
 0x755   : > { %v3842_v35 = vsel %vm3841_vm3, %v3828_v52, %v3840_v25  ;;  %v4015_v41 = vmul.f32 0.5, %v4014_v59 }
 0x756   : > { %4610 = vmatmul.mubr.msk.f32.vlgmr.msra.gmra.mxu0 %vm612_vm9, %v3842_v35 }
 0x816   : > { %v3911_v33 = vpop.f32.mrf.mxu0 }
 0x817   : > { %v4009_v9 = vmax.f32 %v3911_v33, 1e-30 }
 0x818   : > { %v4611_v5 = vpop.f32.mrf.mxu0 }
 0x819   : > { %5079 = vlog2.f32 %v4009_v9 }
 0x826   : > { %v5080_v6 = vpop.eup %5079 }
 0x827   : > { %v4011_v0 = vmul.f32 0.6931472, %v5080_v6 }
 0x829   : > { %v4016_v49 = vadd.f32 %v4015_v41, %v4011_v0 }
 0x82b   : > { %v4017_v14 = vmul.f32 0.16666667, %v4016_v49 }
 0x82d   : > { %4018 = vst.msk [vmem:[%s5457_s18] sm:$0xff] %vm750_vm10, %v4017_v14 }
 0x82e PF: > { %s23_s24 = sadd.s32 1, %s5241_s24   ;;  %s6776_s15 = smov %s5205_s16 }
 0x82f   : > { %p20_p9 = scmp.ge.s32.totalorder %s23_s24, 6   ;;  %s6777_s16 = smov %s5209_s17 }
 0x830   : > { %s6778_s17 = smov %s5416_s10  ;;  %s6779_s18 = smov %s5217_s19 }
 0x831   : > { %s6780_s19 = smov %s5221_s20  ;;  %s6781_s20 = smov %s5364_s6 }
 0x832   : > { %s6782_s0 = smov %s5233_s22  ;;  %s6783_s21 = smov %s5237_s23 }
 0x833   : > { %s6784_s22 = smov %s6787_s26  ;;  %s6785_s23 = smov %s6791_s11 }
 0x834   :  { %22 = sbr.rel (!%p20_p9) target bundleno = 15 (0xf), region = 85 }
 0x839   :  { %4046 = vsyncpa [#allocation7], 1 }
 0x83a   :  { %4048 = vsyncpa [#allocation7 + $0x1], 1 }
 0x83b   :  { %4049 = vsyncpa [#allocation9], 1 }
 0x83c   :  { %4051 = vsyncpa [#allocation9 + $0x1], 1 }

</bundles_post_ra>
